<compile_context>
chip_gen: v5e
topology: v5e:2x2
jax: 0.10.0
libtpu: 0.0.40
codegen_flags: <defaults>
</compile_context>

<pallas_src>
import functools

import jax
import jax.numpy as jnp
from jax.experimental import pallas as pl
from jax.experimental.pallas import tpu as pltpu


# ------------------------- hardware-aware sizing ----------------------------

def _tpu_vmem_bytes():
    cap = 64 << 20          # conservative default = v7x per-TensorCore VMEM
    try:
        info = pltpu.get_tpu_info()
        cap = int(getattr(info, "vmem_capacity_bytes", cap)) or cap
    except Exception:
        pass
    return cap


def _num_tensorcores():
    try:
        info = pltpu.get_tpu_info()
        for name in ("num_cores", "core_count", "num_tensorcores"):
            v = getattr(info, name, None)
            if isinstance(v, int) and v > 0:
                return v
    except Exception:
        pass
    return 1


def _vmem_caps():
    cap = _tpu_vmem_bytes()
    budget = min(cap // 2, 48 << 20)          # data blocks + in-kernel temps
    limit = int(min((cap * 3) // 4, 100 << 20))   # requested scoped-VMEM limit
    return budget, limit


def _pick_rb(num_runs, per_run_bytes, budget_bytes, step_multiple=1):
    """Largest rb dividing num_runs whose block (+ temporaries) fits the budget.

    When more than one TensorCore is available, prefer an rb whose grid-step
    count is a multiple of the core count (load-balances the parallel axis);
    on single-TC chips the grid is a sequential loop, so rb is just maximized.
    """
    if num_runs <= 1:
        return 1
    cap = max(1, budget_bytes // max(int(per_run_bytes), 1))
    divisors = [rb for rb in range(1, num_runs + 1)
                if num_runs % rb == 0 and rb <= cap]
    if not divisors:
        return 1
    if step_multiple > 1:
        pref = [rb for rb in divisors if (num_runs // rb) % step_multiple == 0]
        if pref:
            return max(pref)
    return max(divisors)


# ------------------------------ Pallas kernels ------------------------------

def _row_topk(a, k):
    # Keep, per row, the k largest entries (others -> 0).  The diagonal
    # affinity exp(0) = 1.0 is always the row maximum, so the first max round
    # is skipped (thr starts at 1.0): saves one (rb,N,N) lane reduction/hop.
    work = a
    thr = jnp.ones(a.shape[:-1] + (1,), a.dtype)
    for _ in range(int(k) - 1):
        work = jnp.where(work >= thr, -1.0, work)
        thr = jnp.max(work, axis=-1, keepdims=True)
    return jnp.where(a >= thr, a, 0.0)


def _sym_normalize(a):
    d = jax.lax.rsqrt(jnp.sum(a, axis=-1))                      # (rb, N)
    return d[:, None, :] * a * d[:, :, None]


def _khop_kernel(x_ref, xo_ref, w_ref, *, lam, link_rate, k_hop):
    # Fused k_hop graph smoothing, batched over rb runs per grid step.
    x0 = x_ref[...].astype(jnp.float32)                         # (rb, N, D)
    rb, n, _ = x0.shape
    # Run-invariant (N, N) identity mask (no per-run int32 temporaries).
    row = jax.lax.broadcasted_iota(jnp.int32, (n, n), 0)
    col = jax.lax.broadcasted_iota(jnp.int32, (n, n), 1)
    iden = (row == col).astype(jnp.float32)[None]               # (1, N, N)

    def hop(_, carry):
        x, _g = carry
        # exp(-lam * squared pairwise distance), Gram-matrix trick.  Kept f32:
        # cancellation-sensitive, feeds exp(-lam*d2).
        sq = jnp.sum(x * x, axis=-1)                            # (rb, N)
        gram = jax.lax.dot_general(
            x, x, (((2,), (2,)), ((0,), (0,))),
            preferred_element_type=jnp.float32)                 # (rb, N, N)
        d2 = jnp.maximum(sq[:, :, None] + sq[:, None, :] - 2.0 * gram, 0.0)
        aff = jnp.exp(-lam * d2)
        # Row top-k sparsification in VMEM (no one_hot/einsum scatter).
        a = _row_topk(aff, link_rate)
        # graph_convolution keeps the self-affinity diagonal here (reference
        # semantics, unlike build_graph) -- preserved.
        w = _sym_normalize(a)
        # The two N^3 smoothing matmuls are not cancellation-sensitive
        # (entries in [0,1]): bf16 inputs, f32 accumulation.
        l = (0.5 * iden + 0.5 * w).astype(jnp.bfloat16)
        g = jax.lax.dot_general(                                # G = L @ L
            l, l, (((2,), (1,)), ((0,), (0,))),
            preferred_element_type=jnp.float32)
        x_new = jax.lax.dot_general(                            # X = G @ X
            g.astype(jnp.bfloat16), x.astype(jnp.bfloat16),
            (((2,), (1,)), ((0,), (0,))),
            preferred_element_type=jnp.float32)
        return x_new, g

    x, g = jax.lax.fori_loop(
        0, int(k_hop), hop, (x0, jnp.zeros((rb, n, n), jnp.float32)))

    # build_graph applied twice to the last G: the reference applies it at the
    # end of the loop body and once more after the loop; all earlier in-loop
    # applications are dead and hoisted away.
    def build_graph(m):
        return _sym_normalize(m * (1.0 - iden))

    xo_ref[...] = x
    w_ref[...] = build_graph(build_graph(g))


def khop_graph(features, *, lam, link_rate, k_hop, rb, vmem_limit):
    R, N, D = features.shape
    kern = functools.partial(_khop_kernel, lam=float(lam),
                             link_rate=int(link_rate), k_hop=int(k_hop))
    return pl.pallas_call(
        kern,
        out_shape=(jax.ShapeDtypeStruct((R, N, D), jnp.float32),
                   jax.ShapeDtypeStruct((R, N, N), jnp.float32)),
        grid=(R // rb,),
        in_specs=[pl.BlockSpec((rb, N, D), lambda r: (r, 0, 0))],
        out_specs=(pl.BlockSpec((rb, N, D), lambda r: (r, 0, 0)),
                   pl.BlockSpec((rb, N, N), lambda r: (r, 0, 0))),
        compiler_params=pltpu.CompilerParams(
            dimension_semantics=("parallel",),
            vmem_limit_bytes=vmem_limit),
    )(features)


def _query_prob_kernel(x_ref, p_ref, o_ref, *, lam):
    # exp(-lam * cdist(query_features, proto)^2), emitted lane-dense as
    # (rb, ways, Nq): the lane axis carries Nq, not ways.  (Nq < 128 still
    # pads the lane axis; acceptable per review.)
    x = x_ref[...].astype(jnp.float32)                          # (rb, Nq, D)
    p = p_ref[...].astype(jnp.float32)                          # (rb, W, D)
    xs = jnp.sum(x * x, axis=-1)                                # (rb, Nq)
    ps = jnp.sum(p * p, axis=-1)                                # (rb, W)
    g = jax.lax.dot_general(
        p, x, (((2,), (2,)), ((0,), (0,))),
        preferred_element_type=jnp.float32)                     # (rb, W, Nq)
    d2 = jnp.maximum(ps[:, :, None] + xs[:, None, :] - 2.0 * g, 0.0)
    o_ref[...] = jnp.exp(-lam * d2)


def query_prob(features_q, proto, *, lam, rb, vmem_limit):
    R, Nq, D = features_q.shape
    W = proto.shape[1]
    kern = functools.partial(_query_prob_kernel, lam=float(lam))
    return pl.pallas_call(
        kern,
        out_shape=jax.ShapeDtypeStruct((R, W, Nq), jnp.float32),
        grid=(R // rb,),
        in_specs=[pl.BlockSpec((rb, Nq, D), lambda r: (r, 0, 0)),
                  pl.BlockSpec((rb, W, D), lambda r: (r, 0, 0))],
        out_specs=pl.BlockSpec((rb, W, Nq), lambda r: (r, 0, 0)),
        compiler_params=pltpu.CompilerParams(
            dimension_semantics=("parallel",),
            vmem_limit_bytes=vmem_limit),
    )(features_q, proto)


def _propagate_kernel(z_ref, w_ref, o_ref):
    # Z_new^T = Z^T @ Inv(I - aW)^T  with Z kept lane-dense as (rb, W, N).
    z = z_ref[...].astype(jnp.float32)                          # (rb, W, N)
    w = w_ref[...].astype(jnp.float32)                          # bf16 -> f32
    o_ref[...] = jax.lax.dot_general(
        z, w, (((2,), (2,)), ((0,), (0,))),
        preferred_element_type=jnp.float32)                     # (rb, W, N)


def propagate(z_t, inverse_w, *, rb, vmem_limit):
    R, W, N = z_t.shape
    return pl.pallas_call(
        _propagate_kernel,
        out_shape=jax.ShapeDtypeStruct((R, W, N), jnp.float32),
        grid=(R // rb,),
        in_specs=[pl.BlockSpec((rb, W, N), lambda r: (r, 0, 0)),
                  pl.BlockSpec((rb, N, N), lambda r: (r, 0, 0))],
        out_specs=pl.BlockSpec((rb, W, N), lambda r: (r, 0, 0)),
        compiler_params=pltpu.CompilerParams(
            dimension_semantics=("parallel",),
            vmem_limit_bytes=vmem_limit),
    )(z_t, inverse_w)


def _proto_update_kernel(z_ref, x_ref, p_ref, o_ref, *, rate):
    # new_proto = (Z^T @ X) / Z.sum(over N);  proto = (1-rate)*proto + rate*new
    z = z_ref[...].astype(jnp.float32)                          # (rb, W, N)
    x = x_ref[...].astype(jnp.float32)                          # (rb, N, D)
    p = p_ref[...].astype(jnp.float32)                          # (rb, W, D)
    num = jax.lax.dot_general(
        z, x, (((2,), (1,)), ((0,), (0,))),
        preferred_element_type=jnp.float32)                     # (rb, W, D)
    den = jnp.sum(z, axis=2)                                    # (rb, W)
    # Reference divides with no epsilon; Sinkhorn class-balance keeps den > 0.
    o_ref[...] = (1.0 - rate) * p + rate * (num / den[:, :, None])


def proto_update(z_t, features, proto, *, rate, rb, vmem_limit):
    R, W, N = z_t.shape
    D = features.shape[-1]
    kern = functools.partial(_proto_update_kernel, rate=float(rate))
    return pl.pallas_call(
        kern,
        out_shape=jax.ShapeDtypeStruct((R, W, D), jnp.float32),
        grid=(R // rb,),
        in_specs=[pl.BlockSpec((rb, W, N), lambda r: (r, 0, 0)),
                  pl.BlockSpec((rb, N, D), lambda r: (r, 0, 0)),
                  pl.BlockSpec((rb, W, D), lambda r: (r, 0, 0))],
        out_specs=pl.BlockSpec((rb, W, D), lambda r: (r, 0, 0)),
        compiler_params=pltpu.CompilerParams(
            dimension_semantics=("parallel",),
            vmem_limit_bytes=vmem_limit),
    )(z_t, features, proto)


# -------------------------------- JAX glue ----------------------------------

def compute_optimal_transport_t(m_t, n_lsamples, labels, epsilon=1e-6,
                                class_balance=True):
    # Sinkhorn with data-dependent stopping, on the transposed (R, ways, n)
    # layout (lane-dense Z) -- stays in XLA (lax.while_loop).
    n_runs, ways, n = m_t.shape
    c = (jnp.ones((n_runs, ways), jnp.float32) * n) // ways
    maxiters = 1000
    lab_onehot_t = None
    if n_lsamples > 0:
        lab_onehot_t = (labels[:, None, :n_lsamples]
                        == jnp.arange(ways, dtype=labels.dtype)[None, :, None]
                        ).astype(m_t.dtype)                     # (R, W, ns)

    def cond_fn(state):
        p, u, it = state
        return jnp.logical_and(jnp.max(jnp.abs(u - p.sum(1))) > epsilon,
                               it <= maxiters)

    def body_fn(state):
        p, _, it = state
        u = p.sum(1)                                            # (R, n)
        p = p * (1.0 / u)[:, None, :]
        if class_balance:
            p = p * (c / p.sum(2))[:, :, None]
        if n_lsamples > 0:
            p = p.at[:, :, :n_lsamples].set(lab_onehot_t)
        return (p, u, it + 1)

    u0 = jnp.zeros((n_runs, n), m_t.dtype)
    p, _, _ = jax.lax.while_loop(cond_fn, body_fn, (m_t, u0, jnp.int32(1)))
    return p


def soft_label_propagation(xs, xq, ys, yq, *, runs, ways, shot, queries,
                           lam=10.0, alpha=0.7, link_rate=6, update_rate=0.6,
                           k_hop=4, epochs=10, balance=True):
    del queries  # kept only for signature parity with the nn.Module __init__
    ns = ways * shot
    features = jnp.concatenate([xs, xq], axis=1).astype(jnp.float32)
    labels = jnp.concatenate([ys, yq], axis=1)
    R, N, D = features.shape
    Nq = N - ns
    W = ways

    budget, vmem_limit = _vmem_caps()
    step_mult = _num_tensorcores()

    # Per-kernel rb: the khop footprint (double-buffered in/out blocks plus
    # ~10-12 live (rb,N,N) f32 hop temporaries) is far larger than that of the
    # per-epoch kernels, which therefore get their own (bigger) rb.
    rb_khop = _pick_rb(R, 4 * (6 * N * D + 12 * N * N), budget, step_mult)
    rb_prob = _pick_rb(R, 4 * (2 * Nq * D + 2 * W * D + 5 * W * Nq), budget, step_mult)
    rb_prop = _pick_rb(R, 8 * N * N + 20 * W * N, budget, step_mult)
    rb_upd = _pick_rb(R, 4 * (2 * W * N + 2 * N * D + 6 * W * D), budget, step_mult)

    # Fused k_hop chain + final double build_graph (single pallas_call).
    features, w = khop_graph(features, lam=lam, link_rate=link_rate,
                             k_hop=k_hop, rb=rb_khop, vmem_limit=vmem_limit)

    proto = features[:, :ns].reshape(runs, ways, shot, -1).mean(axis=2)

    iden = jnp.eye(N, dtype=jnp.float32)[None]
    # TODO(synk): batched matrix inverse has no clean Pallas equivalent; kept in XLA.
    # Stored bf16 in HBM: propagate() is HBM-bandwidth-bound and re-reads this
    # (R,N,N) operand every epoch; it is upcast to f32 inside the kernel.
    inverse_w = jnp.linalg.inv(iden - alpha * w).astype(jnp.bfloat16)

    feat_q = features[:, ns:]                      # query rows only (constant)
    # Support one-hot labels, stored lane-dense as (R, W, ns).
    p_sup_t = (ys[:, None, :] == jnp.arange(ways, dtype=ys.dtype)[None, :, None]
               ).astype(jnp.float32)

    def get_prob(proto):
        # (R, W, Nq): lane axis carries Nq; exp fused in-kernel.
        pq_t = query_prob(feat_q, proto, lam=lam, rb=rb_prob,
                          vmem_limit=vmem_limit)
        pq_t = compute_optimal_transport_t(pq_t, 0, ys, 0.001, balance)
        return jnp.concatenate([p_sup_t, pq_t], axis=2)        # (R, W, N)

    for _ in range(int(epochs)):
        z_t = get_prob(proto)
        z_t = propagate(z_t, inverse_w, rb=rb_prop, vmem_limit=vmem_limit)
        z_t = compute_optimal_transport_t(z_t, ns, ys, 0.001, balance)
        proto = proto_update(z_t, features, proto, rate=update_rate,
                             rb=rb_upd, vmem_limit=vmem_limit)

    z_t = get_prob(proto)
    olabels = jnp.argmax(z_t, axis=1)                           # (R, N)
    matches = (labels == olabels).astype(jnp.float32)
    acc_test = matches[:, ns:].mean(axis=1)
    return acc_test


# ---------------------------------- main -------------------------------------

if __name__ == "__main__":
    runs, ways, shot, queries, dim = 2, 4, 2, 2, 32
    ns, qs = ways * shot, ways * queries

    key = jax.random.PRNGKey(0)
    k1, k2 = jax.random.split(key)
    # Scale features so exp(-lam * dist^2) affinities stay non-degenerate.
    xs = 0.1 * jax.random.normal(k1, (runs, ns, dim), jnp.float32)
    xq = 0.1 * jax.random.normal(k2, (runs, qs, dim), jnp.float32)
    ys = jnp.tile(jnp.repeat(jnp.arange(ways, dtype=jnp.int32), shot)[None], (runs, 1))
    yq = jnp.tile(jnp.repeat(jnp.arange(ways, dtype=jnp.int32), queries)[None], (runs, 1))

    fwd = jax.jit(functools.partial(
        soft_label_propagation,
        runs=runs, ways=ways, shot=shot, queries=queries,
        lam=1.0, alpha=0.7, link_rate=6, update_rate=0.6,
        k_hop=2, epochs=3, balance=True))

    acc = fwd(xs, xq, ys, yq)
    jax.block_until_ready(acc)
    assert acc.shape == (runs,)
    assert bool(jnp.all(jnp.isfinite(acc)))
    print("KERNEL_OK")
</pallas_src>

<mosaic_0001>
module attributes {stable_mosaic.version = 11 : i64} {
  func.func @_khop_kernel(%arg0: i32, %arg1: memref<2x16x32xf32, #tpu.memory_space<vmem>>, %arg2: memref<2x16x32xf32, #tpu.memory_space<vmem>>, %arg3: memref<2x16x16xf32, #tpu.memory_space<vmem>>) attributes {dimension_semantics = [#tpu.dimension_semantics<parallel>], iteration_bounds = array<i64: 1>, scalar_prefetch = 0 : i64, scratch_operands = 0 : i64, tpu.core_type = #tpu.core_type<tc>, window_params = [{transform_indices = @transform_0, window_bounds = array<i64: 2, 16, 32>}, {transform_indices = @transform_1, window_bounds = array<i64: 2, 16, 32>}, {transform_indices = @transform_2, window_bounds = array<i64: 2, 16, 16>}]} {
    %c0 = arith.constant 0 : index
    %c0_0 = arith.constant 0 : index
    %c0_1 = arith.constant 0 : index
    %0 = vector.load %arg1[%c0, %c0_0, %c0_1] : memref<2x16x32xf32, #tpu.memory_space<vmem>>, vector<2x16x32xf32>
    %1 = tpu.iota {dimensions = array<i32: 0>} : vector<16x16xi32>
    %2 = tpu.iota {dimensions = array<i32: 1>} : vector<16x16xi32>
    %3 = arith.cmpi eq, %1, %2 : vector<16x16xi32>
    %4 = arith.extui %3 : vector<16x16xi1> to vector<16x16xi32>
    %5 = arith.sitofp %4 : vector<16x16xi32> to vector<16x16xf32>
    %6 = vector.shape_cast %5 : vector<16x16xf32> to vector<1x16x16xf32>
    %cst = arith.constant 0.000000e+00 : f32
    %7 = vector.broadcast %cst : f32 to vector<2x16x16xf32>
    %c0_i32 = arith.constant 0 : i32
    %c2_i32 = arith.constant 2 : i32
    %8 = arith.addi %c0_i32, %c2_i32 : i32
    %c1_i32 = arith.constant 1 : i32
    %9:2 = scf.for %arg4 = %c0_i32 to %8 step %c1_i32 iter_args(%arg5 = %0, %arg6 = %7) -> (vector<2x16x32xf32>, vector<2x16x16xf32>)  : i32 {
      %36 = arith.mulf %arg5, %arg5 : vector<2x16x32xf32>
      %cst_12 = arith.constant dense<0.000000e+00> : vector<2x16xf32>
      %37 = vector.multi_reduction <add>, %36, %cst_12 [2] : vector<2x16x32xf32> to vector<2x16xf32>
      %cst_13 = arith.constant dense<0.000000e+00> : vector<2x16x16xf32>
      %38 = tpu.matmul %arg5, %arg5, %cst_13 {dimension_numbers = #tpu.dot_dimension_numbers<[2], [2], [1], [1], [0, 0, 0, 1, 1, 1], [0], [0]>} : vector<2x16x32xf32>, vector<2x16x32xf32>, vector<2x16x16xf32> -> vector<2x16x16xf32>
      %39 = vector.shape_cast %37 : vector<2x16xf32> to vector<2x16x1xf32>
      %40 = vector.shape_cast %37 : vector<2x16xf32> to vector<2x1x16xf32>
      %41 = vector.broadcast %39 : vector<2x16x1xf32> to vector<2x16x16xf32>
      %42 = vector.broadcast %40 : vector<2x1x16xf32> to vector<2x16x16xf32>
      %43 = arith.addf %41, %42 : vector<2x16x16xf32>
      %cst_14 = arith.constant 2.000000e+00 : f32
      %44 = vector.broadcast %cst_14 : f32 to vector<2x16x16xf32>
      %45 = arith.mulf %44, %38 : vector<2x16x16xf32>
      %46 = arith.subf %43, %45 : vector<2x16x16xf32>
      %cst_15 = arith.constant 0.000000e+00 : f32
      %47 = vector.broadcast %cst_15 : f32 to vector<2x16x16xf32>
      %48 = arith.maximumf %46, %47 : vector<2x16x16xf32>
      %cst_16 = arith.constant -1.000000e+00 : f32
      %49 = vector.broadcast %cst_16 : f32 to vector<2x16x16xf32>
      %50 = arith.mulf %49, %48 : vector<2x16x16xf32>
      %51 = math.exp %50 : vector<2x16x16xf32>
      %cst_17 = arith.constant 1.000000e+00 : f32
      %52 = vector.broadcast %cst_17 : f32 to vector<2x16x1xf32>
      %53 = vector.broadcast %52 : vector<2x16x1xf32> to vector<2x16x16xf32>
      %54 = arith.cmpf oge, %51, %53 : vector<2x16x16xf32>
      %cst_18 = arith.constant -1.000000e+00 : f32
      %55 = vector.broadcast %cst_18 : f32 to vector<2x16x16xf32>
      %56 = arith.select %54, %55, %51 : vector<2x16x16xi1>, vector<2x16x16xf32>
      %cst_19 = arith.constant dense<0xFF800000> : vector<2x16xf32>
      %57 = vector.multi_reduction <maximumf>, %56, %cst_19 [2] : vector<2x16x16xf32> to vector<2x16xf32>
      %58 = vector.shape_cast %57 : vector<2x16xf32> to vector<2x16x1xf32>
      %59 = vector.broadcast %58 : vector<2x16x1xf32> to vector<2x16x16xf32>
      %60 = arith.cmpf oge, %56, %59 : vector<2x16x16xf32>
      %cst_20 = arith.constant -1.000000e+00 : f32
      %61 = vector.broadcast %cst_20 : f32 to vector<2x16x16xf32>
      %62 = arith.select %60, %61, %56 : vector<2x16x16xi1>, vector<2x16x16xf32>
      %cst_21 = arith.constant dense<0xFF800000> : vector<2x16xf32>
      %63 = vector.multi_reduction <maximumf>, %62, %cst_21 [2] : vector<2x16x16xf32> to vector<2x16xf32>
      %64 = vector.shape_cast %63 : vector<2x16xf32> to vector<2x16x1xf32>
      %65 = vector.broadcast %64 : vector<2x16x1xf32> to vector<2x16x16xf32>
      %66 = arith.cmpf oge, %62, %65 : vector<2x16x16xf32>
      %cst_22 = arith.constant -1.000000e+00 : f32
      %67 = vector.broadcast %cst_22 : f32 to vector<2x16x16xf32>
      %68 = arith.select %66, %67, %62 : vector<2x16x16xi1>, vector<2x16x16xf32>
      %cst_23 = arith.constant dense<0xFF800000> : vector<2x16xf32>
      %69 = vector.multi_reduction <maximumf>, %68, %cst_23 [2] : vector<2x16x16xf32> to vector<2x16xf32>
      %70 = vector.shape_cast %69 : vector<2x16xf32> to vector<2x16x1xf32>
      %71 = vector.broadcast %70 : vector<2x16x1xf32> to vector<2x16x16xf32>
      %72 = arith.cmpf oge, %68, %71 : vector<2x16x16xf32>
      %cst_24 = arith.constant -1.000000e+00 : f32
      %73 = vector.broadcast %cst_24 : f32 to vector<2x16x16xf32>
      %74 = arith.select %72, %73, %68 : vector<2x16x16xi1>, vector<2x16x16xf32>
      %cst_25 = arith.constant dense<0xFF800000> : vector<2x16xf32>
      %75 = vector.multi_reduction <maximumf>, %74, %cst_25 [2] : vector<2x16x16xf32> to vector<2x16xf32>
      %76 = vector.shape_cast %75 : vector<2x16xf32> to vector<2x16x1xf32>
      %77 = vector.broadcast %76 : vector<2x16x1xf32> to vector<2x16x16xf32>
      %78 = arith.cmpf oge, %74, %77 : vector<2x16x16xf32>
      %cst_26 = arith.constant -1.000000e+00 : f32
      %79 = vector.broadcast %cst_26 : f32 to vector<2x16x16xf32>
      %80 = arith.select %78, %79, %74 : vector<2x16x16xi1>, vector<2x16x16xf32>
      %cst_27 = arith.constant dense<0xFF800000> : vector<2x16xf32>
      %81 = vector.multi_reduction <maximumf>, %80, %cst_27 [2] : vector<2x16x16xf32> to vector<2x16xf32>
      %82 = vector.shape_cast %81 : vector<2x16xf32> to vector<2x16x1xf32>
      %83 = vector.broadcast %82 : vector<2x16x1xf32> to vector<2x16x16xf32>
      %84 = arith.cmpf oge, %51, %83 : vector<2x16x16xf32>
      %cst_28 = arith.constant 0.000000e+00 : f32
      %85 = vector.broadcast %cst_28 : f32 to vector<2x16x16xf32>
      %86 = arith.select %84, %51, %85 : vector<2x16x16xi1>, vector<2x16x16xf32>
      %cst_29 = arith.constant dense<0.000000e+00> : vector<2x16xf32>
      %87 = vector.multi_reduction <add>, %86, %cst_29 [2] : vector<2x16x16xf32> to vector<2x16xf32>
      %88 = math.rsqrt %87 : vector<2x16xf32>
      %89 = vector.shape_cast %88 : vector<2x16xf32> to vector<2x1x16xf32>
      %90 = vector.broadcast %89 : vector<2x1x16xf32> to vector<2x16x16xf32>
      %91 = arith.mulf %90, %86 : vector<2x16x16xf32>
      %92 = vector.shape_cast %88 : vector<2x16xf32> to vector<2x16x1xf32>
      %93 = vector.broadcast %92 : vector<2x16x1xf32> to vector<2x16x16xf32>
      %94 = arith.mulf %91, %93 : vector<2x16x16xf32>
      %cst_30 = arith.constant 5.000000e-01 : f32
      %95 = vector.broadcast %cst_30 : f32 to vector<1x16x16xf32>
      %96 = arith.mulf %95, %6 : vector<1x16x16xf32>
      %cst_31 = arith.constant 5.000000e-01 : f32
      %97 = vector.broadcast %cst_31 : f32 to vector<2x16x16xf32>
      %98 = arith.mulf %97, %94 : vector<2x16x16xf32>
      %99 = vector.broadcast %96 : vector<1x16x16xf32> to vector<2x16x16xf32>
      %100 = arith.addf %99, %98 : vector<2x16x16xf32>
      %101 = arith.truncf %100 : vector<2x16x16xf32> to vector<2x16x16xbf16>
      %cst_32 = arith.constant dense<0.000000e+00> : vector<2x16x16xf32>
      %102 = tpu.matmul %101, %101, %cst_32 {dimension_numbers = #tpu.dot_dimension_numbers<[2], [1], [1], [2], [0, 0, 0, 1, 1, 2], [0], [0]>} : vector<2x16x16xbf16>, vector<2x16x16xbf16>, vector<2x16x16xf32> -> vector<2x16x16xf32>
      %103 = arith.truncf %102 : vector<2x16x16xf32> to vector<2x16x16xbf16>
      %104 = arith.truncf %arg5 : vector<2x16x32xf32> to vector<2x16x32xbf16>
      %cst_33 = arith.constant dense<0.000000e+00> : vector<2x16x32xf32>
      %105 = tpu.matmul %103, %104, %cst_33 {dimension_numbers = #tpu.dot_dimension_numbers<[2], [1], [1], [2], [0, 0, 0, 1, 1, 2], [0], [0]>} : vector<2x16x16xbf16>, vector<2x16x32xbf16>, vector<2x16x32xf32> -> vector<2x16x32xf32>
      scf.yield %105, %102 : vector<2x16x32xf32>, vector<2x16x16xf32>
    }
    %c0_2 = arith.constant 0 : index
    %c0_3 = arith.constant 0 : index
    %c0_4 = arith.constant 0 : index
    %10 = vector.load %arg2[%c0_2, %c0_3, %c0_4] : memref<2x16x32xf32, #tpu.memory_space<vmem>>, vector<2x16x32xf32>
    tpu.vector_store %arg2[%c0_2, %c0_3, %c0_4], %9#0 {strides = array<i32>} : memref<2x16x32xf32, #tpu.memory_space<vmem>>, vector<2x16x32xf32>,
    %cst_5 = arith.constant 1.000000e+00 : f32
    %11 = vector.broadcast %cst_5 : f32 to vector<1x16x16xf32>
    %12 = arith.subf %11, %6 : vector<1x16x16xf32>
    %13 = vector.broadcast %12 : vector<1x16x16xf32> to vector<2x16x16xf32>
    %14 = arith.mulf %9#1, %13 : vector<2x16x16xf32>
    %cst_6 = arith.constant dense<0.000000e+00> : vector<2x16xf32>
    %15 = vector.multi_reduction <add>, %14, %cst_6 [2] : vector<2x16x16xf32> to vector<2x16xf32>
    %16 = math.rsqrt %15 : vector<2x16xf32>
    %17 = vector.shape_cast %16 : vector<2x16xf32> to vector<2x1x16xf32>
    %18 = vector.broadcast %17 : vector<2x1x16xf32> to vector<2x16x16xf32>
    %19 = arith.mulf %18, %14 : vector<2x16x16xf32>
    %20 = vector.shape_cast %16 : vector<2x16xf32> to vector<2x16x1xf32>
    %21 = vector.broadcast %20 : vector<2x16x1xf32> to vector<2x16x16xf32>
    %22 = arith.mulf %19, %21 : vector<2x16x16xf32>
    %cst_7 = arith.constant 1.000000e+00 : f32
    %23 = vector.broadcast %cst_7 : f32 to vector<1x16x16xf32>
    %24 = arith.subf %23, %6 : vector<1x16x16xf32>
    %25 = vector.broadcast %24 : vector<1x16x16xf32> to vector<2x16x16xf32>
    %26 = arith.mulf %22, %25 : vector<2x16x16xf32>
    %cst_8 = arith.constant dense<0.000000e+00> : vector<2x16xf32>
    %27 = vector.multi_reduction <add>, %26, %cst_8 [2] : vector<2x16x16xf32> to vector<2x16xf32>
    %28 = math.rsqrt %27 : vector<2x16xf32>
    %29 = vector.shape_cast %28 : vector<2x16xf32> to vector<2x1x16xf32>
    %30 = vector.broadcast %29 : vector<2x1x16xf32> to vector<2x16x16xf32>
    %31 = arith.mulf %30, %26 : vector<2x16x16xf32>
    %32 = vector.shape_cast %28 : vector<2x16xf32> to vector<2x16x1xf32>
    %33 = vector.broadcast %32 : vector<2x16x1xf32> to vector<2x16x16xf32>
    %34 = arith.mulf %31, %33 : vector<2x16x16xf32>
    %c0_9 = arith.constant 0 : index
    %c0_10 = arith.constant 0 : index
    %c0_11 = arith.constant 0 : index
    %35 = vector.load %arg3[%c0_9, %c0_10, %c0_11] : memref<2x16x16xf32, #tpu.memory_space<vmem>>, vector<2x16x16xf32>
    tpu.vector_store %arg3[%c0_9, %c0_10, %c0_11], %34 {strides = array<i32>} : memref<2x16x16xf32, #tpu.memory_space<vmem>>, vector<2x16x16xf32>,
    return
  }
  func.func @transform_0(%arg0: i32) -> (i32, i32, i32) {
    %c0_i32 = arith.constant 0 : i32
    %c0_i32_0 = arith.constant 0 : i32
    %c0_i32_1 = arith.constant 0 : i32
    return %arg0, %c0_i32, %c0_i32_0 : i32, i32, i32
  }
  func.func @transform_1(%arg0: i32) -> (i32, i32, i32) {
    %c0_i32 = arith.constant 0 : i32
    %c0_i32_0 = arith.constant 0 : i32
    %c0_i32_1 = arith.constant 0 : i32
    return %arg0, %c0_i32, %c0_i32_0 : i32, i32, i32
  }
  func.func @transform_2(%arg0: i32) -> (i32, i32, i32) {
    %c0_i32 = arith.constant 0 : i32
    %c0_i32_0 = arith.constant 0 : i32
    %c0_i32_1 = arith.constant 0 : i32
    return %arg0, %c0_i32, %c0_i32_0 : i32, i32, i32
  }
}

module attributes {stable_mosaic.version = 11 : i64} {
  func.func @_query_prob_kernel(%arg0: i32, %arg1: memref<2x8x32xf32, #tpu.memory_space<vmem>>, %arg2: memref<2x4x32xf32, #tpu.memory_space<vmem>>, %arg3: memref<2x4x8xf32, #tpu.memory_space<vmem>>) attributes {dimension_semantics = [#tpu.dimension_semantics<parallel>], iteration_bounds = array<i64: 1>, scalar_prefetch = 0 : i64, scratch_operands = 0 : i64, tpu.core_type = #tpu.core_type<tc>, window_params = [{transform_indices = @transform_0, window_bounds = array<i64: 2, 8, 32>}, {transform_indices = @transform_1, window_bounds = array<i64: 2, 4, 32>}, {transform_indices = @transform_2, window_bounds = array<i64: 2, 4, 8>}]} {
    %c0 = arith.constant 0 : index
    %c0_0 = arith.constant 0 : index
    %c0_1 = arith.constant 0 : index
    %0 = vector.load %arg1[%c0, %c0_0, %c0_1] : memref<2x8x32xf32, #tpu.memory_space<vmem>>, vector<2x8x32xf32>
    %c0_2 = arith.constant 0 : index
    %c0_3 = arith.constant 0 : index
    %c0_4 = arith.constant 0 : index
    %1 = vector.load %arg2[%c0_2, %c0_3, %c0_4] : memref<2x4x32xf32, #tpu.memory_space<vmem>>, vector<2x4x32xf32>
    %2 = arith.mulf %0, %0 : vector<2x8x32xf32>
    %cst = arith.constant dense<0.000000e+00> : vector<2x8xf32>
    %3 = vector.multi_reduction <add>, %2, %cst [2] : vector<2x8x32xf32> to vector<2x8xf32>
    %4 = arith.mulf %1, %1 : vector<2x4x32xf32>
    %cst_5 = arith.constant dense<0.000000e+00> : vector<2x4xf32>
    %5 = vector.multi_reduction <add>, %4, %cst_5 [2] : vector<2x4x32xf32> to vector<2x4xf32>
    %cst_6 = arith.constant dense<0.000000e+00> : vector<2x4x8xf32>
    %6 = tpu.matmul %1, %0, %cst_6 {dimension_numbers = #tpu.dot_dimension_numbers<[2], [2], [1], [1], [0, 0, 0, 1, 1, 1], [0], [0]>} : vector<2x4x32xf32>, vector<2x8x32xf32>, vector<2x4x8xf32> -> vector<2x4x8xf32>
    %7 = vector.shape_cast %5 : vector<2x4xf32> to vector<2x4x1xf32>
    %8 = vector.shape_cast %3 : vector<2x8xf32> to vector<2x1x8xf32>
    %9 = vector.broadcast %7 : vector<2x4x1xf32> to vector<2x4x8xf32>
    %10 = vector.broadcast %8 : vector<2x1x8xf32> to vector<2x4x8xf32>
    %11 = arith.addf %9, %10 : vector<2x4x8xf32>
    %cst_7 = arith.constant 2.000000e+00 : f32
    %12 = vector.broadcast %cst_7 : f32 to vector<2x4x8xf32>
    %13 = arith.mulf %12, %6 : vector<2x4x8xf32>
    %14 = arith.subf %11, %13 : vector<2x4x8xf32>
    %cst_8 = arith.constant 0.000000e+00 : f32
    %15 = vector.broadcast %cst_8 : f32 to vector<2x4x8xf32>
    %16 = arith.maximumf %14, %15 : vector<2x4x8xf32>
    %cst_9 = arith.constant -1.000000e+00 : f32
    %17 = vector.broadcast %cst_9 : f32 to vector<2x4x8xf32>
    %18 = arith.mulf %17, %16 : vector<2x4x8xf32>
    %19 = math.exp %18 : vector<2x4x8xf32>
    %c0_10 = arith.constant 0 : index
    %c0_11 = arith.constant 0 : index
    %c0_12 = arith.constant 0 : index
    %20 = vector.load %arg3[%c0_10, %c0_11, %c0_12] : memref<2x4x8xf32, #tpu.memory_space<vmem>>, vector<2x4x8xf32>
    tpu.vector_store %arg3[%c0_10, %c0_11, %c0_12], %19 {strides = array<i32>} : memref<2x4x8xf32, #tpu.memory_space<vmem>>, vector<2x4x8xf32>,
    return
  }
  func.func @transform_0(%arg0: i32) -> (i32, i32, i32) {
    %c0_i32 = arith.constant 0 : i32
    %c0_i32_0 = arith.constant 0 : i32
    %c0_i32_1 = arith.constant 0 : i32
    return %arg0, %c0_i32, %c0_i32_0 : i32, i32, i32
  }
  func.func @transform_1(%arg0: i32) -> (i32, i32, i32) {
    %c0_i32 = arith.constant 0 : i32
    %c0_i32_0 = arith.constant 0 : i32
    %c0_i32_1 = arith.constant 0 : i32
    return %arg0, %c0_i32, %c0_i32_0 : i32, i32, i32
  }
  func.func @transform_2(%arg0: i32) -> (i32, i32, i32) {
    %c0_i32 = arith.constant 0 : i32
    %c0_i32_0 = arith.constant 0 : i32
    %c0_i32_1 = arith.constant 0 : i32
    return %arg0, %c0_i32, %c0_i32_0 : i32, i32, i32
  }
}

module attributes {stable_mosaic.version = 11 : i64} {
  func.func @_propagate_kernel(%arg0: i32, %arg1: memref<2x4x16xf32, #tpu.memory_space<vmem>>, %arg2: memref<2x16x16xbf16, #tpu.memory_space<vmem>>, %arg3: memref<2x4x16xf32, #tpu.memory_space<vmem>>) attributes {dimension_semantics = [#tpu.dimension_semantics<parallel>], iteration_bounds = array<i64: 1>, scalar_prefetch = 0 : i64, scratch_operands = 0 : i64, tpu.core_type = #tpu.core_type<tc>, window_params = [{transform_indices = @transform_0, window_bounds = array<i64: 2, 4, 16>}, {transform_indices = @transform_1, window_bounds = array<i64: 2, 16, 16>}, {transform_indices = @transform_2, window_bounds = array<i64: 2, 4, 16>}]} {
    %c0 = arith.constant 0 : index
    %c0_0 = arith.constant 0 : index
    %c0_1 = arith.constant 0 : index
    %0 = vector.load %arg1[%c0, %c0_0, %c0_1] : memref<2x4x16xf32, #tpu.memory_space<vmem>>, vector<2x4x16xf32>
    %c0_2 = arith.constant 0 : index
    %c0_3 = arith.constant 0 : index
    %c0_4 = arith.constant 0 : index
    %1 = vector.load %arg2[%c0_2, %c0_3, %c0_4] : memref<2x16x16xbf16, #tpu.memory_space<vmem>>, vector<2x16x16xbf16>
    %2 = arith.extf %1 : vector<2x16x16xbf16> to vector<2x16x16xf32>
    %cst = arith.constant dense<0.000000e+00> : vector<2x4x16xf32>
    %3 = tpu.matmul %0, %2, %cst {dimension_numbers = #tpu.dot_dimension_numbers<[2], [2], [1], [1], [0, 0, 0, 1, 1, 1], [0], [0]>} : vector<2x4x16xf32>, vector<2x16x16xf32>, vector<2x4x16xf32> -> vector<2x4x16xf32>
    %c0_5 = arith.constant 0 : index
    %c0_6 = arith.constant 0 : index
    %c0_7 = arith.constant 0 : index
    %4 = vector.load %arg3[%c0_5, %c0_6, %c0_7] : memref<2x4x16xf32, #tpu.memory_space<vmem>>, vector<2x4x16xf32>
    tpu.vector_store %arg3[%c0_5, %c0_6, %c0_7], %3 {strides = array<i32>} : memref<2x4x16xf32, #tpu.memory_space<vmem>>, vector<2x4x16xf32>,
    return
  }
  func.func @transform_0(%arg0: i32) -> (i32, i32, i32) {
    %c0_i32 = arith.constant 0 : i32
    %c0_i32_0 = arith.constant 0 : i32
    %c0_i32_1 = arith.constant 0 : i32
    return %arg0, %c0_i32, %c0_i32_0 : i32, i32, i32
  }
  func.func @transform_1(%arg0: i32) -> (i32, i32, i32) {
    %c0_i32 = arith.constant 0 : i32
    %c0_i32_0 = arith.constant 0 : i32
    %c0_i32_1 = arith.constant 0 : i32
    return %arg0, %c0_i32, %c0_i32_0 : i32, i32, i32
  }
  func.func @transform_2(%arg0: i32) -> (i32, i32, i32) {
    %c0_i32 = arith.constant 0 : i32
    %c0_i32_0 = arith.constant 0 : i32
    %c0_i32_1 = arith.constant 0 : i32
    return %arg0, %c0_i32, %c0_i32_0 : i32, i32, i32
  }
}

module attributes {stable_mosaic.version = 11 : i64} {
  func.func @_proto_update_kernel(%arg0: i32, %arg1: memref<2x4x16xf32, #tpu.memory_space<vmem>>, %arg2: memref<2x16x32xf32, #tpu.memory_space<vmem>>, %arg3: memref<2x4x32xf32, #tpu.memory_space<vmem>>, %arg4: memref<2x4x32xf32, #tpu.memory_space<vmem>>) attributes {dimension_semantics = [#tpu.dimension_semantics<parallel>], iteration_bounds = array<i64: 1>, scalar_prefetch = 0 : i64, scratch_operands = 0 : i64, tpu.core_type = #tpu.core_type<tc>, window_params = [{transform_indices = @transform_0, window_bounds = array<i64: 2, 4, 16>}, {transform_indices = @transform_1, window_bounds = array<i64: 2, 16, 32>}, {transform_indices = @transform_2, window_bounds = array<i64: 2, 4, 32>}, {transform_indices = @transform_3, window_bounds = array<i64: 2, 4, 32>}]} {
    %c0 = arith.constant 0 : index
    %c0_0 = arith.constant 0 : index
    %c0_1 = arith.constant 0 : index
    %0 = vector.load %arg1[%c0, %c0_0, %c0_1] : memref<2x4x16xf32, #tpu.memory_space<vmem>>, vector<2x4x16xf32>
    %c0_2 = arith.constant 0 : index
    %c0_3 = arith.constant 0 : index
    %c0_4 = arith.constant 0 : index
    %1 = vector.load %arg2[%c0_2, %c0_3, %c0_4] : memref<2x16x32xf32, #tpu.memory_space<vmem>>, vector<2x16x32xf32>
    %c0_5 = arith.constant 0 : index
    %c0_6 = arith.constant 0 : index
    %c0_7 = arith.constant 0 : index
    %2 = vector.load %arg3[%c0_5, %c0_6, %c0_7] : memref<2x4x32xf32, #tpu.memory_space<vmem>>, vector<2x4x32xf32>
    %cst = arith.constant dense<0.000000e+00> : vector<2x4x32xf32>
    %3 = tpu.matmul %0, %1, %cst {dimension_numbers = #tpu.dot_dimension_numbers<[2], [1], [1], [2], [0, 0, 0, 1, 1, 2], [0], [0]>} : vector<2x4x16xf32>, vector<2x16x32xf32>, vector<2x4x32xf32> -> vector<2x4x32xf32>
    %cst_8 = arith.constant dense<0.000000e+00> : vector<2x4xf32>
    %4 = vector.multi_reduction <add>, %0, %cst_8 [2] : vector<2x4x16xf32> to vector<2x4xf32>
    %cst_9 = arith.constant 4.000000e-01 : f32
    %5 = vector.broadcast %cst_9 : f32 to vector<2x4x32xf32>
    %6 = arith.mulf %5, %2 : vector<2x4x32xf32>
    %7 = vector.shape_cast %4 : vector<2x4xf32> to vector<2x4x1xf32>
    %8 = vector.broadcast %7 : vector<2x4x1xf32> to vector<2x4x32xf32>
    %9 = arith.divf %3, %8 : vector<2x4x32xf32>
    %cst_10 = arith.constant 6.000000e-01 : f32
    %10 = vector.broadcast %cst_10 : f32 to vector<2x4x32xf32>
    %11 = arith.mulf %10, %9 : vector<2x4x32xf32>
    %12 = arith.addf %6, %11 : vector<2x4x32xf32>
    %c0_11 = arith.constant 0 : index
    %c0_12 = arith.constant 0 : index
    %c0_13 = arith.constant 0 : index
    %13 = vector.load %arg4[%c0_11, %c0_12, %c0_13] : memref<2x4x32xf32, #tpu.memory_space<vmem>>, vector<2x4x32xf32>
    tpu.vector_store %arg4[%c0_11, %c0_12, %c0_13], %12 {strides = array<i32>} : memref<2x4x32xf32, #tpu.memory_space<vmem>>, vector<2x4x32xf32>,
    return
  }
  func.func @transform_0(%arg0: i32) -> (i32, i32, i32) {
    %c0_i32 = arith.constant 0 : i32
    %c0_i32_0 = arith.constant 0 : i32
    %c0_i32_1 = arith.constant 0 : i32
    return %arg0, %c0_i32, %c0_i32_0 : i32, i32, i32
  }
  func.func @transform_1(%arg0: i32) -> (i32, i32, i32) {
    %c0_i32 = arith.constant 0 : i32
    %c0_i32_0 = arith.constant 0 : i32
    %c0_i32_1 = arith.constant 0 : i32
    return %arg0, %c0_i32, %c0_i32_0 : i32, i32, i32
  }
  func.func @transform_2(%arg0: i32) -> (i32, i32, i32) {
    %c0_i32 = arith.constant 0 : i32
    %c0_i32_0 = arith.constant 0 : i32
    %c0_i32_1 = arith.constant 0 : i32
    return %arg0, %c0_i32, %c0_i32_0 : i32, i32, i32
  }
  func.func @transform_3(%arg0: i32) -> (i32, i32, i32) {
    %c0_i32 = arith.constant 0 : i32
    %c0_i32_0 = arith.constant 0 : i32
    %c0_i32_1 = arith.constant 0 : i32
    return %arg0, %c0_i32, %c0_i32_0 : i32, i32, i32
  }
}

</mosaic_0001>

<bundles_post_ra>
// kernel: div.93
= control target key start
LH: loop header
LB: loop body
LE: loop exit
PB: predicated region body
PF: predicated region fallthrough
CT: control target
= control target key end

     0   :  { %s50_s0 = inlined_call_operand.vmem [shape: f32[2,4], index: 0, kind: input, shape index: {}]   ;;  %s51_s1 = inlined_call_operand.vmem [shape: f32[2,4], index: 1, kind: input, shape index: {}]   ;;  %s52_s2 = inlined_call_operand.vmem [shape: f32[2,4], index: 2, kind: output, shape index: {}]  }
   0x1   :  { %v4_v0 = vld [vmem:[%s51_s1] sm:$0x3] }
   0x2   :  { %24 = vrcp.f32 %v4_v0  ;;  %v18_v3 = vand.u32 2147483648, %v4_v0  ;;  %vm12_vm0 = vweird.f32 %v4_v0  ;;  %v16_v5 = vand.u32 2147483647, %v4_v0  ;;  %v3_v9 = vld [vmem:[%s50_s0] sm:$0x3] }
   0x4   :  { %v19_v7 = vor.u32 1.1754944e-38, %v18_v3  ;;  %vm17_vm3 = vcmp.eq.f32.partialorder %v16_v5, 8.507059e+37 }
   0x8   :  { %v25_v1 = vpop.eup %24 }
   0x9   :  { %v8_v2 = vmul.f32 %v25_v1, %v4_v0  ;;  %vm13_vm1 = vweird.f32 %v25_v1 }
   0xa   :  { %vm14_vm2 = vmor %vm12_vm0, %vm13_vm1 }
   0xb   :  { %v9_v4 = vsub.f32 1.0, %v8_v2 }
   0xd   :  { %v10_v6 = vmul.f32 %v25_v1, %v9_v4 }
   0xf   :  { %v11_v8 = vadd.f32 %v25_v1, %v10_v6 }
  0x11   :  { %v15_v10 = vsel %vm14_vm2, %v25_v1, %v11_v8 }
  0x12   :  { %v20_v11 = vsel %vm17_vm3, %v19_v7, %v15_v10 }
  0x13   :  { %v21_v12 = vmul.f32 %v20_v11, %v3_v9 }
  0x15   :  { %23 = vst [vmem:[%s52_s2] sm:$0x3] %v21_v12 }

// kernel: custom-call.11
= control target key start
LH: loop header
LB: loop body
LE: loop exit
PB: predicated region body
PF: predicated region fallthrough
CT: control target
= control target key end

     0   :  { %5 = vsyncpa [#allocation4], 0  ;;  %s989_s0 = inlined_call_operand.vmem [shape: f32[2,16,16], index: 0, kind: input, shape index: {}]   ;;  %s990_s1 = inlined_call_operand.vmem [shape: f32[2,16,16], index: 1, kind: output, shape index: {0}]   ;;  %s991_s2 = inlined_call_operand.hbm [shape: s32[2,16], index: 2, kind: output, shape index: {1}]   ;;  %s992_s3 = inlined_call_operand.vmem [shape: s32[2,16], index: 3, kind: output, shape index: {2}]  }
   0x1   :  { %7 = vsyncpa [#allocation4 + $0x1], 0  ;;  %s784_s12 = smov 0   ;;  %s786_s13 = smov 0  }
   0x2   :  { %s788_s14 = smov 0   ;;  %s790_s15 = smov 0  }
   0x3 LB: > { %s805_s16 = sadd.s32 4294967295, %s753_s15   ;;  %s595_s17 = sadd.s32 4294967294, %s753_s15   ;;  %s753_s15 = sphi %s790_s15, %s998_s15   ;;  %s749_s14 = sphi %s788_s14, %s997_s14   ;;  %s745_s13 = sphi %s786_s13, %s996_s13   ;;  %s741_s12 = sphi %s784_s12, %s995_s12  }
   0x4   : > { %s809_s18 = sadd.s32 1, %s753_s15   ;;  %s17_s19 = sshrl.u32 %s753_s15, 3 }
   0x5   : > { %s18_s20 = sshrl.u32 %s809_s18, 3  ;;  %s22_s21 = sadd.s32 1, %s749_s14 }
   0x6   : > { %s19_s22 = ssub.s32 %s17_s19, %s18_s20  ;;  %p32_p0 = scmp.ne.s32.totalorder %s749_s14, %s745_s13 }
   0x7   : > { %p20_p1 = scmp.eq.s32.totalorder %s19_s22, 0  ;;  %p33_p2 = scmp.eq.s32.totalorder %s805_s16, 1 }
   0x8   : > { %p38_p3 = scmp.ne.s32.totalorder %s745_s13, %s741_s12  ;;  %p39_p4 = scmp.eq.s32.totalorder %s595_s17, 1 }
   0x9   : > { %s820_s23 = scalar_select %p20_p1, %s749_s14, %s22_s21  }
   0xa   : > { %p822_p5 = por %p33_p2, %p32_p0  ;;  %p826_p6 = por %p39_p4, %p38_p3 }
   0xb   : > { %p597_p7 = scmp.ge.s32.totalorder %s753_s15, 2 }
   0xc   : > { %s85_s26 = sand.u32 (!%p597_p7), 1, %s753_s15   ;;  %s599_s27 = sshll.u32 (!%p597_p7), %s753_s15, 4 }
   0xd   : > { %83 = sbr.rel (%p597_p7) target bundleno = 21 (0x15), region = 16  ;;  %s598_s28 = sshll.u32 (!%p597_p7), %s85_s26, 4 }
   0xe   : > { %s89_s4 = scalar_lea.vmem (!%p597_p7), %s989_s0, %s599_s27  ;;  %s87_s5 = scalar_lea.vmem (!%p597_p7), [#allocation0], %s598_s28 }
  0x12   : > { %v102_v0 = vld [vmem:[%s89_s4] sm:$0xff]  ;;  %v104_v1 = vld [vmem:[%s89_s4 + $0x8] sm:$0xff] }
  0x13   : > { %103 = vst [vmem:[%s87_s5] sm:$0xff] %v102_v0 }
  0x14   : > { %105 = vst [vmem:[%s87_s5 + $0x8] sm:$0xff] %v104_v1 }
  0x15 PF: > { %p600_p8 = scmp.ge.s32.totalorder %s753_s15, 1  ;;  %p110_p9 = scmp.lt.s32.totalorder %s753_s15, 3 }
  0x17   : > { %p111_p10 = pnand %p600_p8, %p110_p9 }
  0x19   : > { %114 = sbr.rel (%p111_p10) target bundleno = 485 (0x1e5), region = 39 }
  0x1e   : > { %s117_s6 = sand.u32 1, %s805_s16   ;;  %s132_s7 = sand.u32 1, %s745_s13   ;;  %v154_v2 = vlaneseq  ;;  %v763_v6 = vmov 0  }
  0x1f   : > { %s601_s8 = sshll.u32 %s117_s6, 4  ;;  %s844_s9 = sshll.u32 %s132_s7, 1 }
  0x20   : > { %v847_v3 = vshrl.u32 %v154_v2, 7  ;;  %s119_s10 = scalar_lea.vmem [#allocation0], %s601_s8  ;;  %s849_s11 = scalar_lea.vmem [#allocation1], %s601_s8 }
  0x21   : > { %v143_v4 = vld [vmem:[%s119_s10] sm:$0xff]  ;;  %v605_v5 = vld [vmem:[%s119_s10 + $0x8] sm:$0xff]  ;;  %s149_s17 = sand.u32 7, %s805_s16   ;;  %s134_s20 = scalar_lea.vmem [#allocation3], %s844_s9 }
  0x22   : > { %144 = vst [vmem:[%s849_s11] sm:$0xff] %v143_v4  ;;  %s854_s19 = scalar_lea.vmem [#allocation2], %s149_s17  ;;  %s140_s21 = scalar_lea.vmem [#allocation6], %s844_s9 }
  0x23   : > { %606 = vst [vmem:[%s849_s11 + $0x8] sm:$0xff] %v605_v5  ;;  %s859_s22 = scalar_lea.vmem [#allocation5], %s149_s17  ;;  %s755_s26 = smov 0  }
  0x24   : > { %153 = vst [vmem:[%s854_s19] sm:$0x1] %v763_v6 }
  0x25 LB: >> { %s607_s27 = sshll.u32 %s757_s26, 3  ;;  %s162_s26 = sadd.s32 1, %s757_s26   ;;  %s757_s26 = sphi %s755_s26, %s162_s26  }
  0x26   : >> { %v166_v7 = vstv %s607_s27  ;;  %s164_s28 = scalar_lea.vmem [#allocation7], %s607_s27  ;;  %p159_p11 = scmp.ge.s32.totalorder %s162_s26, 2  }
  0x27   : >> { %v167_v8 = vadd.s32 %v166_v7, %v847_v3  ;;  %s862_s29 = smov (%p159_p11), 0  }
  0x28   : > { %161 = sbr.rel (!%p159_p11) target bundleno = 37 (0x25), region = 191 }
  0x29   : >> { %168 = vst [vmem:[%s164_s28] sm:$0xff] %v167_v8 }
  0x2d LB: >> { %v179_v9 = vld [vmem:[%s849_s11] sm:$0xff]  ;;  %v610_v10 = vld [vmem:[%s849_s11 + $0x8] sm:$0xff]  ;;  %v870_v11 = vadd.s32 8, %v847_v3  ;;  %v873_v13 = vstv %s761_s29  ;;  %s237_s30 = ssub.s32 128, %s761_s29  ;;  %v884_v47 = vand.u32 127, %v154_v2  ;;  %s249_s4 = scalar_lea.vmem %s849_s11, %s761_s29 [#allocation1]  ;;  %s761_s29 = sphi %s862_s29, %s174_s29  }
  0x2e   : >> { %v180_v12 = vand.u32 2147483647, %v179_v9  ;;  %v192_v14 = vand.u32 2147483647, %v610_v10  ;;  %vm183_vm0 = vcmp.ge.s32.totalorder %v847_v3, %v873_v13  ;;  %v246_v48 = vld [vmem:[%s854_s19] ss:$0 sm:$0xff] }
  0x2f   : >> { %vm195_vm3 = vcmp.ge.s32.totalorder %v870_v11, %v873_v13  ;;  %vm244_vm13 = vcmp.eq.s32.totalorder %v884_v47, %v873_v13  ;;  %v251_v49 = vld [vmem:[%s249_s4] ss:$0 sm:$0xff]  ;;  %s255_s8 = scalar_lea.vmem [#allocation7], %s761_s29  ;;  %vm303_vm15 = vcmp.gt.s32.totalorder %v870_v11, %v873_v13  ;;  %s174_s29 = sadd.s32 1, %s761_s29  }
  0x30   : >> { %vm609_vm1 = vcmp.gt.f32.partialorder %v180_v12, -inf  ;;  %v257_v53 = vld [vmem:[%s255_s8] ss:$0 sm:$0xff]  ;;  %p171_p12 = scmp.ge.s32.totalorder %s174_s29, 16  }
  0x31   : >> { %vm187_vm2 = vmand %vm183_vm0, %vm609_vm1  ;;  %vm275_vm0 = vcmp.gt.s32.totalorder %v847_v3, %v873_v13  ;;  %s426_s17 = sshrl.u32 (%p171_p12), %s805_s16, 3 }
  0x32   : >> { %v188_v15 = vsel %vm187_vm2, %v847_v3, %v873_v13  ;;  %v189_v16 = vsel %vm187_vm2, %v180_v12, -inf  ;;  %s932_s26 = sshll.u32 (%p171_p12), %s426_s17, 1 }
  0x33   : >> { %vm198_vm4 = vcmp.lt.f32.partialorder %v189_v16, %v192_v14  ;;  %s430_s29 = scalar_lea.hbm (%p171_p12), %s991_s2, %s932_s26 }
  0x34   : >> { %vm199_vm5 = vmand %vm195_vm3, %vm198_vm4 }
  0x35   : >> { %v200_v17 = vsel %vm199_vm5, %v870_v11, %v188_v15  ;;  %v201_v18 = vsel %vm199_vm5, %v192_v14, %v189_v16 }
  0x36   : >> { %v202_v19 = vrot.slane %v201_v18, 1  ;;  %v203_v20 = vrot.slane %v200_v17, 1 }
  0x38   : >> { %vm204_vm6 = vcmp.ge.f32.partialorder %v202_v19, %v201_v18  ;;  %v207_v21 = vrot.slane %v202_v19, 1  ;;  %v208_v22 = vrot.slane %v203_v20, 1 }
  0x39   : >> { %v205_v23 = vsel %vm204_vm6, %v202_v19, %v201_v18  ;;  %v206_v24 = vsel %vm204_vm6, %v203_v20, %v200_v17 }
  0x3a   : >> { %vm209_vm7 = vcmp.ge.f32.partialorder %v207_v21, %v205_v23  ;;  %v212_v25 = vrot.slane %v207_v21, 1  ;;  %v213_v26 = vrot.slane %v208_v22, 1 }
  0x3b   : >> { %v210_v27 = vsel %vm209_vm7, %v207_v21, %v205_v23  ;;  %v211_v28 = vsel %vm209_vm7, %v208_v22, %v206_v24 }
  0x3c   : >> { %vm214_vm8 = vcmp.ge.f32.partialorder %v212_v25, %v210_v27  ;;  %v217_v29 = vrot.slane %v212_v25, 1  ;;  %v218_v30 = vrot.slane %v213_v26, 1 }
  0x3d   : >> { %v215_v31 = vsel %vm214_vm8, %v212_v25, %v210_v27  ;;  %v216_v32 = vsel %vm214_vm8, %v213_v26, %v211_v28 }
  0x3e   : >> { %vm219_vm9 = vcmp.ge.f32.partialorder %v217_v29, %v215_v31  ;;  %v222_v33 = vrot.slane %v217_v29, 1  ;;  %v223_v34 = vrot.slane %v218_v30, 1 }
  0x3f   : >> { %v220_v35 = vsel %vm219_vm9, %v217_v29, %v215_v31  ;;  %v221_v36 = vsel %vm219_vm9, %v218_v30, %v216_v32  ;;  %vm320_vm9 = vmand %vm303_vm15, %vm244_vm13 }
  0x40   : >> { %vm224_vm10 = vcmp.ge.f32.partialorder %v222_v33, %v220_v35  ;;  %v227_v37 = vrot.slane %v222_v33, 1  ;;  %v228_v38 = vrot.slane %v223_v34, 1 }
  0x41   : >> { %v225_v39 = vsel %vm224_vm10, %v222_v33, %v220_v35  ;;  %v226_v40 = vsel %vm224_vm10, %v223_v34, %v221_v36 }
  0x42   : >> { %vm229_vm11 = vcmp.ge.f32.partialorder %v227_v37, %v225_v39  ;;  %v232_v41 = vrot.slane %v227_v37, 1  ;;  %v233_v42 = vrot.slane %v228_v38, 1 }
  0x43   : >> { %v230_v43 = vsel %vm229_vm11, %v227_v37, %v225_v39  ;;  %v231_v44 = vsel %vm229_vm11, %v228_v38, %v226_v40  ;;  %vm292_vm11 = vmand %vm275_vm0, %vm244_vm13 }
  0x44   : >> { %vm234_vm12 = vcmp.ge.f32.partialorder %v232_v41, %v230_v43 }
  0x45   : >> { %v236_v45 = vsel %vm234_vm12, %v233_v42, %v231_v44  ;;  %vm267_vm12 = vcmp.gt.s32.totalorder %v884_v47, %v873_v13 }
  0x46   : >> { %238 = vrot.lane.b32.xlu0 %v236_v45, %s237_s30  ;;  %s616_s30 = sshll.u32 (%p171_p12), %s805_s16, 4 }
  0xb8   : >> { %v239_v46 = vpop.permute.xlu0 %238 }
  0xb9   : >> { %621 = vpush %v239_v46 }
  0xea   : >> { %s622_s5 = spop %621 }
  0xeb   : >> { %v245_v50 = vstv %s622_s5  ;;  %s250_s6 = scalar_lea.vmem %s849_s11, %s622_s5 [#allocation1]  ;;  %s256_s10 = scalar_lea.vmem [#allocation7], %s622_s5 }
  0xec   : >> { %v247_v51 = vsel %vm244_vm13, %v245_v50, %v246_v48  ;;  %v252_v52 = vld [vmem:[%s250_s6] ss:$0 sm:$0xff] }
  0xed   : >> { %248 = vst [vmem:[%s854_s19] sm:$0x1] %v247_v51  ;;  %v258_v54 = vld [vmem:[%s256_s10] ss:$0 sm:$0xff]  ;;  %vm261_vm14 = vcmp.ne.f32.partialorder %v252_v52, 0.0  ;;  %v268_v11 = vsel %vm267_vm12, %v252_v52, 0.0  ;;  %s432_s19 = sshll.u32 (%p171_p12), %s134_s20, 4  ;;  %s433_s19 = int_to_ptr.vmem [resolvable:$true] %s432_s19 }
  0xee   : >> { %253 = vst [vmem:[%s250_s6] sm:$0x1] %v251_v49  ;;  %vm262_vm1 = vmand %vm244_vm13, %vm261_vm14 }
  0xef   : >> { %254 = vst [vmem:[%s249_s4] sm:$0x1] %v252_v52  ;;  %v263_v55 = vsel %vm262_vm1, %v252_v52, 1.0  ;;  %s434_s4 = sshll.u32 (%p171_p12), %s430_s29, 4  ;;  %s703_s29 = scalar_lea.hbm (%p171_p12), %s991_s2, 2  ;;  %s435_s4 = int_to_ptr.hbm [resolvable:$true] %s434_s4 }
  0xf0   : >> { %259 = vst [vmem:[%s256_s10] sm:$0x1] %v257_v53  ;;  %v304_v56 = vsel %vm303_vm15, %v263_v55, 1.0  ;;  %v276_v57 = vsel %vm275_vm0, %v263_v55, 1.0  ;;  %s394_s10 = scalar_lea.sflag (%p171_p12), [#allocation4], %s132_s7  ;;  %s697_s17 = sshra.s32 (%p171_p12), %s435_s4, 4  ;;  %s698_s17 = int_to_ptr.hbm [resolvable:$true] %s697_s17 }
  0xf1   : >> { %260 = vst [vmem:[%s255_s8] sm:$0x1] %v258_v54  ;;  %679 = vrcp.f32 %v304_v56  ;;  %v316_v63 = vand.u32 2147483648, %v304_v56  ;;  %v314_v4 = vand.u32 2147483647, %v304_v56  ;;  %v288_v5 = vand.u32 2147483648, %v276_v57  ;;  %s403_s8 = scalar_lea.vmem (%p171_p12), %s990_s1, %s616_s30  ;;  %s699_s16 = scalar_lea.hbm (%p171_p12), %s698_s17, 2 }
  0xf2   : >> { %681 = vrcp.f32 %v276_v57  ;;  %v286_v7 = vand.u32 2147483647, %v276_v57  ;;  %vm310_vm4 = vweird.f32 %v304_v56  ;;  %vm282_vm6 = vweird.f32 %v276_v57  ;;  %p700_p13 = scmp.ne.s32.totalorder (%p171_p12), %s698_s17, %s699_s16  ;;  %p704_p2 = scmp.lt.s32.totalorder (%p171_p12), %s698_s17, %s991_s2 }
  0xf3   : >> { %v317_v9 = vor.u32 1.1754944e-38, %v316_v63  ;;  %vm315_vm7 = vcmp.eq.f32.partialorder %v314_v4, 8.507059e+37  ;;  %v289_v14 = vor.u32 1.1754944e-38, %v288_v5  ;;  %p705_p3 = scmp.lt.s32.totalorder (%p171_p12), %s703_s29, %s699_s16 }
  0xf4   : >> { %vm287_vm10 = vcmp.eq.f32.partialorder %v286_v7, 8.507059e+37  ;;  %v379_v2 = vld [vmem:[#allocation2] sm:$0x3] (%p171_p12)  ;;  %p701_p0 = pnand (%p171_p12), %p700_p13, %p822_p5 }
  0xf5   : > { %382 = vst [vmem:[%s134_s20] sm:$0x3] (%p171_p12), %v379_v2  ;;  %p706_p4 = por (%p171_p12), %p705_p3, %p704_p2 }
  0xf6   : >> { %v611_v15 = vld [vmem:[%s849_s11 + $0x8] sm:$0xff]  ;;  %v272_v19 = vld [vmem:[%s849_s11] sm:$0xff]  ;;  %p702_p1 = pneg (%p171_p12), %p701_p0 }
  0xf7   : >> { %v680_v58 = vpop.eup %679 }
  0xf8   : >> { %v682_v59 = vpop.eup %681  ;;  %v306_v60 = vmul.f32 %v680_v58, %v304_v56  ;;  %vm311_vm2 = vweird.f32 %v680_v58  ;;  %v327_v30 = vld [vmem:[#allocation7] sm:$0xff] (%p171_p12)  ;;  %v329_v13 = vld [vmem:[#allocation7 + $0x8] sm:$0xff] (%p171_p12)  ;;  %p707_p8 = pnand (%p171_p12), %p706_p4, %p702_p1 }
  0xf9   : >> { %v278_v61 = vmul.f32 %v682_v59, %v276_v57  ;;  %vm283_vm3 = vweird.f32 %v682_v59  ;;  %vm312_vm5 = vmor %vm310_vm4, %vm311_vm2 }
  0xfa   : >> { %v307_v62 = vsub.f32 1.0, %v306_v60  ;;  %vm284_vm8 = vmor %vm282_vm6, %vm283_vm3 }
  0xfb   : >> { %v279_v0 = vsub.f32 1.0, %v278_v61 }
  0xfc   : >> { %v308_v1 = vmul.f32 %v680_v58, %v307_v62 }
  0xfd   : >> { %v280_v6 = vmul.f32 %v682_v59, %v279_v0 }
  0xfe   : >> { %v309_v8 = vadd.f32 %v680_v58, %v308_v1 }
  0xff   : >> { %v281_v10 = vadd.f32 %v682_v59, %v280_v6 }
 0x100   : >> { %v313_v12 = vsel %vm312_vm5, %v680_v58, %v309_v8 }
 0x101   : >> { %v318_v16 = vsel %vm315_vm7, %v317_v9, %v313_v12  ;;  %v285_v17 = vsel %vm284_vm8, %v682_v59, %v281_v10 }
 0x102   : >> { %v319_v18 = vmul.f32 %v611_v15, %v318_v16  ;;  %v290_v20 = vsel %vm287_vm10, %v289_v14, %v285_v17 }
 0x103   : >> { %v291_v21 = vmul.f32 %v290_v20, %v272_v19 }
 0x104   : >> { %v321_v22 = vsel %vm320_vm9, %v319_v18, 0.0 }
 0x105   : >> { %322 = vadd.xlane.f32.xlu1 %v321_v22  ;;  %v293_v23 = vsel %vm292_vm11, %v291_v21, 0.0 }
 0x106   : >> { %294 = vadd.xlane.f32.xlu0 %v293_v23 }
 0x12f   : > { %344 = vxpose.xlu0.b32.start [1/2] (short) (narrow) (%p171_p12), %v327_v30, 8 }
 0x137   : > { %345 = vxpose.xlu0.b32.end [2/2] (short) (narrow) (%p171_p12), %v329_v13, 8 }
 0x178   : >> { %v323_v24 = vpop.xlane.xlu1 %322 }
 0x179   : >> { %v324_v25 = vmul.f32 %v323_v24, %v268_v11  ;;  %v295_v26 = vpop.xlane.xlu0 %294 }
 0x17a   : >> { %v296_v27 = vmul.f32 %v295_v26, %v268_v11  ;;  %173 = sbr.rel (!%p171_p12) target bundleno = 45 (0x2d), region = 202 }
 0x17b   : >> { %v325_v28 = vsub.f32 %v319_v18, %v324_v25 }
 0x17c   : >> { %v297_v29 = vsub.f32 %v291_v21, %v296_v27 }
 0x17d   : >> { %612 = vst [vmem:[%s849_s11 + $0x8] sm:$0xff] %v325_v28 }
 0x17e   : >> { %298 = vst [vmem:[%s849_s11] sm:$0xff] %v297_v29 }
 0x184   : > { %v418_v31 = vld [vmem:[%s849_s11 + $0x8] sm:$0xff] }
 0x185   : > { %v416_v3 = vld [vmem:[%s849_s11] sm:$0xff] }
 0x186   : > { %417 = vst [vmem:[%s403_s8] sm:$0xff] %v416_v3 }
 0x187   : > { %710 = shalt.err (!%p707_p8)
}
 0x188   : > { %623 = dma.vmem_to_hbm [thread:$0]  (%p822_p5), %s433_s19, 32, %s435_s4, %s394_s10   ;;  %419 = vst [vmem:[%s403_s8 + $0x8] sm:$0xff] %v418_v31 }
 0x189   : > { %s443_s20 = scalar_lea.vmem (%p822_p5), %s992_s3, %s932_s26 }
 0x1d3   : > { %v360_v32 = vpop.trf.xlu0 }
 0x1d4   : > { %376 = vst [vmem:[%s859_s22] sm:$0x1] %v360_v32 }
 0x1d8   : > { %440 = sbr.rel (!%p822_p5) target bundleno = 485 (0x1e5), region = 80 }
 0x1db   : > { %v385_v33 = vld [vmem:[#allocation5] sm:$0x3] }
 0x1dc   : > { %388 = vst [vmem:[%s140_s21] sm:$0x3] %v385_v33 }
 0x1e3   : > { %v460_v34 = vld [vmem:[%s140_s21] sm:$0x3] }
 0x1e4   : > { %461 = vst [vmem:[%s443_s20] sm:$0x3] %v460_v34 }
 0x1e5 PF: > { %s489_s22 = sand.u32 1, %s741_s12   ;;  %p626_p9 = pnand %p597_p7, %p826_p6 }
 0x1e6   : > { %s490_s24 = scalar_lea.sflag [#allocation4], %s489_s22 }
 0x1e7   : > { %p627_p10 = pneg %p626_p9 }
 0x1e9   : > { %736 = dma.done.wait (%p627_p10), %s490_s24, 32  }
 0x1ea   : > { %738 = vsyncadd (%p627_p10), %s490_s24, 4294967264  ;;  %p10_p5 = scmp.ge.s32.totalorder %s809_s18, 4   ;;  %s995_s12 = smov %s745_s13 }
 0x1eb   : > { %s996_s13 = smov %s749_s14  ;;  %s997_s14 = smov %s820_s23 }
 0x1ec   : > { %s998_s15 = smov %s809_s18  ;;  %12 = sbr.rel (!%p10_p5) target bundleno = 3 (0x3), region = 213 }
 0x1f1   :  { %503 = vsyncpa [#allocation4], 1 }
 0x1f2   :  { %505 = vsyncpa [#allocation4 + $0x1], 1 }

// kernel: soft_label_propagation.12
= control target key start
LH: loop header
LB: loop body
LE: loop exit
PB: predicated region body
PF: predicated region fallthrough
CT: control target
= control target key end

     0   :  { %vm18_vm0 = vcmask 261120   ;;  %vm27_vm1 = vcmask 257024   ;;  %s213_s0 = inlined_call_operand.vmem [shape: f32[2,8,32], index: 0, kind: input, shape index: {}]   ;;  %s214_s1 = inlined_call_operand.vmem [shape: f32[2,4,32], index: 1, kind: input, shape index: {}]   ;;  %s215_s2 = inlined_call_operand.hbm [shape: f32[2,4,8], index: 2, kind: output, shape index: {}]  }
   0x1   :  { %v12_v0 = vld [vmem:[%s213_s0] sm:$0xff]  ;;  %v13_v1 = vld [vmem:[%s213_s0 + $0x8] sm:$0xff] }
   0x2   :  { %v14_v2 = vld [vmem:[%s214_s1] sm:$0xf]  ;;  %v16_v3 = vmul.f32 %v12_v0, %v12_v0  ;;  %135 = vmatpush.xpose.msk.msra.mxu0 %vm18_vm0, %v12_v0  ;;  %137 = vmatpush.xpose.msk.msra.mxu1 %vm18_vm0, %v13_v1  ;;  %v15_v4 = vld [vmem:[%s214_s1 + $0x4] sm:$0xf] }
   0x3   :  { %v25_v5 = vmul.f32 %v14_v2, %v14_v2 }
   0x4   :  { %7 = vsyncpa [#allocation3], 0  ;;  %v19_v6 = vsel %vm18_vm0, %v16_v3, 0.0  ;;  %v17_v8 = vmul.f32 %v13_v1, %v13_v1  ;;  %v26_v9 = vmul.f32 %v15_v4, %v15_v4  ;;  %v88_v12 = vlaneseq  ;;  %s172_s0 = smov [#allocation2]   ;;  %s123_s19 = sshll.u32 %s215_s2, 4  ;;  %s124_s19 = int_to_ptr.hbm [resolvable:$true] %s123_s19 }
   0x5   :  { %v28_v7 = vsel %vm27_vm1, %v25_v5, 0.0  ;;  %136 = vmatmul.msk.f32.vlgmr.msra.gmra.mxu0 %vm18_vm0, %v14_v2  ;;  %138 = vmatmul.msk.f32.vlgmr.msra.gmra.mxu1 %vm18_vm0, %v15_v4  ;;  %s121_s1 = sshll.u32 %s172_s0, 4  ;;  %vm114_vm2 = vcmask 60416   ;;  %s173_s20 = smov 64   ;;  %s122_s1 = int_to_ptr.vmem [resolvable:$true] %s121_s1 }
   0x6   :  { %20 = vadd.xlane.f32.xlu0 %v19_v6  ;;  %29 = vadd.xlane.f32.xlu1 %v28_v7  ;;  %v22_v10 = vsel %vm18_vm0, %v17_v8, 0.0  ;;  %v31_v11 = vsel %vm27_vm1, %v26_v9, 0.0  ;;  %v89_v15 = vand.u32 127, %v88_v12  ;;  %s174_s21 = smov 4  }
   0xe   :  { %23 = vadd.xlane.f32.xlu0 %v22_v10  ;;  %32 = vadd.xlane.f32.xlu1 %v31_v11 }
  0x79   :  { %v21_v13 = vpop.xlane.xlu0 %20  ;;  %v30_v14 = vpop.xlane.xlu1 %29 }
  0x7a   :  { %v90_v16 = vperm.slane %v21_v13, %v89_v15 }
  0x7c   :  { %v100_v22 = vadd.f32 %v90_v16, %v30_v14 }
  0x81   :  { %v24_v17 = vpop.xlane.xlu0 %23  ;;  %v33_v18 = vpop.xlane.xlu1 %32 }
  0x82   :  { %v91_v19 = vperm.slane %v24_v17, %v89_v15  ;;  %v57_v20 = vpop.f32.mrf.mxu0  ;;  %v83_v21 = vpop.f32.mrf.mxu1 }
  0x83   :  { %v102_v23 = vmul.f32 2.0, %v57_v20  ;;  %v103_v24 = vmul.f32 2.0, %v83_v21 }
  0x84   :  { %v101_v25 = vadd.f32 %v91_v19, %v33_v18 }
  0x85   :  { %v104_v26 = vsub.f32 %v100_v22, %v102_v23 }
  0x86   :  { %v105_v27 = vsub.f32 %v101_v25, %v103_v24 }
  0x87   :  { %v106_v28 = vmax.f32 %v104_v26, 0.0 }
  0x88   :  { %v107_v29 = vmax.f32 %v105_v27, 0.0 }
  0x89   :  { %v108_v30 = vmul.f32 -1.0, %v106_v28 }
  0x8a   :  { %v109_v31 = vmul.f32 -1.0, %v107_v29 }
  0x8b   :  { %v110_v32 = vmul.f32 1.442695, %v108_v30 }
  0x8c   :  { %v112_v33 = vmul.f32 1.442695, %v109_v31 }
  0x8d   :  { %142 = vpow2.f32 %v110_v32 }
  0x8e   :  { %144 = vpow2.f32 %v112_v33 }
  0x93   :  { %v143_v34 = vpop.eup %142 }
  0x94   :  { %v145_v35 = vpop.eup %144  ;;  %115 = vst.msk [vmem:[#allocation2] sm:$0xf] %vm114_vm2, %v143_v34 }
  0x95   :  { %116 = vst.msk [vmem:[#allocation2 + $0x4] sm:$0xf] %vm114_vm2, %v145_v35 }
  0x96   :  { %129 = dma.vmem_to_hbm [thread:$0]  %s122_s1, 128, %s124_s19, [#allocation3], %s173_s20, %s173_s20, %s174_s21  }
  0x97   :  { %170 = dma.done.wait [#allocation3], 128  }
  0x98   :  { %171 = vsyncadd [#allocation3], 4294967168 }
  0x99   :  { %134 = vsyncpa [#allocation3], 1 }

// kernel: custom-call.13
= control target key start
LH: loop header
LB: loop body
LE: loop exit
PB: predicated region body
PF: predicated region fallthrough
CT: control target
= control target key end

     0   :  { %s606_s6 = smov 0   ;;  %s608_s7 = smov 0   ;;  %s709_s0 = inlined_call_operand.vmem [shape: f32[2,1,16,16], index: 0, kind: input, shape index: {}]   ;;  %s710_s1 = inlined_call_operand.vmem [shape: f32[2,1,16,16], index: 1, kind: output, shape index: {}]  }
   0x1   :  { %s610_s8 = smov 0  }
   0x2 LB: > { %s522_s9 = sadd.s32 4294967295, %s592_s8   ;;  %s33_s10 = sadd.s32 1, %s588_s7  ;;  %s592_s8 = sphi %s610_s8, %s7_s8   ;;  %s588_s7 = sphi %s608_s7, %s712_s7   ;;  %s584_s6 = sphi %s606_s6, %s711_s6  }
   0x3   : > { %p35_p0 = scmp.ge.s32.totalorder %s33_s10, 2  ;;  %p524_p1 = scmp.ge.s32.totalorder %s592_s8, 2 }
   0x4   : > { %s49_s11 = sand.u32 (!%p524_p1), 1, %s592_s8   ;;  %s538_s12 = sshll.u32 (!%p524_p1), %s588_s7, 4 }
   0x5   : > { %s714_s10 = smov (%p35_p0, %s33_s10), 0  ;;  %47 = sbr.rel (%p524_p1) target bundleno = 13 (0xd), region = 16 }
   0x6   : > { %s525_s13 = sshll.u32 (!%p524_p1), %s49_s11, 4  ;;  %s58_s16 = scalar_lea.vmem (!%p524_p1), %s709_s0, %s538_s12 }
   0x7   : > { %s51_s17 = scalar_lea.vmem (!%p524_p1), [#allocation0], %s525_s13 }
   0xa   : > { %v89_v0 = vld [vmem:[%s58_s16] sm:$0xff]  ;;  %v91_v1 = vld [vmem:[%s58_s16 + $0x8] sm:$0xff] }
   0xb   : > { %90 = vst [vmem:[%s51_s17] sm:$0xff] %v89_v0 }
   0xc   : > { %92 = vst [vmem:[%s51_s17 + $0x8] sm:$0xff] %v91_v1 }
   0xd PF: > { %p528_p2 = scmp.ge.s32.totalorder %s592_s8, 1  ;;  %p97_p3 = scmp.lt.s32.totalorder %s592_s8, 3 }
   0xf   : > { %p98_p4 = pnand %p528_p2, %p97_p3 }
  0x11   : > { %101 = sbr.rel (%p98_p4) target bundleno = 1962 (0x7aa), region = 54 }
  0x16   : > { %s104_s18 = sand.u32 1, %s522_s9   ;;  %v115_v2 = vlaneseq  ;;  %v594_v20 = vmov -1.0   ;;  %v595_v63 = vmov 0.0   ;;  %s539_s21 = sshll.u32 %s584_s6, 4 }
  0x17   : > { %s529_s19 = sshll.u32 %s104_s18, 4  ;;  %s421_s24 = scalar_lea.vmem %s710_s1, %s539_s21 }
  0x18   : > { %v633_v3 = vand.u32 127, %v115_v2  ;;  %v119_v4 = vshrl.u32 %v115_v2, 7  ;;  %s635_s20 = scalar_lea.vmem [#allocation0], %s529_s19 }
  0x19   : > { %v122_v5 = vld [vmem:[%s635_s20] sm:$0xff]  ;;  %v531_v42 = vld [vmem:[%s635_s20 + $0x8] sm:$0xff] }
  0x1a   : > { %vm121_vm0 = vcmp.eq.s32.totalorder %v119_v4, %v633_v3  ;;  %vm117_vm1 = vcmp.lt.s32.totalorder %v633_v3, 16  ;;  %vm126_vm2 = vcmp.ge.s32.totalorder %v119_v4, %v633_v3  ;;  %vm182_vm8 = vcmp.eq.s32.totalorder %v633_v3, 0 }
  0x1b   : > { %v123_v6 = vsel %vm121_vm0, %v122_v5, 0.0  ;;  %vm127_vm3 = vmand %vm126_vm2, %vm117_vm1  ;;  %vm179_vm9 = vcmp.eq.s32.totalorder %v633_v3, %v119_v4  ;;  %v183_v21 = vsel %vm182_vm8, 1.0, %v594_v20  ;;  %vm197_vm10 = vcmp.eq.s32.totalorder %v633_v3, 1 }
  0x1c   : > { %124 = vadd.xlane.f32.xlu0 %v123_v6  ;;  %v128_v15 = vsel %vm127_vm3, %v122_v5, 0.0  ;;  %v184_v22 = vsel %vm179_vm9, %v183_v21, 0.0  ;;  %vm207_vm11 = vcmp.eq.s32.totalorder %v633_v3, 2  ;;  %vm217_vm12 = vcmp.eq.s32.totalorder %v633_v3, 3 }
  0x1d   : > { %v149_v41 = vadd.s32 8, %v119_v4  ;;  %vm227_vm14 = vcmp.eq.s32.totalorder %v633_v3, 4  ;;  %vm237_vm8 = vcmp.eq.s32.totalorder %v633_v3, 5  ;;  %vm257_vm9 = vcmp.eq.s32.totalorder %v633_v3, 7 }
  0x1f   : > { %vm150_vm13 = vcmp.eq.s32.totalorder %v149_v41, %v633_v3  ;;  %vm155_vm15 = vcmp.ge.s32.totalorder %v149_v41, %v633_v3 }
  0x20   : > { %v152_v43 = vsel %vm150_vm13, %v531_v42, 0.0  ;;  %vm156_vm3 = vmand %vm155_vm15, %vm117_vm1  ;;  %vm247_vm1 = vcmp.eq.s32.totalorder %v633_v3, 6  ;;  %vm309_vm13 = vcmp.eq.s32.totalorder %v633_v3, 11  ;;  %vm337_vm15 = vcmp.eq.s32.totalorder %v633_v3, 13 }
  0x21   : > { %v157_v58 = vsel %vm156_vm3, %v531_v42, 0.0  ;;  %vm365_vm3 = vcmp.eq.s32.totalorder %v633_v3, 15 }
  0x8f   : > { %v639_v7 = vpop.xlane.xlu0 %124 }
  0x90   : > { %566 = vrcp.f32 %v639_v7  ;;  %v140_v11 = vand.u32 2147483648, %v639_v7  ;;  %v138_v13 = vand.u32 2147483647, %v639_v7  ;;  %vm134_vm5 = vweird.f32 %v639_v7 }
  0x92   : > { %v141_v16 = vor.u32 1.1754944e-38, %v140_v11  ;;  %vm139_vm7 = vcmp.eq.f32.partialorder %v138_v13, 8.507059e+37 }
  0x96   : > { %v567_v8 = vpop.eup %566 }
  0x97   : > { %v130_v9 = vmul.f32 %v567_v8, %v639_v7  ;;  %vm135_vm4 = vweird.f32 %v567_v8 }
  0x98   : > { %vm136_vm6 = vmor %vm134_vm5, %vm135_vm4 }
  0x99   : > { %v131_v10 = vsub.f32 1.0, %v130_v9 }
  0x9b   : > { %v132_v12 = vmul.f32 %v567_v8, %v131_v10 }
  0x9d   : > { %v133_v14 = vadd.f32 %v567_v8, %v132_v12 }
  0x9f   : > { %v137_v17 = vsel %vm136_vm6, %v567_v8, %v133_v14 }
  0xa0   : > { %v652_v18 = vsel %vm139_vm7, %v141_v16, %v137_v17  ;;  %vm190_vm7 = vcmp.eq.s32.totalorder %v633_v3, %v149_v41 }
  0xa1   : > { %v143_v19 = vmul.f32 %v652_v18, %v128_v15  ;;  %v191_v0 = vsel %vm190_vm7, -1.0, %v595_v63 }
  0xa3   : > { %144 = vst [vmem:[#allocation2] sm:$0xff] %v143_v19 }
  0xaa   : > { %v193_v23 = vld [vmem:[#allocation2 + $0x1] ss:$0 sm:$0xff]  ;;  %v203_v26 = vld [vmem:[#allocation2 + $0x2] ss:$0 sm:$0xff]  ;;  %v213_v31 = vld [vmem:[#allocation2 + $0x3] ss:$0 sm:$0xff] }
  0xab   : > { %v194_v24 = vxor.u32 2147483648, %v193_v23  ;;  %v204_v28 = vxor.u32 2147483648, %v203_v26  ;;  %v214_v33 = vxor.u32 2147483648, %v213_v31  ;;  %v223_v36 = vld [vmem:[#allocation2 + $0x4] ss:$0 sm:$0xff] }
  0xac   : > { %v224_v38 = vxor.u32 2147483648, %v223_v36  ;;  %v233_v44 = vld [vmem:[#allocation2 + $0x5] ss:$0 sm:$0xff]  ;;  %v243_v62 = vld [vmem:[#allocation2 + $0x6] ss:$0 sm:$0xff] }
  0xad   : > { %v198_v25 = vmul.f32 %v194_v24, %v184_v22  ;;  %v234_v46 = vxor.u32 2147483648, %v233_v44  ;;  %v244_v4 = vxor.u32 2147483648, %v243_v62  ;;  %v253_v10 = vld [vmem:[#allocation2 + $0x7] ss:$0 sm:$0xff] }
  0xae   : > { %v254_v12 = vxor.u32 2147483648, %v253_v10 }
  0xaf   : > { %199 = vadd.xlane.f32.xlu0 %v198_v25 }
 0x122   : > { %v200_v27 = vpop.xlane.xlu0 %199 }
 0x123   : > { %v201_v29 = vsel %vm197_vm10, %v200_v27, %v184_v22  ;;  %vm267_vm10 = vcmp.eq.s32.totalorder %v633_v3, 8 }
 0x124   : > { %v208_v30 = vmul.f32 %v204_v28, %v201_v29 }
 0x126   : > { %209 = vadd.xlane.f32.xlu1 %v208_v30 }
 0x199   : > { %v210_v32 = vpop.xlane.xlu1 %209 }
 0x19a   : > { %v211_v34 = vsel %vm207_vm11, %v210_v32, %v201_v29  ;;  %vm281_vm11 = vcmp.eq.s32.totalorder %v633_v3, 9 }
 0x19b   : > { %v218_v35 = vmul.f32 %v214_v33, %v211_v34 }
 0x19d   : > { %219 = vadd.xlane.f32.xlu1 %v218_v35 }
 0x1a5   : > { %153 = vadd.xlane.f32.xlu1 %v152_v43 }
 0x210   : > { %v220_v37 = vpop.xlane.xlu1 %219 }
 0x211   : > { %v221_v39 = vsel %vm217_vm12, %v220_v37, %v211_v34  ;;  %vm295_vm12 = vcmp.eq.s32.totalorder %v633_v3, 10 }
 0x212   : > { %v228_v40 = vmul.f32 %v224_v38, %v221_v39 }
 0x214   : > { %229 = vadd.xlane.f32.xlu2 %v228_v40 }
 0x218   : > { %v663_v49 = vpop.xlane.xlu1 %153 }
 0x219   : > { %568 = vrcp.f32 %v663_v49  ;;  %v169_v52 = vand.u32 2147483648, %v663_v49  ;;  %vm163_vm0 = vweird.f32 %v663_v49  ;;  %v167_v54 = vand.u32 2147483647, %v663_v49 }
 0x21b   : > { %v170_v56 = vor.u32 1.1754944e-38, %v169_v52  ;;  %vm168_vm6 = vcmp.eq.f32.partialorder %v167_v54, 8.507059e+37 }
 0x21f   : > { %v569_v50 = vpop.eup %568 }
 0x220   : > { %v159_v51 = vmul.f32 %v569_v50, %v663_v49  ;;  %vm164_vm2 = vweird.f32 %v569_v50 }
 0x221   : > { %vm165_vm4 = vmor %vm163_vm0, %vm164_vm2  ;;  %vm351_vm2 = vcmp.eq.s32.totalorder %v633_v3, 14 }
 0x222   : > { %v160_v53 = vsub.f32 1.0, %v159_v51 }
 0x224   : > { %v161_v55 = vmul.f32 %v569_v50, %v160_v53 }
 0x226   : > { %v162_v57 = vadd.f32 %v569_v50, %v161_v55 }
 0x228   : > { %v166_v59 = vsel %vm165_vm4, %v569_v50, %v162_v57 }
 0x229   : > { %v675_v60 = vsel %vm168_vm6, %v170_v56, %v166_v59 }
 0x22a   : > { %v172_v61 = vmul.f32 %v675_v60, %v157_v58 }
 0x22c   : > { %173 = vst [vmem:[#allocation2 + $0x8] sm:$0xff] %v172_v61 }
 0x233   : > { %v263_v1 = vld [vmem:[#allocation2 + $0x8] ss:$0 sm:$0xff]  ;;  %v277_v19 = vld [vmem:[#allocation2 + $0x9] ss:$0 sm:$0xff]  ;;  %v291_v27 = vld [vmem:[#allocation2 + $0xa] ss:$0 sm:$0xff] }
 0x234   : > { %v264_v5 = vxor.u32 2147483648, %v263_v1  ;;  %v278_v21 = vxor.u32 2147483648, %v277_v19  ;;  %v292_v29 = vxor.u32 2147483648, %v291_v27  ;;  %v305_v35 = vld [vmem:[#allocation2 + $0xb] ss:$0 sm:$0xff] }
 0x235   : > { %v306_v37 = vxor.u32 2147483648, %v305_v35  ;;  %v319_v43 = vld [vmem:[#allocation2 + $0xc] ss:$0 sm:$0xff]  ;;  %v333_v52 = vld [vmem:[#allocation2 + $0xd] ss:$0 sm:$0xff] }
 0x236   : > { %v272_v9 = vmul.f32 %v264_v5, %v191_v0  ;;  %v334_v54 = vxor.u32 2147483648, %v333_v52  ;;  %v347_v61 = vld [vmem:[#allocation2 + $0xe] ss:$0 sm:$0xff] }
 0x237   : > { %v348_v63 = vxor.u32 2147483648, %v347_v61 }
 0x238   : > { %273 = vadd.xlane.f32.xlu1 %v272_v9 }
 0x287   : > { %v230_v45 = vpop.xlane.xlu2 %229 }
 0x288   : > { %v231_v47 = vsel %vm227_vm14, %v230_v45, %v221_v39  ;;  %v320_v45 = vxor.u32 2147483648, %v319_v43  ;;  %vm323_vm14 = vcmp.eq.s32.totalorder %v633_v3, 12 }
 0x289   : > { %v238_v48 = vmul.f32 %v234_v46, %v231_v47 }
 0x28b   : > { %239 = vadd.xlane.f32.xlu2 %v238_v48 }
 0x2ab   : > { %v274_v20 = vpop.xlane.xlu1 %273 }
 0x2ac   : > { %v275_v22 = vsel %vm267_vm10, %v274_v20, %v191_v0 }
 0x2ad   : > { %v286_v23 = vmul.f32 %v278_v21, %v275_v22 }
 0x2fe   : > { %v240_v2 = vpop.xlane.xlu2 %239 }
 0x2ff   : > { %v241_v6 = vsel %vm237_vm8, %v240_v2, %v231_v47 }
 0x300   : > { %v248_v8 = vmul.f32 %v244_v4, %v241_v6 }
 0x302   : > { %249 = vadd.xlane.f32.xlu0 %v248_v8 }
 0x375   : > { %v250_v11 = vpop.xlane.xlu0 %249 }
 0x376   : > { %v251_v13 = vsel %vm247_vm1, %v250_v11, %v241_v6  ;;  %v361_v6 = vld [vmem:[#allocation2 + $0xf] ss:$0 sm:$0xff] }
 0x377   : > { %v258_v14 = vmul.f32 %v254_v12, %v251_v13  ;;  %v362_v9 = vxor.u32 2147483648, %v361_v6 }
 0x379   : > { %259 = vadd.xlane.f32.xlu2 %v258_v14 }
 0x3ec   : > { %v260_v15 = vpop.xlane.xlu2 %259 }
 0x3ed   : > { %v261_v16 = vsel %vm257_vm9, %v260_v15, %v251_v13 }
 0x3ee   : > { %v268_v17 = vmul.f32 %v264_v5, %v261_v16 }
 0x3f0   : > { %269 = vadd.xlane.f32.xlu0 %v268_v17 }
 0x3f8   : > { %287 = vadd.xlane.f32.xlu0 %v286_v23 }
 0x463   : > { %v270_v24 = vpop.xlane.xlu0 %269 }
 0x464   : > { %v271_v25 = vsel %vm267_vm10, %v270_v24, %v261_v16 }
 0x465   : > { %v282_v26 = vmul.f32 %v278_v21, %v271_v25 }
 0x467   : > { %283 = vadd.xlane.f32.xlu2 %v282_v26 }
 0x46b   : > { %v288_v28 = vpop.xlane.xlu0 %287 }
 0x46c   : > { %v289_v30 = vsel %vm281_vm11, %v288_v28, %v275_v22 }
 0x46d   : > { %v300_v31 = vmul.f32 %v292_v29, %v289_v30 }
 0x46f   : > { %301 = vadd.xlane.f32.xlu2 %v300_v31 }
 0x4da   : > { %v284_v32 = vpop.xlane.xlu2 %283 }
 0x4db   : > { %v285_v33 = vsel %vm281_vm11, %v284_v32, %v271_v25 }
 0x4dc   : > { %v296_v34 = vmul.f32 %v292_v29, %v285_v33 }
 0x4de   : > { %297 = vadd.xlane.f32.xlu1 %v296_v34 }
 0x4e2   : > { %v302_v36 = vpop.xlane.xlu2 %301 }
 0x4e3   : > { %v303_v38 = vsel %vm295_vm12, %v302_v36, %v289_v30 }
 0x4e4   : > { %v314_v39 = vmul.f32 %v306_v37, %v303_v38 }
 0x4e6   : > { %315 = vadd.xlane.f32.xlu1 %v314_v39 }
 0x551   : > { %v298_v40 = vpop.xlane.xlu1 %297 }
 0x552   : > { %v299_v41 = vsel %vm295_vm12, %v298_v40, %v285_v33 }
 0x553   : > { %v310_v42 = vmul.f32 %v306_v37, %v299_v41 }
 0x555   : > { %311 = vadd.xlane.f32.xlu0 %v310_v42 }
 0x559   : > { %v316_v44 = vpop.xlane.xlu1 %315 }
 0x55a   : > { %v317_v46 = vsel %vm309_vm13, %v316_v44, %v303_v38 }
 0x55b   : > { %v328_v47 = vmul.f32 %v320_v45, %v317_v46 }
 0x55d   : > { %329 = vadd.xlane.f32.xlu0 %v328_v47 }
 0x5c8   : > { %v312_v48 = vpop.xlane.xlu0 %311 }
 0x5c9   : > { %v313_v50 = vsel %vm309_vm13, %v312_v48, %v299_v41 }
 0x5ca   : > { %v324_v51 = vmul.f32 %v320_v45, %v313_v50 }
 0x5cc   : > { %325 = vadd.xlane.f32.xlu2 %v324_v51 }
 0x5d0   : > { %v330_v53 = vpop.xlane.xlu0 %329 }
 0x5d1   : > { %v331_v55 = vsel %vm323_vm14, %v330_v53, %v317_v46 }
 0x5d2   : > { %v342_v56 = vmul.f32 %v334_v54, %v331_v55 }
 0x5d4   : > { %343 = vadd.xlane.f32.xlu2 %v342_v56 }
 0x63f   : > { %v326_v57 = vpop.xlane.xlu2 %325 }
 0x640   : > { %v327_v58 = vsel %vm323_vm14, %v326_v57, %v313_v50 }
 0x641   : > { %v338_v59 = vmul.f32 %v334_v54, %v327_v58 }
 0x643   : > { %339 = vadd.xlane.f32.xlu1 %v338_v59 }
 0x647   : > { %v344_v62 = vpop.xlane.xlu2 %343 }
 0x648   : > { %v345_v0 = vsel %vm337_vm15, %v344_v62, %v331_v55 }
 0x649   : > { %v356_v1 = vmul.f32 %v348_v63, %v345_v0 }
 0x64b   : > { %357 = vadd.xlane.f32.xlu1 %v356_v1 }
 0x6b6   : > { %v340_v2 = vpop.xlane.xlu1 %339 }
 0x6b7   : > { %v341_v4 = vsel %vm337_vm15, %v340_v2, %v327_v58 }
 0x6b8   : > { %v352_v5 = vmul.f32 %v348_v63, %v341_v4 }
 0x6ba   : > { %353 = vadd.xlane.f32.xlu0 %v352_v5 }
 0x6be   : > { %v358_v8 = vpop.xlane.xlu1 %357 }
 0x6bf   : > { %v359_v10 = vsel %vm351_vm2, %v358_v8, %v345_v0 }
 0x6c0   : > { %v370_v11 = vmul.f32 %v362_v9, %v359_v10 }
 0x6c2   : > { %371 = vadd.xlane.f32.xlu0 %v370_v11 }
 0x72d   : > { %v354_v12 = vpop.xlane.xlu0 %353 }
 0x72e   : > { %v355_v13 = vsel %vm351_vm2, %v354_v12, %v341_v4 }
 0x72f   : > { %v366_v14 = vmul.f32 %v362_v9, %v355_v13 }
 0x731   : > { %367 = vadd.xlane.f32.xlu2 %v366_v14 }
 0x735   : > { %v372_v15 = vpop.xlane.xlu0 %371 }
 0x736   : > { %v373_v16 = vsel %vm365_vm3, %v372_v15, %v359_v10 }
 0x737   : > { %v406_v17 = vmul.f32 %v373_v16, %v675_v60 }
 0x739   : > { %v408_v19 = vsel %vm163_vm0, %v373_v16, %v406_v17 }
 0x73a   : > { %455 = vst [vmem:[%s421_s24 + $0x8] sm:$0xff] %v408_v19 }
 0x7a4   : > { %v368_v20 = vpop.xlane.xlu2 %367 }
 0x7a5   : > { %v369_v21 = vsel %vm365_vm3, %v368_v20, %v355_v13 }
 0x7a6   : > { %v388_v22 = vmul.f32 %v369_v21, %v652_v18 }
 0x7a8   : > { %v390_v3 = vsel %vm134_vm5, %v369_v21, %v388_v22 }
 0x7a9   : > { %453 = vst [vmem:[%s421_s24] sm:$0xff] %v390_v3 }
 0x7aa PF: > { %s7_s8 = sadd.s32 1, %s592_s8   ;;  %s711_s6 = smov %s588_s7 }
 0x7ab   : > { %p4_p5 = scmp.ge.s32.totalorder %s7_s8, 4   ;;  %s712_s7 = smov %s714_s10 }
 0x7ad   :  { %6 = sbr.rel (!%p4_p5) target bundleno = 2 (0x2), region = 136 }

// kernel: custom-call.12
= control target key start
LH: loop header
LB: loop body
LE: loop exit
PB: predicated region body
PF: predicated region fallthrough
CT: control target
= control target key end

     0   :  { %s605_s6 = smov 0   ;;  %s607_s7 = smov 0   ;;  %s742_s0 = inlined_call_operand.vmem [shape: f32[2,1,16,16], index: 0, kind: input, shape index: {}]   ;;  %s743_s1 = inlined_call_operand.vmem [shape: f32[2,1,16,16], index: 1, kind: output, shape index: {}]  }
   0x1   :  { %s609_s8 = smov 0  }
   0x2 LB: > { %s521_s9 = sadd.s32 4294967295, %s591_s8   ;;  %s33_s10 = sadd.s32 1, %s587_s7  ;;  %s591_s8 = sphi %s609_s8, %s7_s8   ;;  %s587_s7 = sphi %s607_s7, %s745_s7   ;;  %s583_s6 = sphi %s605_s6, %s744_s6  }
   0x3   : > { %p35_p0 = scmp.ge.s32.totalorder %s33_s10, 2  ;;  %p523_p1 = scmp.ge.s32.totalorder %s591_s8, 2 }
   0x4   : > { %s49_s11 = sand.u32 (!%p523_p1), 1, %s591_s8   ;;  %s537_s12 = sshll.u32 (!%p523_p1), %s587_s7, 4 }
   0x5   : > { %s747_s10 = smov (%p35_p0, %s33_s10), 0  ;;  %47 = sbr.rel (%p523_p1) target bundleno = 13 (0xd), region = 16 }
   0x6   : > { %s524_s13 = sshll.u32 (!%p523_p1), %s49_s11, 4  ;;  %s58_s16 = scalar_lea.vmem (!%p523_p1), %s742_s0, %s537_s12 }
   0x7   : > { %s51_s17 = scalar_lea.vmem (!%p523_p1), [#allocation0], %s524_s13 }
   0xa   : > { %v89_v0 = vld [vmem:[%s58_s16] sm:$0xff]  ;;  %v91_v1 = vld [vmem:[%s58_s16 + $0x8] sm:$0xff] }
   0xb   : > { %90 = vst [vmem:[%s51_s17] sm:$0xff] %v89_v0 }
   0xc   : > { %92 = vst [vmem:[%s51_s17 + $0x8] sm:$0xff] %v91_v1 }
   0xd PF: > { %p527_p2 = scmp.ge.s32.totalorder %s591_s8, 1  ;;  %p97_p3 = scmp.lt.s32.totalorder %s591_s8, 3 }
   0xf   : > { %p98_p4 = pnand %p527_p2, %p97_p3 }
  0x11   : > { %101 = sbr.rel (%p98_p4) target bundleno = 1964 (0x7ac), region = 54 }
  0x16   : > { %s104_s18 = sand.u32 1, %s521_s9   ;;  %v115_v2 = vlaneseq  ;;  %v593_v21 = vmov -1.0   ;;  %s538_s21 = sshll.u32 %s583_s6, 4 }
  0x17   : > { %s528_s19 = sshll.u32 %s104_s18, 4  ;;  %s420_s24 = scalar_lea.vmem %s743_s1, %s538_s21 }
  0x18   : > { %v632_v3 = vand.u32 127, %v115_v2  ;;  %v634_v4 = vshrl.u32 %v115_v2, 7  ;;  %s637_s20 = scalar_lea.vmem [#allocation0], %s528_s19 }
  0x19   : > { %v530_v6 = vld [vmem:[%s637_s20 + $0x8] sm:$0xff]  ;;  %v122_v37 = vld [vmem:[%s637_s20] sm:$0xff] }
  0x1a   : > { %v149_v5 = vadd.s32 8, %v634_v4  ;;  %vm117_vm1 = vcmp.lt.s32.totalorder %v632_v3, 16  ;;  %vm189_vm8 = vcmp.eq.s32.totalorder %v632_v3, 15  ;;  %vm197_vm10 = vcmp.eq.s32.totalorder %v632_v3, 14 }
  0x1b   : > { %v190_v22 = vsel %vm189_vm8, 1.0, %v593_v21  ;;  %vm207_vm11 = vcmp.eq.s32.totalorder %v632_v3, 13  ;;  %vm121_vm12 = vcmp.eq.s32.totalorder %v634_v4, %v632_v3  ;;  %vm217_vm13 = vcmp.eq.s32.totalorder %v632_v3, 12 }
  0x1c   : > { %vm150_vm0 = vcmp.eq.s32.totalorder %v149_v5, %v632_v3  ;;  %vm155_vm2 = vcmp.le.s32.totalorder %v149_v5, %v632_v3  ;;  %vm186_vm9 = vcmp.eq.s32.totalorder %v632_v3, %v149_v5  ;;  %v123_v38 = vsel %vm121_vm12, %v122_v37, 0.0 }
  0x1d   : > { %v152_v7 = vsel %vm150_vm0, %v530_v6, 0.0  ;;  %vm156_vm3 = vmand %vm155_vm2, %vm117_vm1  ;;  %v191_v23 = vsel %vm186_vm9, %v190_v22, 0.0  ;;  %vm126_vm14 = vcmp.le.s32.totalorder %v634_v4, %v632_v3  ;;  %vm247_vm8 = vcmp.eq.s32.totalorder %v632_v3, 9 }
  0x1e   : > { %153 = vadd.xlane.f32.xlu0 %v152_v7  ;;  %v157_v16 = vsel %vm156_vm3, %v530_v6, 0.0  ;;  %vm127_vm2 = vmand %vm126_vm14, %vm117_vm1  ;;  %vm237_vm1 = vcmp.eq.s32.totalorder %v632_v3, 10  ;;  %v594_v7 = vmov 0.0   ;;  %vm267_vm9 = vcmp.eq.s32.totalorder %v632_v3, 7 }
  0x1f   : > { %v128_v53 = vsel %vm127_vm2, %v122_v37, 0.0  ;;  %vm295_vm12 = vcmp.eq.s32.totalorder %v632_v3, 5  ;;  %vm323_vm14 = vcmp.eq.s32.totalorder %v632_v3, 3  ;;  %vm351_vm2 = vcmp.eq.s32.totalorder %v632_v3, 1 }
  0x91   : > { %v641_v8 = vpop.xlane.xlu0 %153 }
  0x92   : > { %565 = vrcp.f32 %v641_v8  ;;  %v169_v12 = vand.u32 2147483648, %v641_v8  ;;  %v167_v14 = vand.u32 2147483647, %v641_v8  ;;  %vm163_vm5 = vweird.f32 %v641_v8 }
  0x94   : > { %v170_v17 = vor.u32 1.1754944e-38, %v169_v12  ;;  %vm168_vm7 = vcmp.eq.f32.partialorder %v167_v14, 8.507059e+37 }
  0x98   : > { %v566_v9 = vpop.eup %565 }
  0x99   : > { %v159_v10 = vmul.f32 %v566_v9, %v641_v8  ;;  %vm164_vm4 = vweird.f32 %v566_v9 }
  0x9a   : > { %vm165_vm6 = vmor %vm163_vm5, %vm164_vm4 }
  0x9b   : > { %v160_v11 = vsub.f32 1.0, %v159_v10 }
  0x9d   : > { %v161_v13 = vmul.f32 %v566_v9, %v160_v11 }
  0x9f   : > { %v162_v15 = vadd.f32 %v566_v9, %v161_v13 }
  0xa1   : > { %v166_v18 = vsel %vm165_vm6, %v566_v9, %v162_v15  ;;  %vm227_vm6 = vcmp.eq.s32.totalorder %v632_v3, 11 }
  0xa2   : > { %v654_v19 = vsel %vm168_vm7, %v170_v17, %v166_v18  ;;  %vm179_vm7 = vcmp.eq.s32.totalorder %v632_v3, %v634_v4 }
  0xa3   : > { %v172_v20 = vmul.f32 %v654_v19, %v157_v16  ;;  %v180_v9 = vsel %vm179_vm7, -1.0, %v594_v7 }
  0xa5   : > { %173 = vst [vmem:[#allocation2 + $0x8] sm:$0xff] %v172_v20 }
  0xac   : > { %v193_v24 = vld [vmem:[#allocation2 + $0xe] ss:$0 sm:$0xff]  ;;  %v203_v27 = vld [vmem:[#allocation2 + $0xd] ss:$0 sm:$0xff]  ;;  %v213_v32 = vld [vmem:[#allocation2 + $0xc] ss:$0 sm:$0xff] }
  0xad   : > { %v194_v25 = vxor.u32 2147483648, %v193_v24  ;;  %v204_v29 = vxor.u32 2147483648, %v203_v27  ;;  %v214_v34 = vxor.u32 2147483648, %v213_v32  ;;  %v223_v39 = vld [vmem:[#allocation2 + $0xb] ss:$0 sm:$0xff] }
  0xae   : > { %v224_v41 = vxor.u32 2147483648, %v223_v39  ;;  %v233_v57 = vld [vmem:[#allocation2 + $0xa] ss:$0 sm:$0xff]  ;;  %v243_v62 = vld [vmem:[#allocation2 + $0x9] ss:$0 sm:$0xff] }
  0xaf   : > { %v198_v26 = vmul.f32 %v194_v25, %v191_v23  ;;  %v234_v59 = vxor.u32 2147483648, %v233_v57  ;;  %v244_v0 = vxor.u32 2147483648, %v243_v62  ;;  %v253_v11 = vld [vmem:[#allocation2 + $0x8] ss:$0 sm:$0xff] }
  0xb0   : > { %v254_v13 = vxor.u32 2147483648, %v253_v11 }
  0xb1   : > { %199 = vadd.xlane.f32.xlu0 %v198_v26 }
 0x124   : > { %v200_v28 = vpop.xlane.xlu0 %199 }
 0x125   : > { %v201_v30 = vsel %vm197_vm10, %v200_v28, %v191_v23  ;;  %vm257_vm10 = vcmp.eq.s32.totalorder %v632_v3, 8 }
 0x126   : > { %v208_v31 = vmul.f32 %v204_v29, %v201_v30 }
 0x128   : > { %209 = vadd.xlane.f32.xlu1 %v208_v31 }
 0x19b   : > { %v210_v33 = vpop.xlane.xlu1 %209 }
 0x19c   : > { %v211_v35 = vsel %vm207_vm11, %v210_v33, %v201_v30  ;;  %vm281_vm11 = vcmp.eq.s32.totalorder %v632_v3, 6 }
 0x19d   : > { %v218_v36 = vmul.f32 %v214_v34, %v211_v35 }
 0x19f   : > { %219 = vadd.xlane.f32.xlu1 %v218_v36 }
 0x1a7   : > { %124 = vadd.xlane.f32.xlu1 %v123_v38 }
 0x212   : > { %v220_v40 = vpop.xlane.xlu1 %219 }
 0x213   : > { %v221_v42 = vsel %vm217_vm13, %v220_v40, %v211_v35  ;;  %vm309_vm13 = vcmp.eq.s32.totalorder %v632_v3, 4 }
 0x214   : > { %v228_v43 = vmul.f32 %v224_v41, %v221_v42 }
 0x216   : > { %229 = vadd.xlane.f32.xlu2 %v228_v43 }
 0x21a   : > { %v665_v44 = vpop.xlane.xlu1 %124 }
 0x21b   : > { %567 = vrcp.f32 %v665_v44  ;;  %v140_v47 = vand.u32 2147483648, %v665_v44  ;;  %vm134_vm15 = vweird.f32 %v665_v44  ;;  %v138_v49 = vand.u32 2147483647, %v665_v44 }
 0x21d   : > { %v141_v51 = vor.u32 1.1754944e-38, %v140_v47  ;;  %vm139_vm4 = vcmp.eq.f32.partialorder %v138_v49, 8.507059e+37 }
 0x221   : > { %v568_v45 = vpop.eup %567 }
 0x222   : > { %v130_v46 = vmul.f32 %v568_v45, %v665_v44  ;;  %vm135_vm0 = vweird.f32 %v568_v45 }
 0x223   : > { %vm136_vm3 = vmor %vm134_vm15, %vm135_vm0  ;;  %vm337_vm0 = vcmp.eq.s32.totalorder %v632_v3, 2 }
 0x224   : > { %v131_v48 = vsub.f32 1.0, %v130_v46 }
 0x226   : > { %v132_v50 = vmul.f32 %v568_v45, %v131_v48 }
 0x228   : > { %v133_v52 = vadd.f32 %v568_v45, %v132_v50 }
 0x22a   : > { %v137_v54 = vsel %vm136_vm3, %v568_v45, %v133_v52  ;;  %vm364_vm3 = vcmp.eq.s32.totalorder %v632_v3, 0 }
 0x22b   : > { %v678_v55 = vsel %vm139_vm4, %v141_v51, %v137_v54 }
 0x22c   : > { %v143_v56 = vmul.f32 %v678_v55, %v128_v53 }
 0x22e   : > { %144 = vst [vmem:[#allocation2] sm:$0xff] %v143_v56 }
 0x235   : > { %v263_v2 = vld [vmem:[#allocation2 + $0x7] ss:$0 sm:$0xff]  ;;  %v277_v16 = vld [vmem:[#allocation2 + $0x6] ss:$0 sm:$0xff]  ;;  %v291_v24 = vld [vmem:[#allocation2 + $0x5] ss:$0 sm:$0xff] }
 0x236   : > { %v264_v6 = vxor.u32 2147483648, %v263_v2  ;;  %v278_v17 = vxor.u32 2147483648, %v277_v16  ;;  %v292_v26 = vxor.u32 2147483648, %v291_v24  ;;  %v305_v32 = vld [vmem:[#allocation2 + $0x4] ss:$0 sm:$0xff] }
 0x237   : > { %v306_v34 = vxor.u32 2147483648, %v305_v32  ;;  %v319_v40 = vld [vmem:[#allocation2 + $0x3] ss:$0 sm:$0xff]  ;;  %v333_v49 = vld [vmem:[#allocation2 + $0x2] ss:$0 sm:$0xff] }
 0x238   : > { %v268_v10 = vmul.f32 %v264_v6, %v180_v9  ;;  %v334_v51 = vxor.u32 2147483648, %v333_v49  ;;  %v360_v2 = vld [vmem:[#allocation2] ss:$0 sm:$0xff] }
 0x289   : > { %v230_v58 = vpop.xlane.xlu2 %229 }
 0x28a   : > { %v231_v60 = vsel %vm227_vm6, %v230_v58, %v221_v42  ;;  %v320_v42 = vxor.u32 2147483648, %v319_v40  ;;  %v347_v58 = vld [vmem:[#allocation2 + $0x1] ss:$0 sm:$0xff] }
 0x28b   : > { %v238_v61 = vmul.f32 %v234_v59, %v231_v60 }
 0x28d   : > { %239 = vadd.xlane.f32.xlu2 %v238_v61 }
 0x300   : > { %v240_v63 = vpop.xlane.xlu2 %239 }
 0x301   : > { %v241_v1 = vsel %vm237_vm1, %v240_v63, %v231_v60  ;;  %v348_v60 = vxor.u32 2147483648, %v347_v58 }
 0x302   : > { %v248_v5 = vmul.f32 %v244_v0, %v241_v1 }
 0x304   : > { %249 = vadd.xlane.f32.xlu0 %v248_v5 }
 0x30c   : > { %269 = vadd.xlane.f32.xlu0 %v268_v10 }
 0x377   : > { %v250_v12 = vpop.xlane.xlu0 %249 }
 0x378   : > { %v251_v14 = vsel %vm247_vm8, %v250_v12, %v241_v1 }
 0x379   : > { %v258_v15 = vmul.f32 %v254_v13, %v251_v14 }
 0x37b   : > { %259 = vadd.xlane.f32.xlu2 %v258_v15 }
 0x37f   : > { %v270_v18 = vpop.xlane.xlu0 %269 }
 0x380   : > { %v271_v4 = vsel %vm267_vm9, %v270_v18, %v180_v9 }
 0x381   : > { %v282_v20 = vmul.f32 %v278_v17, %v271_v4 }
 0x383   : > { %283 = vadd.xlane.f32.xlu2 %v282_v20 }
 0x3ee   : > { %v260_v21 = vpop.xlane.xlu2 %259 }
 0x3ef   : > { %v261_v22 = vsel %vm257_vm10, %v260_v21, %v251_v14 }
 0x3f0   : > { %v272_v23 = vmul.f32 %v264_v6, %v261_v22  ;;  %v361_v6 = vxor.u32 2147483648, %v360_v2 }
 0x3f2   : > { %273 = vadd.xlane.f32.xlu1 %v272_v23 }
 0x3f6   : > { %v284_v25 = vpop.xlane.xlu2 %283 }
 0x3f7   : > { %v285_v27 = vsel %vm281_vm11, %v284_v25, %v271_v4 }
 0x3f8   : > { %v296_v28 = vmul.f32 %v292_v26, %v285_v27 }
 0x3fa   : > { %297 = vadd.xlane.f32.xlu1 %v296_v28 }
 0x465   : > { %v274_v29 = vpop.xlane.xlu1 %273 }
 0x466   : > { %v275_v30 = vsel %vm267_vm9, %v274_v29, %v261_v22 }
 0x467   : > { %v286_v31 = vmul.f32 %v278_v17, %v275_v30 }
 0x469   : > { %287 = vadd.xlane.f32.xlu0 %v286_v31 }
 0x46d   : > { %v298_v33 = vpop.xlane.xlu1 %297 }
 0x46e   : > { %v299_v35 = vsel %vm295_vm12, %v298_v33, %v285_v27 }
 0x46f   : > { %v310_v36 = vmul.f32 %v306_v34, %v299_v35 }
 0x471   : > { %311 = vadd.xlane.f32.xlu0 %v310_v36 }
 0x4dc   : > { %v288_v37 = vpop.xlane.xlu0 %287 }
 0x4dd   : > { %v289_v38 = vsel %vm281_vm11, %v288_v37, %v275_v30 }
 0x4de   : > { %v300_v39 = vmul.f32 %v292_v26, %v289_v38 }
 0x4e0   : > { %301 = vadd.xlane.f32.xlu2 %v300_v39 }
 0x4e4   : > { %v312_v41 = vpop.xlane.xlu0 %311 }
 0x4e5   : > { %v313_v43 = vsel %vm309_vm13, %v312_v41, %v299_v35 }
 0x4e6   : > { %v324_v45 = vmul.f32 %v320_v42, %v313_v43 }
 0x4e8   : > { %325 = vadd.xlane.f32.xlu2 %v324_v45 }
 0x553   : > { %v302_v46 = vpop.xlane.xlu2 %301 }
 0x554   : > { %v303_v47 = vsel %vm295_vm12, %v302_v46, %v289_v38 }
 0x555   : > { %v314_v48 = vmul.f32 %v306_v34, %v303_v47 }
 0x557   : > { %315 = vadd.xlane.f32.xlu1 %v314_v48 }
 0x55b   : > { %v326_v50 = vpop.xlane.xlu2 %325 }
 0x55c   : > { %v327_v52 = vsel %vm323_vm14, %v326_v50, %v313_v43 }
 0x55d   : > { %v338_v53 = vmul.f32 %v334_v51, %v327_v52 }
 0x55f   : > { %339 = vadd.xlane.f32.xlu1 %v338_v53 }
 0x5ca   : > { %v316_v54 = vpop.xlane.xlu1 %315 }
 0x5cb   : > { %v317_v56 = vsel %vm309_vm13, %v316_v54, %v303_v47 }
 0x5cc   : > { %v328_v57 = vmul.f32 %v320_v42, %v317_v56 }
 0x5ce   : > { %329 = vadd.xlane.f32.xlu0 %v328_v57 }
 0x5d2   : > { %v340_v59 = vpop.xlane.xlu1 %339 }
 0x5d3   : > { %v341_v61 = vsel %vm337_vm0, %v340_v59, %v327_v52 }
 0x5d4   : > { %v352_v62 = vmul.f32 %v348_v60, %v341_v61 }
 0x5d6   : > { %353 = vadd.xlane.f32.xlu0 %v352_v62 }
 0x641   : > { %v330_v63 = vpop.xlane.xlu0 %329 }
 0x642   : > { %v331_v0 = vsel %vm323_vm14, %v330_v63, %v317_v56 }
 0x643   : > { %v342_v1 = vmul.f32 %v334_v51, %v331_v0 }
 0x645   : > { %343 = vadd.xlane.f32.xlu2 %v342_v1 }
 0x649   : > { %v354_v5 = vpop.xlane.xlu0 %353 }
 0x64a   : > { %v355_v7 = vsel %vm351_vm2, %v354_v5, %v341_v61 }
 0x64b   : > { %v365_v9 = vmul.f32 %v361_v6, %v355_v7 }
 0x64d   : > { %366 = vadd.xlane.f32.xlu2 %v365_v9 }
 0x6b8   : > { %v344_v10 = vpop.xlane.xlu2 %343 }
 0x6b9   : > { %v345_v11 = vsel %vm337_vm0, %v344_v10, %v331_v0 }
 0x6ba   : > { %v356_v12 = vmul.f32 %v348_v60, %v345_v11 }
 0x6bc   : > { %357 = vadd.xlane.f32.xlu1 %v356_v12 }
 0x6c0   : > { %v367_v13 = vpop.xlane.xlu2 %366 }
 0x6c1   : > { %v368_v14 = vsel %vm364_vm3, %v367_v13, %v355_v7 }
 0x6c2   : > { %v387_v15 = vmul.f32 %v368_v14, %v678_v55 }
 0x6c4   : > { %v389_v16 = vsel %vm134_vm15, %v368_v14, %v387_v15 }
 0x6c5   : > { %452 = vst [vmem:[%s420_s24] sm:$0xff] %v389_v16 }
 0x72f   : > { %v358_v17 = vpop.xlane.xlu1 %357 }
 0x730   : > { %v359_v18 = vsel %vm351_vm2, %v358_v17, %v345_v11 }
 0x731   : > { %v369_v4 = vmul.f32 %v361_v6, %v359_v18 }
 0x733   : > { %370 = vadd.xlane.f32.xlu0 %v369_v4 }
 0x7a6   : > { %v371_v20 = vpop.xlane.xlu0 %370 }
 0x7a7   : > { %v372_v21 = vsel %vm364_vm3, %v371_v20, %v359_v18 }
 0x7a8   : > { %v405_v22 = vmul.f32 %v372_v21, %v654_v19 }
 0x7aa   : > { %v407_v55 = vsel %vm163_vm5, %v372_v21, %v405_v22 }
 0x7ab   : > { %454 = vst [vmem:[%s420_s24 + $0x8] sm:$0xff] %v407_v55 }
 0x7ac PF: > { %s7_s8 = sadd.s32 1, %s591_s8   ;;  %s744_s6 = smov %s587_s7 }
 0x7ad   : > { %p4_p5 = scmp.ge.s32.totalorder %s7_s8, 4   ;;  %s745_s7 = smov %s747_s10 }
 0x7af   :  { %6 = sbr.rel (!%p4_p5) target bundleno = 2 (0x2), region = 135 }

// kernel: soft_label_propagation.11
= control target key start
LH: loop header
LB: loop body
LE: loop exit
PB: predicated region body
PF: predicated region fallthrough
CT: control target
= control target key end

     0   :  { %v15_v0 = vlaneseq  ;;  %v3914_v8 = vmov 0.0   ;;  %s6232_s0 = inlined_call_operand.vmem [shape: f32[2,16,32], index: 0, kind: input, shape index: {}]   ;;  %s6233_s1 = inlined_call_operand.vmem [shape: f32[2,16,32], index: 1, kind: output, shape index: {0}]   ;;  %s6234_s2 = inlined_call_operand.vmem [shape: f32[2,16,16], index: 2, kind: output, shape index: {1}]  }
   0x1   :  { %v11_v1 = vld [vmem:[%s6232_s0] sm:$0xff]   ;;  %v12_v2 = vld [vmem:[%s6232_s0 + $0x8] sm:$0xff]   ;;  %v13_v3 = vld [vmem:[%s6232_s0 + $0x10] sm:$0xff]  }
   0x2   :  { %v14_v4 = vld [vmem:[%s6232_s0 + $0x18] sm:$0xff]   ;;  %v3944_v5 = vshrl.u32 %v15_v0, 7  ;;  %v3946_v6 = vand.u32 127, %v15_v0  ;;  %s3967_s0 = smov 0  }
   0x4   :  { %v3949_v7 = vadd.s32 8, %v3944_v5  ;;  %vm20_vm0 = vcmp.eq.s32.totalorder %v3944_v5, %v3946_v6 }
   0x5   :  { %v3953_v9 = vsel %vm20_vm0, 1.0, %v3914_v8 }
   0x6   :  { %vm21_vm1 = vcmp.eq.s32.totalorder %v3949_v7, %v3946_v6 }
   0x7   :  { %v3957_v10 = vsel %vm21_vm1, 1.0, %v3914_v8 }
   0x8 LB: > { %vm44_vm2 = vcmask 261120   ;;  %3758 = vset.pattern.permute.xlu1 %v3944_v5  ;;  %3760 = vset.pattern.permute.xlu0 %v3944_v5  ;;  %v40_v11 = vmul.f32 %v3908_v1, %v3908_v1  ;;  %v42_v12 = vmul.f32 %v3900_v3, %v3900_v3  ;;  %v41_v15 = vmul.f32 %v3904_v2, %v3904_v2  ;;  %s31_s0 = sadd.s32 1, %s3912_s0   ;;  %s3912_s0 = sphi %s3967_s0, %s31_s0   ;;  %v3908_v1 = vphi %v11_v1, %v6313_v1   ;;  %v3904_v2 = vphi %v12_v2, %v6312_v2   ;;  %v3900_v3 = vphi %v13_v3, %v6311_v3   ;;  %v3896_v4 = vphi %v14_v4, %v6310_v4  }
   0x9   : > { %3759 = vset.pattern.permute.xlu2 %v3949_v7  ;;  %3703 = vmatpush.xpose.msk.msra.mxu0 %vm44_vm2, %v3904_v2  ;;  %v43_v16 = vmul.f32 %v3896_v4, %v3896_v4  ;;  %v4016_v21 = vadd.s32 4294967288, %v3946_v6  ;;  %vm122_vm3 = vcmask 130112   ;;  %vm184_vm4 = vcmask 130048   ;;  %p28_p0 = scmp.ge.s32.totalorder %s31_s0, 2  }
   0xa   : > { %3707 = vmatpush.xpose.msk.msra.mxu1 %vm44_vm2, %v3896_v4  ;;  %v45_v13 = vsel %vm44_vm2, %v40_v11, 0.0  ;;  %v51_v14 = vsel %vm44_vm2, %v42_v12, 0.0  ;;  %v48_v17 = vsel %vm44_vm2, %v41_v15, 0.0 }
   0xb   : > { %46 = vadd.xlane.f32.xlu0 %v45_v13  ;;  %52 = vadd.xlane.f32.xlu1 %v51_v14  ;;  %v54_v18 = vsel %vm44_vm2, %v43_v16, 0.0 }
   0xd   : > { %3704 = vmatpush.xpose.msk.msra.mxu0 %vm44_vm2, %v3908_v1 }
   0xe   : > { %3708 = vmatpush.xpose.msk.msra.mxu1 %vm44_vm2, %v3900_v3 }
  0x10   : > { %3705 = vmatmul.msk.f32.vlgmr.msra.gmra.mxu0 %vm44_vm2, %v3908_v1 }
  0x11   : > { %3709 = vmatmul.msk.f32.vlgmr.msra.gmra.mxu1 %vm44_vm2, %v3900_v3 }
  0x13   : > { %49 = vadd.xlane.f32.xlu0 %v48_v17  ;;  %55 = vadd.xlane.f32.xlu1 %v54_v18 }
  0x18   : > { %3706 = vmatmul.msk.f32.gmra.mxu0 %vm44_vm2, %v3904_v2 }
  0x19   : > { %3710 = vmatmul.msk.f32.gmra.mxu1 %vm44_vm2, %v3896_v4 }
  0x7e   : > { %v47_v19 = vpop.xlane.xlu0 %46  ;;  %v53_v20 = vpop.xlane.xlu1 %52 }
  0x7f   : > { %v124_v23 = vperm.slane %v53_v20, %v3946_v6  ;;  %v119_v25 = vperm.slane %v47_v19, %v3946_v6 }
  0x86   : > { %v50_v22 = vpop.xlane.xlu0 %49  ;;  %v56_v26 = vpop.xlane.xlu1 %55 }
  0x87   : > { %v121_v24 = vperm.slane %v50_v22, %v4016_v21  ;;  %v125_v27 = vperm.slane %v56_v26, %v4016_v21 }
  0x89   : > { %v123_v28 = vsel %vm122_vm3, %v121_v24, %v119_v25  ;;  %v126_v29 = vsel %vm122_vm3, %v125_v27, %v124_v23 }
  0x8a   : > { %v150_v32 = vadd.f32 %v126_v29, %v53_v20  ;;  %v148_v33 = vadd.f32 %v123_v28, %v47_v19  ;;  %v151_v40 = vadd.f32 %v126_v29, %v56_v26  ;;  %v149_v43 = vadd.f32 %v123_v28, %v50_v22 }
  0x8d   : > { %v80_v30 = vpop.f32.mrf.mxu0 }
  0x8e   : > { %v109_v31 = vpop.f32.mrf.mxu1  ;;  %v152_v34 = vmul.f32 2.0, %v80_v30 }
  0x8f   : > { %v154_v35 = vmul.f32 2.0, %v109_v31 }
  0x90   : > { %v156_v36 = vsub.f32 %v148_v33, %v152_v34 }
  0x91   : > { %v158_v37 = vsub.f32 %v150_v32, %v154_v35 }
  0x92   : > { %v160_v38 = vmax.f32 %v156_v36, 0.0 }
  0x93   : > { %v162_v39 = vmax.f32 %v158_v37, 0.0 }
  0x94   : > { %v164_v41 = vmul.f32 -1.0, %v160_v38 }
  0x95   : > { %v166_v42 = vmul.f32 -1.0, %v162_v39  ;;  %v83_v44 = vpop.f32.mrf.mxu0 }
  0x96   : > { %v112_v45 = vpop.f32.mrf.mxu1  ;;  %v168_v46 = vmul.f32 1.442695, %v164_v41  ;;  %v153_v48 = vmul.f32 2.0, %v83_v44 }
  0x97   : > { %v172_v47 = vmul.f32 1.442695, %v166_v42  ;;  %v155_v49 = vmul.f32 2.0, %v112_v45 }
  0x98   : > { %3795 = vpow2.f32 %v168_v46  ;;  %v157_v50 = vsub.f32 %v149_v43, %v153_v48 }
  0x99   : > { %v159_v51 = vsub.f32 %v151_v40, %v155_v49  ;;  %3797 = vpow2.f32 %v172_v47 }
  0x9a   : > { %v161_v52 = vmax.f32 %v157_v50, 0.0 }
  0x9b   : > { %v163_v53 = vmax.f32 %v159_v51, 0.0 }
  0x9c   : > { %v165_v54 = vmul.f32 -1.0, %v161_v52 }
  0x9d   : > { %v167_v55 = vmul.f32 -1.0, %v163_v53 }
  0x9e   : > { %v4024_v56 = vpop.eup %3795  ;;  %v170_v57 = vmul.f32 1.442695, %v165_v54 }
  0x9f   : > { %v174_v58 = vmul.f32 1.442695, %v167_v55  ;;  %v4026_v59 = vpop.eup %3797  ;;  %vm176_vm5 = vcmp.ge.f32.partialorder %v4024_v56, 1.0 }
  0xa0   : > { %3799 = vpow2.f32 %v170_v57  ;;  %v180_v60 = vsel %vm176_vm5, -1.0, %v4024_v56  ;;  %vm178_vm6 = vcmp.ge.f32.partialorder %v4026_v59, 1.0 }
  0xa1   : > { %3801 = vpow2.f32 %v174_v58  ;;  %v185_v61 = vsel %vm184_vm4, %v180_v60, -inf  ;;  %v182_v62 = vsel %vm178_vm6, -1.0, %v4026_v59 }
  0xa2   : > { %186 = vmax.xlane.f32.xlu2 %v185_v61  ;;  %v191_v63 = vsel %vm184_vm4, %v182_v62, -inf }
  0xa3   : > { %192 = vmax.xlane.f32.xlu0 %v191_v63 }
  0xa6   : > { %v4034_v0 = vpop.eup %3799 }
  0xa7   : > { %v4036_v8 = vpop.eup %3801  ;;  %vm177_vm7 = vcmp.ge.f32.partialorder %v4034_v0, 1.0 }
  0xa8   : > { %v181_v11 = vsel %vm177_vm7, -1.0, %v4034_v0  ;;  %vm179_vm8 = vcmp.ge.f32.partialorder %v4036_v8, 1.0 }
  0xa9   : > { %v188_v12 = vsel %vm184_vm4, %v181_v11, -inf  ;;  %v183_v13 = vsel %vm179_vm8, -1.0, %v4036_v8 }
  0xaa   : > { %189 = vmax.xlane.f32.xlu2 %v188_v12  ;;  %v194_v14 = vsel %vm184_vm4, %v183_v13, -inf }
  0xab   : > { %195 = vmax.xlane.f32.xlu1 %v194_v14 }
 0x115   : > { %v187_v15 = vpop.xlane.xlu2 %186 }
 0x116   : > { %vm197_vm9 = vcmp.ge.f32.partialorder %v180_v60, %v187_v15  ;;  %v193_v16 = vpop.xlane.xlu0 %192 }
 0x117   : > { %vm199_vm10 = vcmp.ge.f32.partialorder %v182_v62, %v193_v16  ;;  %v201_v17 = vsel %vm197_vm9, -1.0, %v180_v60 }
 0x118   : > { %v203_v18 = vsel %vm199_vm10, -1.0, %v182_v62  ;;  %v205_v19 = vsel %vm184_vm4, %v201_v17, -inf }
 0x119   : > { %206 = vmax.xlane.f32.xlu2 %v205_v19  ;;  %v211_v20 = vsel %vm184_vm4, %v203_v18, -inf }
 0x11a   : > { %212 = vmax.xlane.f32.xlu1 %v211_v20 }
 0x11d   : > { %v190_v22 = vpop.xlane.xlu2 %189 }
 0x11e   : > { %vm198_vm11 = vcmp.ge.f32.partialorder %v181_v11, %v190_v22  ;;  %v196_v23 = vpop.xlane.xlu1 %195 }
 0x11f   : > { %vm200_vm12 = vcmp.ge.f32.partialorder %v183_v13, %v196_v23  ;;  %v202_v24 = vsel %vm198_vm11, -1.0, %v181_v11 }
 0x120   : > { %v204_v25 = vsel %vm200_vm12, -1.0, %v183_v13  ;;  %v208_v26 = vsel %vm184_vm4, %v202_v24, -inf }
 0x121   : > { %v214_v27 = vsel %vm184_vm4, %v204_v25, -inf  ;;  %209 = vmax.xlane.f32.xlu0 %v208_v26 }
 0x122   : > { %215 = vmax.xlane.f32.xlu2 %v214_v27 }
 0x18c   : > { %v207_v28 = vpop.xlane.xlu2 %206 }
 0x18d   : > { %vm217_vm13 = vcmp.ge.f32.partialorder %v201_v17, %v207_v28  ;;  %v213_v29 = vpop.xlane.xlu1 %212 }
 0x18e   : > { %vm219_vm14 = vcmp.ge.f32.partialorder %v203_v18, %v213_v29  ;;  %v221_v30 = vsel %vm217_vm13, -1.0, %v201_v17 }
 0x18f   : > { %v225_v31 = vsel %vm184_vm4, %v221_v30, -inf  ;;  %v223_v32 = vsel %vm219_vm14, -1.0, %v203_v18 }
 0x190   : > { %226 = vmax.xlane.f32.xlu0 %v225_v31  ;;  %v231_v33 = vsel %vm184_vm4, %v223_v32, -inf }
 0x191   : > { %232 = vmax.xlane.f32.xlu2 %v231_v33 }
 0x194   : > { %v210_v34 = vpop.xlane.xlu0 %209 }
 0x195   : > { %v216_v35 = vpop.xlane.xlu2 %215  ;;  %vm218_vm15 = vcmp.ge.f32.partialorder %v202_v24, %v210_v34 }
 0x196   : > { %vm220_vm0 = vcmp.ge.f32.partialorder %v204_v25, %v216_v35  ;;  %v222_v36 = vsel %vm218_vm15, -1.0, %v202_v24 }
 0x197   : > { %v224_v37 = vsel %vm220_vm0, -1.0, %v204_v25  ;;  %v228_v38 = vsel %vm184_vm4, %v222_v36, -inf }
 0x198   : > { %v234_v39 = vsel %vm184_vm4, %v224_v37, -inf  ;;  %229 = vmax.xlane.f32.xlu1 %v228_v38 }
 0x199   : > { %235 = vmax.xlane.f32.xlu0 %v234_v39 }
 0x203   : > { %v227_v40 = vpop.xlane.xlu0 %226 }
 0x204   : > { %v233_v41 = vpop.xlane.xlu2 %232  ;;  %vm237_vm1 = vcmp.ge.f32.partialorder %v221_v30, %v227_v40 }
 0x205   : > { %vm239_vm5 = vcmp.ge.f32.partialorder %v223_v32, %v233_v41  ;;  %v241_v42 = vsel %vm237_vm1, -1.0, %v221_v30 }
 0x206   : > { %v243_v43 = vsel %vm239_vm5, -1.0, %v223_v32  ;;  %v245_v44 = vsel %vm184_vm4, %v241_v42, -inf }
 0x207   : > { %v251_v45 = vsel %vm184_vm4, %v243_v43, -inf  ;;  %246 = vmax.xlane.f32.xlu1 %v245_v44 }
 0x208   : > { %252 = vmax.xlane.f32.xlu0 %v251_v45 }
 0x20b   : > { %v230_v46 = vpop.xlane.xlu1 %229 }
 0x20c   : > { %vm238_vm6 = vcmp.ge.f32.partialorder %v222_v36, %v230_v46  ;;  %v236_v47 = vpop.xlane.xlu0 %235 }
 0x20d   : > { %vm240_vm7 = vcmp.ge.f32.partialorder %v224_v37, %v236_v47  ;;  %v242_v48 = vsel %vm238_vm6, -1.0, %v222_v36 }
 0x20e   : > { %v244_v49 = vsel %vm240_vm7, -1.0, %v224_v37  ;;  %v248_v50 = vsel %vm184_vm4, %v242_v48, -inf }
 0x20f   : > { %249 = vmax.xlane.f32.xlu2 %v248_v50  ;;  %v254_v51 = vsel %vm184_vm4, %v244_v49, -inf }
 0x210   : > { %255 = vmax.xlane.f32.xlu1 %v254_v51 }
 0x27a   : > { %v247_v52 = vpop.xlane.xlu1 %246 }
 0x27b   : > { %vm257_vm8 = vcmp.ge.f32.partialorder %v241_v42, %v247_v52  ;;  %v253_v53 = vpop.xlane.xlu0 %252 }
 0x27c   : > { %vm259_vm9 = vcmp.ge.f32.partialorder %v243_v43, %v253_v53  ;;  %v261_v54 = vsel %vm257_vm8, -1.0, %v241_v42 }
 0x27d   : > { %v265_v55 = vsel %vm184_vm4, %v261_v54, -inf  ;;  %v263_v57 = vsel %vm259_vm9, -1.0, %v243_v43 }
 0x27e   : > { %266 = vmax.xlane.f32.xlu2 %v265_v55  ;;  %v271_v58 = vsel %vm184_vm4, %v263_v57, -inf }
 0x27f   : > { %272 = vmax.xlane.f32.xlu1 %v271_v58 }
 0x282   : > { %v250_v60 = vpop.xlane.xlu2 %249 }
 0x283   : > { %vm258_vm10 = vcmp.ge.f32.partialorder %v242_v48, %v250_v60  ;;  %v256_v61 = vpop.xlane.xlu1 %255 }
 0x284   : > { %vm260_vm11 = vcmp.ge.f32.partialorder %v244_v49, %v256_v61  ;;  %v262_v62 = vsel %vm258_vm10, -1.0, %v242_v48 }
 0x285   : > { %v268_v63 = vsel %vm184_vm4, %v262_v62, -inf  ;;  %v264_v11 = vsel %vm260_vm11, -1.0, %v244_v49 }
 0x286   : > { %269 = vmax.xlane.f32.xlu0 %v268_v63  ;;  %v274_v12 = vsel %vm184_vm4, %v264_v11, -inf }
 0x287   : > { %275 = vmax.xlane.f32.xlu2 %v274_v12 }
 0x2f1   : > { %v267_v13 = vpop.xlane.xlu2 %266 }
 0x2f2   : > { %vm277_vm12 = vcmp.ge.f32.partialorder %v4024_v56, %v267_v13  ;;  %v273_v14 = vpop.xlane.xlu1 %272 }
 0x2f3   : > { %v281_v15 = vsel %vm277_vm12, %v4024_v56, 0.0  ;;  %vm279_vm13 = vcmp.ge.f32.partialorder %v4026_v59, %v273_v14 }
 0x2f4   : > { %v4064_v16 = vsel %vm279_vm13, %v4026_v59, 0.0  ;;  %v285_v17 = vsel %vm184_vm4, %v281_v15, 0.0  ;;  %v341_v18 = vperm.slane %v281_v15, 0  ;;  %v367_v20 = vperm.slane %v281_v15, 2 }
 0x2f5   : > { %286 = vadd.xlane.f32.xlu0 %v285_v17  ;;  %v291_v19 = vsel %vm184_vm4, %v4064_v16, 0.0  ;;  %v380_v22 = vperm.slane %v281_v15, 3  ;;  %v354_v23 = vperm.slane %v281_v15, 1  ;;  %v393_v56 = vperm.slane %v281_v15, 4 }
 0x2f6   : > { %292 = vadd.xlane.f32.xlu2 %v291_v19  ;;  %346 = vperm.xlu1 %3758, %v341_v18   ;;  %v406_v59 = vperm.slane %v281_v15, 5  ;;  %v419_v24 = vperm.slane %v281_v15, 6  ;;  %v432_v25 = vperm.slane %v281_v15, 7  ;;  %v549_v26 = vperm.slane %v4064_v16, 0 }
 0x2f7   : > { %v562_v27 = vperm.slane %v4064_v16, 1  ;;  %v575_v28 = vperm.slane %v4064_v16, 2  ;;  %v588_v29 = vperm.slane %v4064_v16, 3  ;;  %v627_v30 = vperm.slane %v4064_v16, 6 }
 0x2f8   : > { %v601_v31 = vperm.slane %v4064_v16, 4  ;;  %v614_v32 = vperm.slane %v4064_v16, 5  ;;  %v640_v33 = vperm.slane %v4064_v16, 7 }
 0x2f9   : > { %v270_v38 = vpop.xlane.xlu0 %269 }
 0x2fa   : > { %v276_v34 = vpop.xlane.xlu2 %275  ;;  %vm278_vm15 = vcmp.ge.f32.partialorder %v4034_v0, %v270_v38 }
 0x2fb   : > { %vm280_vm14 = vcmp.ge.f32.partialorder %v4036_v8, %v276_v34  ;;  %v4103_v40 = vsel %vm278_vm15, %v4034_v0, 0.0  ;;  %vm127_vm15 = vcmask 1041409  }
 0x2fc   : > { %v4092_v35 = vsel %vm280_vm14, %v4036_v8, 0.0  ;;  %v458_v8 = vperm.slane %v4103_v40, 1  ;;  %v288_v42 = vsel %vm184_vm4, %v4103_v40, 0.0  ;;  %v497_v0 = vperm.slane %v4103_v40, 4 }
 0x2fd   : > { %v294_v36 = vsel %vm184_vm4, %v4092_v35, 0.0  ;;  %v445_v47 = vperm.slane %v4103_v40, 0  ;;  %v523_v49 = vperm.slane %v4103_v40, 6  ;;  %v653_v52 = vperm.slane %v4092_v35, 0 }
 0x2fe   : > { %372 = vperm.xlu1 %3758, %v367_v20   ;;  %v471_v58 = vperm.slane %v4103_v40, 2  ;;  %v484_v12 = vperm.slane %v4103_v40, 3  ;;  %v692_v13 = vperm.slane %v4092_v35, 3  ;;  %v510_v34 = vperm.slane %v4103_v40, 5 }
 0x306   : > { %385 = vperm.xlu1 %3758, %v380_v22  }
 0x309   : > { %359 = vperm.xlu0 %3760, %v354_v23  }
 0x30e   : > { %352 = vperm.xlu2 %3759, %v341_v18   ;;  %398 = vperm.xlu1 %3758, %v393_v56  }
 0x311   : > { %3761 = vset.pattern.permute.xlu0 %v3949_v7 }
 0x316   : > { %365 = vperm.xlu2 %3759, %v354_v23   ;;  %3763 = vset.pattern.permute.xlu1 %v3949_v7 }
 0x319   : > { %404 = vperm.xlu0 %3761, %v393_v56  }
 0x31e   : > { %378 = vperm.xlu2 %3759, %v367_v20   ;;  %417 = vperm.xlu1 %3763, %v406_v59  }
 0x321   : > { %3764 = vset.pattern.permute.xlu0 %v3944_v5 }
 0x326   : > { %391 = vperm.xlu2 %3759, %v380_v22   ;;  %430 = vperm.xlu1 %3763, %v419_v24  }
 0x329   : > { %437 = vperm.xlu0 %3764, %v432_v25  }
 0x32e   : > { %3762 = vset.pattern.permute.xlu2 %v3944_v5  ;;  %560 = vperm.xlu1 %3763, %v549_v26  }
 0x331   : > { %567 = vperm.xlu0 %3764, %v562_v27  }
 0x336   : > { %411 = vperm.xlu2 %3762, %v406_v59   ;;  %3768 = vset.pattern.permute.xlu1 %v3944_v5 }
 0x339   : > { %3769 = vset.pattern.permute.xlu0 %v3949_v7 }
 0x33e   : > { %424 = vperm.xlu2 %3762, %v419_v24   ;;  %580 = vperm.xlu1 %3768, %v575_v28  }
 0x341   : > { %599 = vperm.xlu0 %3769, %v588_v29  }
 0x346   : > { %3765 = vset.pattern.permute.xlu2 %v3949_v7  ;;  %593 = vperm.xlu1 %3768, %v588_v29  }
 0x349   : > { %3772 = vset.pattern.permute.xlu0 %v3944_v5 }
 0x34e   : > { %443 = vperm.xlu2 %3765, %v432_v25   ;;  %3771 = vset.pattern.permute.xlu1 %v3949_v7 }
 0x351   : > { %632 = vperm.xlu0 %3772, %v627_v30  }
 0x356   : > { %3766 = vset.pattern.permute.xlu2 %v3944_v5  ;;  %612 = vperm.xlu1 %3771, %v601_v31  }
 0x359   : > { %3775 = vset.pattern.permute.xlu0 %v3949_v7 }
 0x35e   : > { %554 = vperm.xlu2 %3766, %v549_v26   ;;  %625 = vperm.xlu1 %3771, %v614_v32   ;;  %v718_v26 = vperm.slane %v4092_v35, 5 }
 0x366   : > { %3767 = vset.pattern.permute.xlu2 %v3949_v7  ;;  %3774 = vset.pattern.permute.xlu1 %v3944_v5 }
 0x368   : > { %v347_v44 = vpop.permute.xlu1 %346  ;;  %v287_v51 = vpop.xlane.xlu0 %286 }
 0x369   : > { %v4096_v37 = vpop.xlane.xlu2 %292  ;;  %3803 = vrsqrt.f32 %v287_v51  ;;  %vm303_vm1 = vweird.f32 %v287_v51 }
 0x36a   : > { %3805 = vrsqrt.f32 %v4096_v37  ;;  %vm323_vm7 = vweird.f32 %v4096_v37 }
 0x36e   : > { %573 = vperm.xlu2 %3767, %v562_v27   ;;  %645 = vperm.xlu1 %3774, %v640_v33  }
 0x36f   : > { %v3804_v55 = vpop.eup %3803 }
 0x370   : > { %v4117_v46 = vpop.permute.xlu1 %372  ;;  %v298_v60 = vmul.f32 %v3804_v55, %v287_v51  ;;  %v3806_v14 = vpop.eup %3805  ;;  %vm304_vm0 = vweird.f32 %v3804_v55 }
 0x371   : > { %v4099_v39 = vpop.permute.xlu2 %352  ;;  %v318_v17 = vmul.f32 %v3806_v14, %v4096_v37  ;;  %vm305_vm5 = vmor %vm303_vm1, %vm304_vm0  ;;  %vm324_vm6 = vweird.f32 %v3806_v14  ;;  %vm128_vm0 = vcmask 1042434   ;;  %vm130_vm1 = vcmask 1043459  }
 0x372   : > { %v299_v62 = vmul.f32 %v3804_v55, %v298_v60  ;;  %vm325_vm8 = vmor %vm323_vm7, %vm324_vm6  ;;  %vm134_vm6 = vcmask 1045509   ;;  %vm136_vm7 = vcmask 1046534  }
 0x373   : > { %v319_v20 = vmul.f32 %v3806_v14, %v318_v17 }
 0x374   : > { %v300_v15 = vmul.f32 0.5, %v299_v62 }
 0x375   : > { %v320_v59 = vmul.f32 0.5, %v319_v20 }
 0x376   : > { %586 = vperm.xlu2 %3767, %v575_v28   ;;  %v301_v18 = vsub.f32 1.5, %v300_v15 }
 0x377   : > { %v321_v25 = vsub.f32 1.5, %v320_v59 }
 0x378   : > { %v4126_v50 = vpop.permute.xlu1 %385  ;;  %v302_v23 = vmul.f32 %v3804_v55, %v301_v18 }
 0x379   : > { %v4106_v41 = vpop.permute.xlu2 %365 }
 0x37a   : > { %v4161_v24 = vsel %vm305_vm5, %v3804_v55, %v302_v23  ;;  %vm132_vm5 = vcmask 1044484  }
 0x37b   : > { %295 = vadd.xlane.f32.xlu0 %v294_v36  ;;  %v4136_v57 = vpop.permute.xlu0 %359  ;;  %v821_v28 = vmul.f32 %v347_v44, %v4161_v24  ;;  %v889_v29 = vperm.slane %v4161_v24, 0  ;;  %v6236_v62 = vperm.slane %v4161_v24, 4 }
 0x37e   : > { %3770 = vset.pattern.permute.xlu2 %v3944_v5 }
 0x380   : > { %v4134_v54 = vpop.permute.xlu1 %398 }
 0x381   : > { %v4112_v43 = vpop.permute.xlu2 %378  ;;  %v829_v55 = vmul.f32 %v4134_v54, %v4161_v24 }
 0x386   : > { %606 = vperm.xlu2 %3770, %v601_v31   ;;  %v322_v31 = vmul.f32 %v3806_v14, %v321_v25 }
 0x388   : > { %v4179_v36 = vsel %vm325_vm8, %v3806_v14, %v322_v31  ;;  %v961_v14 = vmul.f32 %v6236_v62, %v829_v55  ;;  %v891_v62 = vperm.slane %v4161_v24, 2  ;;  %vm138_vm8 = vcmask 1047559  }
 0x389   : > { %v4115_v45 = vpop.permute.xlu2 %391  ;;  %v910_v20 = vperm.slane %v4179_v36, 5 }
 0x38a   : > { %v1027_v54 = vmul.f32 0.5, %v961_v14  ;;  %v679_v14 = vperm.slane %v4092_v35, 2 }
 0x38b   : > { %v4146_v11 = vpop.permute.xlu0 %404 }
 0x38e   : > { %619 = vperm.xlu2 %3770, %v614_v32  }
 0x38f   : > { %469 = vperm.xlu0 %3775, %v458_v8  }
 0x390   : > { %v4144_v63 = vpop.permute.xlu1 %417 }
 0x391   : > { %v4121_v48 = vpop.permute.xlu2 %411 }
 0x396   : > { %3773 = vset.pattern.permute.xlu2 %v3949_v7 }
 0x397   : > { %3778 = vset.pattern.permute.xlu0 %v3944_v5 }
 0x398   : > { %289 = vadd.xlane.f32.xlu1 %v288_v42  ;;  %v4155_v22 = vpop.permute.xlu1 %430 }
 0x399   : > { %v4130_v53 = vpop.permute.xlu2 %424 }
 0x39b   : > { %v4153_v19 = vpop.permute.xlu0 %437 }
 0x39e   : > { %638 = vperm.xlu2 %3773, %v627_v30  }
 0x39f   : > { %502 = vperm.xlu0 %3778, %v497_v0  }
 0x3a0   : > { %v4168_v30 = vpop.permute.xlu1 %560 }
 0x3a3   : > { %v4164_v27 = vpop.permute.xlu0 %567 }
 0x3a6   : > { %651 = vperm.xlu2 %3773, %v640_v33   ;;  %v953_v33 = vmul.f32 %v889_v29, %v821_v28  ;;  %v835_v28 = vmul.f32 %v4153_v19, %v4161_v24 }
 0x3a7   : > { %3781 = vset.pattern.permute.xlu0 %v3949_v7 }
 0x3a8   : > { %v4139_v61 = vpop.permute.xlu2 %443  ;;  %v1019_v42 = vmul.f32 0.5, %v953_v33  ;;  %v6235_v33 = vperm.slane %v4161_v24, 7 }
 0x3ae   : > { %456 = vperm.xlu2 %3773, %v445_v47  }
 0x3af   : > { %534 = vperm.xlu0 %3781, %v523_v49  }
 0x3b0   : > { %v4184_v44 = vpop.permute.xlu1 %580 }
 0x3b1   : > { %450 = vperm.xlu1 %3774, %v445_v47   ;;  %v905_v47 = vperm.slane %v4179_v36, 0 }
 0x3b3   : > { %v4181_v38 = vpop.permute.xlu0 %599 }
 0x3b6   : > { %3776 = vset.pattern.permute.xlu2 %v3944_v5 }
 0x3b7   : > { %664 = vperm.xlu0 %3781, %v653_v52  }
 0x3b8   : > { %v555_v16 = vpop.permute.xlu2 %554 }
 0x3b9   : > { %463 = vperm.xlu1 %3774, %v458_v8   ;;  %v853_v8 = vmul.f32 %v555_v16, %v4179_v36  ;;  %v536_v16 = vperm.slane %v4103_v40, 7 }
 0x3bb   : > { %v985_v51 = vmul.f32 %v905_v47, %v853_v8 }
 0x3be   : > { %476 = vperm.xlu2 %3776, %v471_v58  }
 0x3bf   : > { %3786 = vset.pattern.permute.xlu0 %v3944_v5 }
 0x3c1   : > { %3777 = vset.pattern.permute.xlu1 %v3949_v7 }
 0x3c3   : > { %v4194_v60 = vpop.permute.xlu0 %632 }
 0x3c6   : > { %489 = vperm.xlu2 %3776, %v484_v12  }
 0x3c7   : > { %697 = vperm.xlu0 %3786, %v692_v13  }
 0x3c8   : > { %v4158_v56 = vpop.permute.xlu2 %573 }
 0x3c9   : > { %482 = vperm.xlu1 %3777, %v471_v58   ;;  %v1051_v58 = vmul.f32 0.5, %v985_v51 }
 0x3ce   : > { %3779 = vset.pattern.permute.xlu2 %v3949_v7 }
 0x3cf   : > { %3789 = vset.pattern.permute.xlu0 %v3949_v7 }
 0x3d0   : > { %v4172_v32 = vpop.permute.xlu2 %586 }
 0x3d1   : > { %495 = vperm.xlu1 %3777, %v484_v12   ;;  %v4198_v12 = vpop.permute.xlu1 %593 }
 0x3d6   : > { %508 = vperm.xlu2 %3779, %v497_v0   ;;  %v3915_v0 = vmov 0  }
 0x3d7   : > { %729 = vperm.xlu0 %3789, %v718_v26  }
 0x3d9   : > { %3780 = vset.pattern.permute.xlu1 %v3944_v5  ;;  %v613_v23 = vpop.permute.xlu1 %612 }
 0x3de   : > { %521 = vperm.xlu2 %3779, %v510_v34  }
 0x3df   : > { %3792 = vset.pattern.permute.xlu0 %v3915_v0 }
 0x3e0   : > { %1148 = vperm.xlu0 %3792, %v1019_v42   ;;  %v4188_v37 = vpop.permute.xlu2 %606  ;;  %v967_v42 = vmul.f32 %v6235_v33, %v835_v28 }
 0x3e1   : > { %515 = vperm.xlu1 %3780, %v510_v34   ;;  %v626_v55 = vpop.permute.xlu1 %625 }
 0x3e6   : > { %3782 = vset.pattern.permute.xlu2 %v3944_v5 }
 0x3e8   : > { %1244 = vperm.xlu0 %3792, %v1051_v58   ;;  %v620_v15 = vpop.permute.xlu2 %619 }
 0x3e9   : > { %528 = vperm.xlu1 %3780, %v523_v49   ;;  %v863_v17 = vmul.f32 %v620_v15, %v4179_v36  ;;  %v666_v49 = vperm.slane %v4092_v35, 1  ;;  %v1033_v15 = vmul.f32 0.5, %v967_v42 }
 0x3eb   : > { %v995_v59 = vmul.f32 %v910_v20, %v863_v17 }
 0x3ed   : > { %v1061_v40 = vmul.f32 0.5, %v995_v59  ;;  %v912_v59 = vperm.slane %v4179_v36, 7 }
 0x3ee   : > { %541 = vperm.xlu2 %3782, %v536_v16   ;;  %v296_v18 = vpop.xlane.xlu0 %295 }
 0x3ef   : > { %3807 = vrsqrt.f32 %v296_v18  ;;  %vm333_vm10 = vweird.f32 %v296_v18 }
 0x3f0   : > { %1172 = vperm.xlu0 %3792, %v1027_v54  }
 0x3f1   : > { %3783 = vset.pattern.permute.xlu1 %v3949_v7 }
 0x3f5   : > { %v3808_v25 = vpop.eup %3807 }
 0x3f6   : > { %v328_v31 = vmul.f32 %v3808_v25, %v296_v18  ;;  %671 = vperm.xlu2 %3782, %v666_v49   ;;  %vm334_vm9 = vweird.f32 %v3808_v25 }
 0x3f7   : > { %vm335_vm11 = vmor %vm333_vm10, %vm334_vm9 }
 0x3f8   : > { %v329_v34 = vmul.f32 %v3808_v25, %v328_v31  ;;  %v639_v8 = vpop.permute.xlu2 %638  ;;  %1274 = vperm.xlu0 %3792, %v1061_v40   ;;  %v4222_v31 = vpop.permute.xlu1 %645 }
 0x3f9   : > { %547 = vperm.xlu1 %3783, %v536_v16   ;;  %v6237_v16 = vperm.slane %v4179_v36, 6 }
 0x3fa   : > { %v330_v51 = vmul.f32 0.5, %v329_v34  ;;  %v909_v34 = vperm.slane %v4179_v36, 4 }
 0x3fc   : > { %v331_v58 = vsub.f32 1.5, %v330_v51 }
 0x3fe   : > { %v332_v19 = vmul.f32 %v3808_v25, %v331_v58  ;;  %684 = vperm.xlu2 %3782, %v679_v14  }
 0x400   : > { %v4215_v54 = vsel %vm335_vm11, %v3808_v25, %v332_v19  ;;  %v652_v17 = vpop.permute.xlu2 %651  ;;  %1190 = vperm.xlu0 %3792, %v1033_v15  }
 0x401   : > { %v866_v28 = vmul.f32 %v639_v8, %v4215_v54  ;;  %v868_v40 = vmul.f32 %v652_v17, %v4215_v54  ;;  %3784 = vset.pattern.permute.xlu1 %v3944_v5  ;;  %v862_v8 = vmul.f32 %v613_v23, %v4215_v54  ;;  %v864_v42 = vmul.f32 %v626_v55, %v4215_v54 }
 0x402   : > { %v705_v55 = vperm.slane %v4092_v35, 4 }
 0x403   : > { %v4226_v18 = vmul.f32 %v6237_v16, %v866_v28  ;;  %v4230_v25 = vmul.f32 %v912_v59, %v868_v40  ;;  %v4238_v51 = vmul.f32 %v909_v34, %v862_v8  ;;  %v4240_v58 = vmul.f32 %v910_v20, %v864_v42 }
 0x404   : > { %v744_v16 = vperm.slane %v4092_v35, 7 }
 0x406   : > { %3787 = vset.pattern.permute.xlu2 %v3949_v7 }
 0x408   : > { %v457_v23 = vpop.permute.xlu2 %456 }
 0x409   : > { %658 = vperm.xlu1 %3784, %v653_v52  }
 0x40b   : > { %v290_v15 = vpop.xlane.xlu1 %289 }
 0x40c   : > { %3809 = vrsqrt.f32 %v290_v15  ;;  %vm313_vm13 = vweird.f32 %v290_v15 }
 0x40e   : > { %703 = vperm.xlu2 %3787, %v692_v13  }
 0x411   : > { %3785 = vset.pattern.permute.xlu1 %v3949_v7 }
 0x412   : > { %v3810_v19 = vpop.eup %3809 }
 0x413   : > { %v308_v17 = vmul.f32 %v3810_v19, %v290_v15  ;;  %vm314_vm12 = vweird.f32 %v3810_v19 }
 0x414   : > { %vm315_vm14 = vmor %vm313_vm13, %vm314_vm12 }
 0x415   : > { %v309_v28 = vmul.f32 %v3810_v19, %v308_v17 }
 0x416   : > { %716 = vperm.xlu2 %3787, %v705_v55  }
 0x417   : > { %v310_v40 = vmul.f32 0.5, %v309_v28 }
 0x418   : > { %v477_v52 = vpop.permute.xlu2 %476 }
 0x419   : > { %v311_v20 = vsub.f32 1.5, %v310_v40  ;;  %677 = vperm.xlu1 %3785, %v666_v49   ;;  %v841_v13 = vmul.f32 %v477_v52, %v4161_v24  ;;  %v731_v52 = vperm.slane %v4092_v35, 6 }
 0x41b   : > { %v312_v8 = vmul.f32 %v3810_v19, %v311_v20 }
 0x41d   : > { %v4248_v42 = vsel %vm315_vm14, %v3810_v19, %v312_v8 }
 0x41e   : > { %v899_v33 = vperm.slane %v4248_v42, 2  ;;  %3790 = vset.pattern.permute.xlu2 %v3944_v5  ;;  %v826_v17 = vmul.f32 %v4112_v43, %v4248_v42  ;;  %v897_v19 = vperm.slane %v4248_v42, 0  ;;  %v838_v20 = vmul.f32 %v457_v23, %v4248_v42 }
 0x41f   : > { %v827_v23 = vmul.f32 %v4126_v50, %v4161_v24  ;;  %v857_v50 = vmul.f32 %v4184_v44, %v4179_v36 }
 0x420   : > { %v4258_v49 = vmul.f32 %v899_v33, %v841_v13  ;;  %v958_v15 = vmul.f32 %v891_v62, %v826_v17  ;;  %v970_v13 = vmul.f32 %v897_v19, %v838_v20  ;;  %v856_v17 = vmul.f32 %v4158_v56, %v4215_v54 }
 0x421   : > { %690 = vperm.xlu1 %3785, %v679_v14  }
 0x422   : > { %v1024_v40 = vmul.f32 0.5, %v958_v15  ;;  %v1036_v14 = vmul.f32 0.5, %v970_v13  ;;  %v892_v15 = vperm.slane %v4161_v24, 3 }
 0x423   : > { %v451_v28 = vpop.permute.xlu1 %450 }
 0x424   : > { %v837_v8 = vmul.f32 %v451_v28, %v4161_v24  ;;  %1163 = vperm.xlu0 %3792, %v1024_v40   ;;  %v906_v28 = vperm.slane %v4179_v36, 1  ;;  %v4276_v40 = vpop.permute.xlu2 %489  ;;  %v959_v20 = vmul.f32 %v892_v15, %v827_v23  ;;  %v861_v23 = vmul.f32 %v4188_v37, %v4179_v36 }
 0x426   : > { %v4266_v43 = vmul.f32 %v897_v19, %v837_v8  ;;  %736 = vperm.xlu2 %3790, %v731_v52   ;;  %v988_v19 = vmul.f32 %v906_v28, %v856_v17  ;;  %v1025_v8 = vmul.f32 0.5, %v959_v20  ;;  %v833_v20 = vmul.f32 %v4130_v53, %v4161_v24 }
 0x427   : > { %v823_v53 = vmul.f32 %v4136_v57, %v4161_v24  ;;  %v822_v57 = vmul.f32 %v4099_v39, %v4248_v42 }
 0x428   : > { %v1054_v56 = vmul.f32 0.5, %v988_v19  ;;  %v993_v19 = vmul.f32 %v909_v34, %v861_v23  ;;  %v867_v34 = vmul.f32 %v4222_v31, %v4179_v36 }
 0x429   : > { %3788 = vset.pattern.permute.xlu1 %v3944_v5 }
 0x42b   : > { %v464_v35 = vpop.permute.xlu1 %463 }
 0x42c   : > { %1199 = vperm.xlu0 %3792, %v1036_v14   ;;  %v907_v14 = vperm.slane %v4179_v36, 2 }
 0x42e   : > { %749 = vperm.xlu2 %3790, %v744_v16   ;;  %v989_v17 = vmul.f32 %v907_v14, %v857_v50 }
 0x430   : > { %v4284_v13 = vpop.permute.xlu2 %508 }
 0x431   : > { %710 = vperm.xlu1 %3788, %v705_v55   ;;  %v1055_v55 = vmul.f32 0.5, %v989_v17 }
 0x434   : > { %1253 = vperm.xlu0 %3792, %v1054_v56   ;;  %v1059_v56 = vmul.f32 0.5, %v993_v19  ;;  %v999_v19 = vmul.f32 %v912_v59, %v867_v34  ;;  %v825_v59 = vmul.f32 %v4117_v46, %v4161_v24 }
 0x436   : > { %3794 = vset.pattern.permute.xlu2 %v3915_v0  ;;  %v957_v39 = vmul.f32 %v891_v62, %v825_v59 }
 0x437   : > { %1166 = vperm.xlu2 %3794, %v1025_v8   ;;  %v6238_v8 = vperm.slane %v4161_v24, 6 }
 0x438   : > { %v4294_v44 = vpop.permute.xlu2 %521 }
 0x439   : > { %723 = vperm.xlu1 %3788, %v718_v26   ;;  %v965_v37 = vmul.f32 %v6238_v8, %v833_v20  ;;  %v914_v20 = vperm.slane %v4215_v54, 1 }
 0x43b   : > { %v1031_v50 = vmul.f32 0.5, %v965_v37  ;;  %v483_v17 = vpop.permute.xlu1 %482  ;;  %v1065_v37 = vmul.f32 0.5, %v999_v19 }
 0x43f   : > { %1256 = vperm.xlu2 %3794, %v1055_v55   ;;  %v890_v55 = vperm.slane %v4161_v24, 1 }
 0x441   : > { %3791 = vset.pattern.permute.xlu1 %v3949_v7  ;;  %v955_v31 = vmul.f32 %v890_v55, %v823_v53 }
 0x443   : > { %v1021_v34 = vmul.f32 0.5, %v955_v31 }
 0x447   : > { %1268 = vperm.xlu2 %3794, %v1059_v56  }
 0x448   : > { %v4302_v26 = vpop.permute.xlu2 %541 }
 0x449   : > { %742 = vperm.xlu1 %3791, %v731_v52  }
 0x44f   : > { %1184 = vperm.xlu2 %3794, %v1031_v50   ;;  %v842_v50 = vmul.f32 %v483_v17, %v4248_v42  ;;  %v954_v17 = vmul.f32 %v889_v29, %v822_v57  ;;  %v855_v29 = vmul.f32 %v4164_v27, %v4179_v36  ;;  %v839_v57 = vmul.f32 %v464_v35, %v4161_v24 }
 0x450   : > { %v672_v23 = vpop.permute.xlu2 %671  ;;  %v900_v27 = vperm.slane %v4248_v42, 3  ;;  %v908_v35 = vperm.slane %v4179_v36, 3 }
 0x451   : > { %v871_v56 = vmul.f32 %v672_v23, %v4179_v36  ;;  %755 = vperm.xlu1 %3791, %v744_v16   ;;  %v974_v16 = vmul.f32 %v899_v33, %v842_v50  ;;  %v4324_v23 = vpop.permute.xlu1 %495  ;;  %v1020_v46 = vmul.f32 0.5, %v954_v17  ;;  %v4334_v33 = vpop.permute.xlu0 %469  ;;  %v843_v50 = vmul.f32 %v4276_v40, %v4161_v24 }
 0x452   : > { %v898_v17 = vperm.slane %v4248_v42, 1 }
 0x453   : > { %v1003_v52 = vmul.f32 %v914_v20, %v871_v56  ;;  %v824_v56 = vmul.f32 %v4106_v41, %v4248_v42  ;;  %v987_v41 = vmul.f32 %v906_v28, %v855_v29  ;;  %v975_v28 = vmul.f32 %v900_v27, %v843_v50 }
 0x454   : > { %v971_v40 = vmul.f32 %v898_v17, %v839_v57  ;;  %v894_v57 = vperm.slane %v4161_v24, 5 }
 0x455   : > { %v1069_v8 = vmul.f32 0.5, %v1003_v52  ;;  %v915_v52 = vperm.slane %v4215_v54, 2 }
 0x457   : > { %1286 = vperm.xlu2 %3794, %v1065_v37   ;;  %1298 = vperm.xlu0 %3792, %v1069_v8   ;;  %v1040_v8 = vmul.f32 0.5, %v974_v16  ;;  %v956_v37 = vmul.f32 %v890_v55, %v824_v56  ;;  %v1053_v55 = vmul.f32 0.5, %v987_v41  ;;  %v860_v56 = vmul.f32 %v4181_v38, %v4215_v54 }
 0x458   : > { %v685_v53 = vpop.permute.xlu2 %684 }
 0x459   : > { %3793 = vset.pattern.permute.xlu1 %v3915_v0  ;;  %v873_v19 = vmul.f32 %v685_v53, %v4179_v36  ;;  %v1023_v0 = vmul.f32 0.5, %v957_v39  ;;  %v4339_v31 = vpop.permute.xlu1 %515  ;;  %v4348_v16 = vpop.permute.xlu0 %502  ;;  %v859_v53 = vmul.f32 %v4198_v12, %v4179_v36  ;;  %v992_v41 = vmul.f32 %v908_v35, %v860_v56 }
 0x45a   : > { %1154 = vperm.xlu1 %3793, %v1021_v34   ;;  %v1022_v34 = vmul.f32 0.5, %v956_v37 }
 0x45b   : > { %v1005_v62 = vmul.f32 %v915_v52, %v873_v19  ;;  %v1041_v19 = vmul.f32 0.5, %v975_v28 }
 0x45d   : > { %v1071_v59 = vmul.f32 0.5, %v1005_v62  ;;  %v831_v62 = vmul.f32 %v4121_v48, %v4161_v24  ;;  %v901_v48 = vperm.slane %v4248_v42, 4 }
 0x45f   : > { %1151 = vperm.xlu2 %3794, %v1020_v46   ;;  %1211 = vperm.xlu0 %3792, %v1040_v8   ;;  %v991_v8 = vmul.f32 %v908_v35, %v859_v53  ;;  %v1037_v46 = vmul.f32 0.5, %v971_v40 }
 0x461   : > { %v4357_v39 = vpop.permute.xlu1 %528  ;;  %v4363_v29 = vpop.permute.xlu0 %534  ;;  %v1057_v37 = vmul.f32 0.5, %v991_v8 }
 0x462   : > { %1160 = vperm.xlu1 %3793, %v1023_v0   ;;  %v854_v0 = vmul.f32 %v4168_v30, %v4215_v54  ;;  %v963_v30 = vmul.f32 %v894_v57, %v831_v62 }
 0x464   : > { %v986_v50 = vmul.f32 %v905_v47, %v854_v0  ;;  %v1029_v53 = vmul.f32 0.5, %v963_v30  ;;  %v865_v47 = vmul.f32 %v4194_v60, %v4179_v36  ;;  %v1035_v30 = vmul.f32 0.5, %v4266_v43 }
 0x467   : > { %1157 = vperm.xlu2 %3794, %v1022_v34   ;;  %1304 = vperm.xlu0 %3792, %v1071_v59   ;;  %v846_v59 = vmul.f32 %v4284_v13, %v4248_v42  ;;  %v1058_v34 = vmul.f32 0.5, %v992_v41  ;;  %v6306_v13 = vperm.slane %v4179_v36, 6 }
 0x468   : > { %v4365_v12 = vpop.permute.xlu2 %703 }
 0x469   : > { %v665_v28 = vpop.permute.xlu0 %664  ;;  %v978_v35 = vmul.f32 %v901_v48, %v846_v59 }
 0x46a   : > { %1250 = vperm.xlu1 %3793, %v1053_v55   ;;  %v1052_v55 = vmul.f32 0.5, %v986_v50 }
 0x46b   : > { %v4372_v38 = vpop.permute.xlu1 %547  ;;  %v1044_v0 = vmul.f32 0.5, %v978_v35 }
 0x46f   : > { %1202 = vperm.xlu2 %3794, %v1037_v46   ;;  %1214 = vperm.xlu0 %3792, %v1041_v19   ;;  %v997_v19 = vmul.f32 %v6306_v13, %v865_v47  ;;  %v913_v46 = vperm.slane %v4215_v54, 0  ;;  %v870_v13 = vmul.f32 %v665_v28, %v4215_v54 }
 0x470   : > { %v4381_v40 = vpop.permute.xlu2 %716 }
 0x471   : > { %v698_v60 = vpop.permute.xlu0 %697 }
 0x472   : > { %1262 = vperm.xlu1 %3793, %v1057_v37   ;;  %v1063_v37 = vmul.f32 0.5, %v997_v19 }
 0x477   : > { %1265 = vperm.xlu0 %3792, %v1058_v34   ;;  %1247 = vperm.xlu2 %3794, %v1052_v55   ;;  %v840_v55 = vmul.f32 %v4334_v33, %v4248_v42  ;;  %v1002_v33 = vmul.f32 %v913_v46, %v870_v13 }
 0x479   : > { %v730_v59 = vpop.permute.xlu0 %729  ;;  %v972_v35 = vmul.f32 %v898_v17, %v840_v55 }
 0x47a   : > { %1178 = vperm.xlu1 %3793, %v1029_v53  }
 0x47b   : > { %v659_v8 = vpop.permute.xlu1 %658 }
 0x47c   : > { %v869_v56 = vmul.f32 %v659_v8, %v4179_v36 }
 0x47e   : > { %v1001_v62 = vmul.f32 %v913_v46, %v869_v56  ;;  %v1038_v56 = vmul.f32 0.5, %v972_v35  ;;  %v1039_v46 = vmul.f32 0.5, %v4258_v49  ;;  %v875_v35 = vmul.f32 %v698_v60, %v4179_v36 }
 0x47f   : > { %1223 = vperm.xlu0 %3792, %v1044_v0  }
 0x480   : > { %v1067_v41 = vmul.f32 0.5, %v1001_v62  ;;  %v4389_v50 = vpop.permute.xlu2 %736 }
 0x481   : > { %v4402_v43 = vpop.permute.xlu0 %1148 }
 0x482   : > { %1280 = vperm.xlu1 %3793, %v1063_v37   ;;  %1292 = vperm.xlu2 %3794, %v1067_v41   ;;  %v1068_v41 = vmul.f32 0.5, %v1002_v33 }
 0x488   : > { %v4392_v34 = vpop.permute.xlu2 %749 }
 0x48a   : > { %1196 = vperm.xlu1 %3793, %v1035_v30  }
 0x48b   : > { %v678_v53 = vpop.permute.xlu1 %677 }
 0x48c   : > { %v872_v47 = vmul.f32 %v678_v53, %v4215_v54  ;;  %v4413_v53 = vpop.permute.xlu0 %1244 }
 0x48e   : > { %v1004_v8 = vmul.f32 %v914_v20, %v872_v47  ;;  %v844_v20 = vmul.f32 %v4324_v23, %v4248_v42  ;;  %v916_v23 = vperm.slane %v4215_v54, 3 }
 0x490   : > { %v1070_v19 = vmul.f32 0.5, %v1004_v8  ;;  %v976_v55 = vmul.f32 %v900_v27, %v844_v20 }
 0x491   : > { %v4400_v0 = vpop.permute.xlu2 %1166 }
 0x492   : > { %1301 = vperm.xlu2 %3794, %v1070_v19   ;;  %1205 = vperm.xlu1 %3793, %v1038_v56   ;;  %v1042_v47 = vmul.f32 0.5, %v976_v55  ;;  %v917_v19 = vperm.slane %v4215_v54, 4  ;;  %v1007_v56 = vmul.f32 %v916_v23, %v875_v35 }
 0x493   : > { %v691_v62 = vpop.permute.xlu1 %690 }
 0x494   : > { %v874_v37 = vmul.f32 %v691_v62, %v4215_v54  ;;  %v4426_v62 = vpop.permute.xlu0 %1172 }
 0x496   : > { %v1006_v17 = vmul.f32 %v915_v52, %v874_v37  ;;  %v858_v52 = vmul.f32 %v4172_v32, %v4215_v54  ;;  %v832_v37 = vmul.f32 %v4144_v63, %v4248_v42  ;;  %v6307_v63 = vperm.slane %v4161_v24, 4 }
 0x498   : > { %v1072_v28 = vmul.f32 0.5, %v1006_v17  ;;  %v990_v49 = vmul.f32 %v907_v14, %v858_v52  ;;  %v828_v17 = vmul.f32 %v4115_v45, %v4248_v42  ;;  %v964_v14 = vmul.f32 %v894_v57, %v832_v37 }
 0x499   : > { %v4409_v30 = vpop.permute.xlu2 %1256  ;;  %v880_v45 = vmul.f32 %v730_v59, %v4215_v54 }
 0x49a   : > { %1307 = vperm.xlu2 %3794, %v1072_v28   ;;  %1295 = vperm.xlu1 %3793, %v1068_v41   ;;  %v1056_v60 = vmul.f32 0.5, %v990_v49  ;;  %v1073_v41 = vmul.f32 0.5, %v1007_v56  ;;  %v830_v28 = vmul.f32 %v4146_v11, %v4248_v42  ;;  %v960_v55 = vmul.f32 %v892_v15, %v828_v17 }
 0x49b   : > { %v1030_v11 = vmul.f32 0.5, %v964_v14  ;;  %v918_v15 = vperm.slane %v4215_v54, 5  ;;  %v1339_v14 = vperm.slane %v4402_v43, %v3946_v6 }
 0x49c   : > { %v4445_v52 = vpop.permute.xlu0 %1274  ;;  %v1026_v35 = vmul.f32 0.5, %v960_v55 }
 0x49d   : > { %v1012_v59 = vmul.f32 %v918_v15, %v880_v45 }
 0x4a1   : > { %v4419_v8 = vpop.permute.xlu2 %1268 }
 0x4a2   : > { %1217 = vperm.xlu2 %3794, %v1042_v47   ;;  %1208 = vperm.xlu1 %3793, %v1039_v46   ;;  %v962_v46 = vmul.f32 %v6307_v63, %v830_v28  ;;  %v876_v47 = vmul.f32 %v4365_v12, %v4215_v54  ;;  %v903_v28 = vperm.slane %v4248_v42, 6 }
 0x4a3   : > { %v711_v13 = vpop.permute.xlu1 %710 }
 0x4a4   : > { %v877_v27 = vmul.f32 %v711_v13, %v4179_v36  ;;  %v878_v13 = vmul.f32 %v4381_v40, %v4215_v54  ;;  %v1028_v57 = vmul.f32 0.5, %v962_v46  ;;  %v1008_v12 = vmul.f32 %v916_v23, %v876_v47  ;;  %v4463_v23 = vpop.permute.xlu0 %1190 }
 0x4a5   : > { %v847_v40 = vmul.f32 %v4339_v31, %v4161_v24 }
 0x4a6   : > { %v1009_v32 = vmul.f32 %v917_v19, %v877_v27  ;;  %v1010_v56 = vmul.f32 %v917_v19, %v878_v13 }
 0x4a8   : > { %v1075_v33 = vmul.f32 0.5, %v1009_v32  ;;  %v1078_v32 = vmul.f32 0.5, %v1012_v59  ;;  %v1076_v37 = vmul.f32 0.5, %v1010_v56  ;;  %v1064_v59 = vmul.f32 0.5, %v4226_v18 }
 0x4a9   : > { %v4432_v20 = vpop.permute.xlu2 %1184  ;;  %v850_v56 = vmul.f32 %v4363_v29, %v4248_v42 }
 0x4aa   : > { %1316 = vperm.xlu0 %3792, %v1075_v33   ;;  %1259 = vperm.xlu1 %3793, %v1056_v60   ;;  %v849_v33 = vmul.f32 %v4357_v39, %v4161_v24  ;;  %v1074_v60 = vmul.f32 0.5, %v1008_v12  ;;  %v902_v39 = vperm.slane %v4248_v42, 5  ;;  %v1060_v12 = vmul.f32 0.5, %v4238_v51 }
 0x4ab   : > { %1310 = vperm.xlu2 %3794, %v1073_v41   ;;  %v724_v49 = vpop.permute.xlu1 %723  ;;  %v845_v41 = vmul.f32 %v4348_v16, %v4161_v24  ;;  %v982_v51 = vmul.f32 %v903_v28, %v850_v56 }
 0x4ac   : > { %v981_v16 = vmul.f32 %v903_v28, %v849_v33  ;;  %v979_v46 = vmul.f32 %v902_v39, %v847_v40  ;;  %v1062_v33 = vmul.f32 0.5, %v4240_v58  ;;  %v881_v28 = vmul.f32 %v4389_v50, %v4179_v36 }
 0x4ad   : > { %v977_v55 = vmul.f32 %v901_v48, %v845_v41  ;;  %v852_v48 = vmul.f32 %v4372_v38, %v4248_v42 }
 0x4ae   : > { %v1047_v43 = vmul.f32 0.5, %v981_v16  ;;  %v1045_v47 = vmul.f32 0.5, %v979_v46  ;;  %v1387_v46 = vperm.slane %v4413_v53, %v3946_v6 }
 0x4af   : > { %v1043_v45 = vmul.f32 0.5, %v977_v55  ;;  %v1048_v55 = vmul.f32 0.5, %v982_v51 }
 0x4b1   : > { %v4449_v27 = vpop.permute.xlu2 %1286 }
 0x4b2   : > { %1181 = vperm.xlu0 %3792, %v1030_v11   ;;  %1169 = vperm.xlu1 %3793, %v1026_v35   ;;  %v1164_v35 = vpop.permute.xlu0 %1163 }
 0x4b3   : > { %1175 = vperm.xlu2 %3794, %v1028_v57   ;;  %v848_v57 = vmul.f32 %v4294_v44, %v4248_v42 }
 0x4b5   : > { %v980_v40 = vmul.f32 %v902_v39, %v848_v57 }
 0x4b9   : > { %v1152_v17 = vpop.permute.xlu2 %1151 }
 0x4ba   : > { %v1340_v19 = vperm.slane %v1152_v17, %v4016_v21  ;;  %1313 = vperm.xlu1 %3793, %v1074_v60   ;;  %1325 = vperm.xlu0 %3792, %v1078_v32   ;;  %v904_v60 = vperm.slane %v4248_v42, 7  ;;  %v4488_v44 = vpop.permute.xlu0 %1199  ;;  %v1046_v17 = vmul.f32 0.5, %v980_v40  ;;  %v836_v40 = vmul.f32 %v4139_v61, %v4248_v42 }
 0x4bb   : > { %1319 = vperm.xlu2 %3794, %v1076_v37   ;;  %v4467_v31 = vpop.permute.xlu1 %742 }
 0x4bc   : > { %v1341_v63 = vsel %vm122_vm3, %v1340_v19, %v1339_v14  ;;  %v984_v18 = vmul.f32 %v904_v60, %v852_v48  ;;  %v883_v14 = vmul.f32 %v4392_v34, %v4179_v36  ;;  %v879_v19 = vmul.f32 %v724_v49, %v4179_v36 }
 0x4bd   : > { %v919_v34 = vperm.slane %v4215_v54, 6  ;;  %v882_v61 = vmul.f32 %v4467_v31, %v4215_v54 }
 0x4be   : > { %v1050_v41 = vmul.f32 0.5, %v984_v18  ;;  %v6308_v18 = vperm.slane %v4161_v24, 6 }
 0x4bf   : > { %v1013_v50 = vmul.f32 %v919_v34, %v881_v28 }
 0x4c1   : > { %v1158_v11 = vpop.permute.xlu2 %1157 }
 0x4c2   : > { %1220 = vperm.xlu1 %3793, %v1043_v45   ;;  %1232 = vperm.xlu0 %3792, %v1047_v43   ;;  %v1343_v37 = vperm.slane %v1158_v11, %v4016_v21  ;;  %v920_v45 = vperm.slane %v4215_v54, 7  ;;  %v1346_v11 = vperm.slane %v1164_v35, %v4016_v21  ;;  %v1254_v57 = vpop.permute.xlu0 %1253 }
 0x4c3   : > { %1226 = vperm.xlu2 %3794, %v1045_v47   ;;  %v4472_v13 = vpop.permute.xlu1 %755  ;;  %v1391_v51 = vperm.slane %v1254_v57, %v4016_v21  ;;  %v1066_v57 = vmul.f32 0.5, %v4230_v25 }
 0x4c4   : > { %v1015_v49 = vmul.f32 %v920_v45, %v883_v14 }
 0x4c6   : > { %v1081_v48 = vmul.f32 0.5, %v1015_v49 }
 0x4c9   : > { %v4482_v32 = vpop.permute.xlu2 %1202 }
 0x4ca   : > { %1271 = vperm.xlu1 %3793, %v1060_v12   ;;  %1283 = vperm.xlu0 %3792, %v1064_v59  }
 0x4cb   : > { %1277 = vperm.xlu2 %3794, %v1062_v33   ;;  %v1079_v33 = vmul.f32 0.5, %v1013_v50 }
 0x4cc   : > { %v1155_v38 = vpop.permute.xlu1 %1154 }
 0x4cd   : > { %v1342_v29 = vperm.slane %v1155_v38, %v3946_v6 }
 0x4cf   : > { %v1344_v58 = vsel %vm122_vm3, %v1343_v37, %v1342_v29  ;;  %v6309_v29 = vperm.slane %v4161_v24, 7 }
 0x4d0   : > { %v1435_v39 = vsel %vm127_vm15, %v1344_v58, %v1341_v63  ;;  %v1011_v63 = vmul.f32 %v918_v15, %v879_v19  ;;  %v834_v15 = vmul.f32 %v4155_v22, %v4248_v42  ;;  %v1299_v58 = vpop.permute.xlu0 %1298  ;;  %v884_v19 = vmul.f32 %v4472_v13, %v4215_v54 }
 0x4d1   : > { %v1248_v16 = vpop.permute.xlu2 %1247  ;;  %v1414_v13 = vperm.slane %v1299_v58, %v3946_v6 }
 0x4d2   : > { %v1388_v43 = vperm.slane %v1248_v16, %v4016_v21  ;;  %1229 = vperm.xlu1 %3793, %v1046_v17   ;;  %1241 = vperm.xlu0 %3792, %v1050_v41   ;;  %v1077_v12 = vmul.f32 0.5, %v1011_v63  ;;  %v966_v38 = vmul.f32 %v6308_v18, %v834_v15  ;;  %v968_v17 = vmul.f32 %v6309_v29, %v836_v40 }
 0x4d3   : > { %1235 = vperm.xlu2 %3794, %v1048_v55   ;;  %v1014_v55 = vmul.f32 %v919_v34, %v882_v61  ;;  %v1366_v18 = vperm.slane %v4482_v32, %v3946_v6 }
 0x4d4   : > { %v1389_v47 = vsel %vm122_vm3, %v1388_v43, %v1387_v46  ;;  %v1161_v36 = vpop.permute.xlu1 %1160  ;;  %v1032_v14 = vmul.f32 0.5, %v966_v38  ;;  %v1016_v46 = vmul.f32 %v920_v45, %v884_v19  ;;  %v851_v43 = vmul.f32 %v4302_v26, %v4161_v24 }
 0x4d5   : > { %v1345_v53 = vperm.slane %v1161_v36, %v3946_v6  ;;  %v1080_v49 = vmul.f32 0.5, %v1014_v55 }
 0x4d6   : > { %v1082_v31 = vmul.f32 0.5, %v1016_v46 }
 0x4d7   : > { %v1347_v59 = vsel %vm122_vm3, %v1346_v11, %v1345_v53 }
 0x4d8   : > { %v4511_v56 = vsel %vm128_vm0, %v1347_v59, %v1435_v39  ;;  %v1034_v39 = vmul.f32 0.5, %v968_v17  ;;  %v1212_v63 = vpop.permute.xlu0 %1211 }
 0x4da   : > { %1322 = vperm.xlu1 %3793, %v1077_v12   ;;  %1334 = vperm.xlu0 %3792, %v1081_v48   ;;  %v1364_v48 = vperm.slane %v4488_v44, %v4016_v21 }
 0x4db   : > { %1328 = vperm.xlu2 %3794, %v1079_v33  }
 0x4dc   : > { %v1251_v35 = vpop.permute.xlu1 %1250  ;;  %v1293_v28 = vpop.permute.xlu2 %1292 }
 0x4dd   : > { %v1390_v37 = vperm.slane %v1251_v35, %v3946_v6  ;;  %v1411_v17 = vperm.slane %v1293_v28, %v3946_v6 }
 0x4df   : > { %v1392_v22 = vsel %vm122_vm3, %v1391_v51, %v1390_v37 }
 0x4e0   : > { %v4527_v41 = vsel %vm127_vm15, %v1392_v22, %v1389_v47  ;;  %v983_v47 = vmul.f32 %v904_v60, %v851_v43  ;;  %v1305_v11 = vpop.permute.xlu0 %1304 }
 0x4e1   : > { %v1417_v53 = vperm.slane %v1305_v11, %v3946_v6 }
 0x4e2   : > { %1187 = vperm.xlu1 %3793, %v1032_v14   ;;  %v1049_v50 = vmul.f32 0.5, %v983_v47  ;;  %3813 = vset.pattern.permute.xlu0 (%p28_p0), %v3944_v5 }
 0x4e3   : > { %1193 = vperm.xlu2 %3794, %v1034_v39   ;;  %v1370_v39 = vperm.slane %v1212_v63, %v4016_v21 }
 0x4e4   : > { %v1263_v16 = vpop.permute.xlu1 %1262 }
 0x4e5   : > { %v1396_v63 = vperm.slane %v1263_v16, %v3946_v6 }
 0x4e8   : > { %v4550_v33 = vpop.permute.xlu0 %1214 }
 0x4ea   : > { %1331 = vperm.xlu1 %3793, %v1080_v49  }
 0x4eb   : > { %1337 = vperm.xlu2 %3794, %v1082_v31  }
 0x4ec   : > { %v4535_v36 = vpop.permute.xlu1 %1178  ;;  %v1302_v54 = vpop.permute.xlu2 %1301 }
 0x4ed   : > { %v1415_v34 = vperm.slane %v1302_v54, %v4016_v21  ;;  %v1393_v54 = vperm.slane %v4409_v30, %v3946_v6 }
 0x4ef   : > { %v1416_v45 = vsel %vm122_vm3, %v1415_v34, %v1414_v13 }
 0x4f0   : > { %v1266_v37 = vpop.permute.xlu0 %1265 }
 0x4f1   : > { %v1397_v49 = vperm.slane %v1266_v37, %v4016_v21 }
 0x4f2   : > { %1238 = vperm.xlu1 %3793, %v1049_v50  }
 0x4f3   : > { %v1398_v50 = vsel %vm122_vm3, %v1397_v49, %v1396_v63  ;;  %3811 = vset.pattern.permute.xlu2 (%p28_p0), %v3944_v5 }
 0x4f4   : > { %v4540_v24 = vpop.permute.xlu1 %1280  ;;  %v1308_v26 = vpop.permute.xlu2 %1307 }
 0x4f5   : > { %v1418_v42 = vperm.slane %v1308_v26, %v4016_v21 }
 0x4f7   : > { %v1419_v60 = vsel %vm122_vm3, %v1418_v42, %v1417_v53 }
 0x4f8   : > { %v4568_v14 = vpop.permute.xlu0 %1223 }
 0x4fa   : > { %1289 = vperm.xlu1 %3793, %v1066_v57  }
 0x4fc   : > { %v1197_v59 = vpop.permute.xlu1 %1196  ;;  %v4552_v40 = vpop.permute.xlu2 %1217 }
 0x4fd   : > { %v1363_v12 = vperm.slane %v1197_v59, %v3946_v6  ;;  %v1351_v59 = vperm.slane %v4426_v62, %v3946_v6 }
 0x4ff   : > { %v1365_v15 = vsel %vm122_vm3, %v1364_v48, %v1363_v12 }
 0x502   :  { %3814 = vset.pattern.permute.xlu1 (%p28_p0), %v3949_v7 }
 0x504   : > { %v1206_v35 = vpop.permute.xlu1 %1205 }
 0x505   : > { %v1367_v38 = vperm.slane %v1206_v35, %v4016_v21  ;;  %v4559_v44 = vpop.permute.xlu2 %1310 }
 0x507   : > { %v1368_v25 = vsel %vm122_vm3, %v1367_v38, %v1366_v18 }
 0x508   : > { %v1442_v51 = vsel %vm127_vm15, %v1368_v25, %v1365_v15 }
 0x50c   : > { %v1296_v29 = vpop.permute.xlu1 %1295 }
 0x50d   : > { %v1412_v58 = vperm.slane %v1296_v29, %v4016_v21  ;;  %v1176_v55 = vpop.permute.xlu2 %1175 }
 0x50e   : > { %v1352_v53 = vperm.slane %v1176_v55, %v4016_v21  ;;  %v1405_v55 = vperm.slane %v4540_v24, %v3946_v6 }
 0x50f   : > { %v1413_v22 = vsel %vm122_vm3, %v1412_v58, %v1411_v17 }
 0x510   : > { %v1456_v61 = vsel %vm127_vm15, %v1416_v45, %v1413_v22  ;;  %v1353_v12 = vsel %vm122_vm3, %v1352_v53, %v1351_v59 }
 0x511   : > { %v4566_v32 = vsel %vm128_vm0, %v1419_v60, %v1456_v61  ;;  %v1348_v60 = vperm.slane %v4400_v0, %v3946_v6 }
 0x514   : > { %v1209_v19 = vpop.permute.xlu1 %1208 }
 0x515   : > { %v1369_v46 = vperm.slane %v1209_v19, %v3946_v6  ;;  %v4583_v34 = vpop.permute.xlu2 %1319 }
 0x517   : > { %v1371_v43 = vsel %vm122_vm3, %v1370_v39, %v1369_v46  ;;  %v1402_v39 = vperm.slane %v4445_v52, %v3946_v6 }
 0x518   : > { %v4574_v28 = vsel %vm128_vm0, %v1371_v43, %v1442_v51 }
 0x51c   : > { %v1260_v31 = vpop.permute.xlu1 %1259  ;;  %v4577_v47 = vpop.permute.xlu0 %1316 }
 0x51d   : > { %v1394_v13 = vperm.slane %v1260_v31, %v4016_v21  ;;  %v1227_v0 = vpop.permute.xlu2 %1226 }
 0x51f   : > { %v1395_v45 = vsel %vm122_vm3, %v1394_v13, %v1393_v54 }
 0x520   : > { %v1450_v11 = vsel %vm128_vm0, %v1395_v45, %v4527_v41  ;;  %v1354_v41 = vperm.slane %v4535_v36, %v3946_v6 }
 0x521   : > { %v1451_v26 = vsel %vm130_vm1, %v1398_v50, %v1450_v11  ;;  %v1357_v11 = vperm.slane %v4432_v20, %v3946_v6  ;;  %v1373_v20 = vperm.slane %v4552_v40, %v4016_v21  ;;  %v1423_v40 = vperm.slane %v4577_v47, %v3946_v6 }
 0x522   : > { %v1017_v47 = vmul.f32 0.5, %v3953_v9 }
 0x524   : > { %v1170_v42 = vpop.permute.xlu1 %1169  ;;  %v1182_v30 = vpop.permute.xlu0 %1181 }
 0x525   : > { %v1349_v16 = vperm.slane %v1170_v42, %v4016_v21  ;;  %v1355_v57 = vperm.slane %v1182_v30, %v4016_v21  ;;  %v1278_v51 = vpop.permute.xlu2 %1277 }
 0x526   : > { %v1403_v29 = vperm.slane %v1278_v51, %v4016_v21  ;;  %v1424_v51 = vperm.slane %v4583_v34, %v4016_v21 }
 0x527   : > { %v1350_v48 = vsel %vm122_vm3, %v1349_v16, %v1348_v60  ;;  %v1356_v18 = vsel %vm122_vm3, %v1355_v57, %v1354_v41  ;;  %v1420_v41 = vperm.slane %v4559_v44, %v3946_v6 }
 0x528   : > { %v1437_v15 = vsel %vm130_vm1, %v1350_v48, %v4511_v56  ;;  %v1399_v56 = vperm.slane %v4419_v8, %v3946_v6  ;;  %v1404_v43 = vsel %vm122_vm3, %v1403_v29, %v1402_v39 }
 0x529   : > { %v1438_v35 = vsel %vm132_vm5, %v1353_v12, %v1437_v15  ;;  %v1372_v15 = vperm.slane %v4550_v33, %v3946_v6 }
 0x52a   : > { %v1439_v38 = vsel %vm134_vm6, %v1356_v18, %v1438_v35  ;;  %v1376_v35 = vperm.slane %v4568_v14, %v4016_v21 }
 0x52c   : > { %v1314_v62 = vpop.permute.xlu1 %1313  ;;  %v4606_v25 = vpop.permute.xlu0 %1325 }
 0x52d   : > { %v4613_v22 = vpop.permute.xlu2 %1235  ;;  %v1421_v59 = vperm.slane %v1314_v62, %v4016_v21  ;;  %v1374_v62 = vsel %vm122_vm3, %v1373_v20, %v1372_v15 }
 0x52e   : > { %v1382_v39 = vperm.slane %v4613_v22, %v4016_v21 }
 0x52f   : > { %v1422_v18 = vsel %vm122_vm3, %v1421_v59, %v1420_v41 }
 0x530   : > { %v1458_v14 = vsel %vm130_vm1, %v1422_v18, %v4566_v32 }
 0x534   : > { %v1221_v36 = vpop.permute.xlu1 %1220  ;;  %v4608_v37 = vpop.permute.xlu0 %1232 }
 0x535   : > { %v1329_v63 = vpop.permute.xlu2 %1328  ;;  %v1381_v34 = vperm.slane %v4608_v37, %v3946_v6 }
 0x53c   : > { %v1272_v17 = vpop.permute.xlu1 %1271  ;;  %v1284_v58 = vpop.permute.xlu0 %1283 }
 0x53d   : > { %v1400_v61 = vperm.slane %v1272_v17, %v4016_v21  ;;  %v1406_v19 = vperm.slane %v1284_v58, %v4016_v21  ;;  %v1194_v45 = vpop.permute.xlu2 %1193  ;;  %v1444_v17 = vsel %vm130_vm1, %v1374_v62, %v4574_v28  ;;  %v1429_v58 = vperm.slane %v1329_v63, %v3946_v6 }
 0x53e   : > { %v1361_v24 = vperm.slane %v1194_v45, %v4016_v21  ;;  %v1525_v62 = vpack.c.bf16 %v3908_v1, %v3908_v1 }
 0x53f   : > { %v1401_v46 = vsel %vm122_vm3, %v1400_v61, %v1399_v56  ;;  %v1407_v31 = vsel %vm122_vm3, %v1406_v19, %v1405_v55  ;;  %v1425_v61 = vsel %vm122_vm3, %v1424_v51, %v1423_v40  ;;  %v1526_v51 = vpack.c.bf16 %v3904_v2, %v3904_v2 }
 0x540   : > { %v1452_v49 = vsel %vm132_vm5, %v1401_v46, %v1451_v26  ;;  %v1360_v26 = vperm.slane %v4463_v23, %v3946_v6  ;;  %v1375_v23 = vperm.slane %v1221_v36, %v3946_v6  ;;  %v1459_v28 = vsel %vm132_vm5, %v1425_v61, %v1458_v14 }
 0x541   : > { %v1453_v8 = vsel %vm134_vm6, %v1404_v43, %v1452_v49  ;;  %v1537_v14 = vunpack.c.l.b16 %v1526_v51 }
 0x542   : > { %v4627_v54 = vsel %vm136_vm7, %v1407_v31, %v1453_v8  ;;  %v1362_v30 = vsel %vm122_vm3, %v1361_v24, %v1360_v26  ;;  %v1377_v36 = vsel %vm122_vm3, %v1376_v35, %v1375_v23  ;;  %v1018_v24 = vmul.f32 0.5, %v3957_v10 }
 0x543   : > { %v1445_v32 = vsel %vm132_vm5, %v1377_v36, %v1444_v17  ;;  %v1528_v36 = vpack.c.bf16 %v3896_v4, %v3896_v4 }
 0x544   : > { %v1230_v13 = vpop.permute.xlu1 %1229  ;;  %v1242_v60 = vpop.permute.xlu0 %1241 }
 0x545   : > { %v1379_v12 = vperm.slane %v1230_v13, %v4016_v21  ;;  %v1338_v19 = vpop.permute.xlu2 %1337  ;;  %v1385_v37 = vperm.slane %v1242_v60, %v4016_v21  ;;  %v1383_v13 = vsel %vm122_vm3, %v1382_v39, %v1381_v34 }
 0x546   : > { %v1433_v63 = vperm.slane %v1338_v19, %v4016_v21 }
 0x54c   : > { %v1323_v52 = vpop.permute.xlu1 %1322  ;;  %v1335_v56 = vpop.permute.xlu0 %1334 }
 0x54d   : > { %v1426_v44 = vperm.slane %v1323_v52, %v3946_v6  ;;  %v1432_v49 = vperm.slane %v1335_v56, %v3946_v6 }
 0x554   : > { %v1188_v50 = vpop.permute.xlu1 %1187 }
 0x555   : > { %v1358_v53 = vperm.slane %v1188_v50, %v4016_v21 }
 0x557   : > { %v1359_v42 = vsel %vm122_vm3, %v1358_v53, %v1357_v11  ;;  %v1434_v53 = vsel %vm122_vm3, %v1433_v63, %v1432_v49 }
 0x558   : > { %v1440_v16 = vsel %vm136_vm7, %v1359_v42, %v1439_v38  ;;  %v1378_v38 = vperm.slane %v1227_v0, %v3946_v6  ;;  %v1427_v0 = vperm.slane %v4606_v25, %v4016_v21 }
 0x559   : > { %v1441_v57 = vsel %vm138_vm8, %v1362_v30, %v1440_v16  ;;  %v1408_v16 = vperm.slane %v4449_v27, %v3946_v6 }
 0x55a   : > { %v1380_v29 = vsel %vm122_vm3, %v1379_v12, %v1378_v38  ;;  %v1428_v25 = vsel %vm122_vm3, %v1427_v0, %v1426_v44  ;;  %v1467_v31 = vadd.f32 %v1441_v57, %v1017_v47 }
 0x55b   : > { %v1446_v55 = vsel %vm134_vm6, %v1380_v29, %v1445_v32  ;;  %v1460_v22 = vsel %vm134_vm6, %v1428_v25, %v1459_v28  ;;  %v1565_v29 = vunpack.c.l.b16 %v1528_v36 }
 0x55c   : > { %v1332_v48 = vpop.permute.xlu1 %1331  ;;  %v1447_v50 = vsel %vm136_vm7, %v1383_v13, %v1446_v55  ;;  %v1471_v42 = vpack.c.bf16 %v1467_v31, %v1467_v31  ;;  %v4742_v13 = vsub.f32 (%p28_p0), 1.0, %v3957_v10 }
 0x55d   : > { %v1430_v33 = vperm.slane %v1332_v48, %v4016_v21 }
 0x55e   : > { %v1477_v20 = vunpack.c.l.b16 %v1471_v42 }
 0x55f   : > { %v1431_v46 = vsel %vm122_vm3, %v1430_v33, %v1429_v58  ;;  %v1536_v33 = vunpack.c.l.b16 %v1525_v62 }
 0x560   : > { %v1461_v52 = vsel %vm136_vm7, %v1431_v46, %v1460_v22 }
 0x561   : > { %v1462_v30 = vsel %vm138_vm8, %v1434_v53, %v1461_v52 }
 0x562   : > { %v1470_v23 = vadd.f32 %v1462_v30, %v1018_v24 }
 0x564   : > { %v1239_v43 = vpop.permute.xlu1 %1238  ;;  %v1474_v18 = vpack.c.bf16 %v1470_v23, %v1470_v23 }
 0x565   : > { %v1384_v8 = vperm.slane %v1239_v43, %v3946_v6 }
 0x566   : > { %v1501_v27 = vunpack.c.l.b16 %v1474_v18 }
 0x567   : > { %v1386_v45 = vsel %vm122_vm3, %v1385_v37, %v1384_v8  ;;  %v4723_v8 = vsub.f32 (%p28_p0), 1.0, %v3953_v9 }
 0x568   : > { %v1448_v11 = vsel %vm138_vm8, %v1386_v45, %v1447_v50 }
 0x569   : > { %v1468_v26 = vadd.f32 %v1448_v11, %v1018_v24  ;;  %v2344_v23 = vperm.slane (%p28_p0), %v4723_v8, 1  ;;  %v2370_v36 = vperm.slane (%p28_p0), %v4723_v8, 3 }
 0x56b   : > { %v1472_v60 = vpack.c.bf16 %v1468_v26, %v1468_v26 }
 0x56c   : > { %v1290_v57 = vpop.permute.xlu1 %1289 }
 0x56d   : > { %v1409_v59 = vperm.slane %v1290_v57, %v4016_v21  ;;  %v1478_v41 = vunpack.c.l.b16 %v1472_v60 }
 0x56f   : > { %v1410_v48 = vsel %vm122_vm3, %v1409_v59, %v1408_v16  ;;  %v1479_v12 = vpack.c.b16 %v1478_v41, %v1477_v20 }
 0x570   : > { %v1455_v15 = vsel %vm138_vm8, %v1410_v48, %v4627_v54  ;;  %v1527_v54 = vpack.c.bf16 %v3900_v3, %v3900_v3 }
 0x571   : > { %1491 = vmatpush.bf16.msra.mxu2 %v1479_v12  ;;  %v1469_v35 = vadd.f32 %v1455_v15, %v1017_v47  ;;  %v1538_v47 = vpack.c.b16 %v1537_v14, %v1536_v33  ;;  %v6239_v15 = vperm.slane (%p28_p0), %v4742_v13, 3  ;;  %v2435_v33 = vperm.slane (%p28_p0), %v4742_v13, 0 }
 0x572   : > { %v1564_v0 = vunpack.c.l.b16 %v1527_v54 }
 0x573   : > { %v1473_v38 = vpack.c.bf16 %v1469_v35, %v1469_v35 }
 0x574   : > { %3711 = vmatmul.msk.bf16.vlgmr.msra.gmra.mxu2 %vm184_vm4, %v1479_v12  ;;  %v1566_v17 = vpack.c.b16 %v1565_v29, %v1564_v0  ;;  %v6241_v12 = vperm.slane (%p28_p0), %v4723_v8, 6  ;;  %v6240_v0 = vperm.slane (%p28_p0), %v4742_v13, 5 }
 0x575   : > { %v1500_v40 = vunpack.c.l.b16 %v1473_v38  ;;  %1550 = vmatpush.bf16.msrb.mxu2 %v1538_v47 }
 0x577   : > { %v1502_v44 = vpack.c.b16 %v1501_v27, %v1500_v40 }
 0x579   : > { %1514 = vmatpush.bf16.msra.mxu3 %v1502_v44 }
 0x57c   : > { %3712 = vmatmul.msk.bf16.vlgmr.msra.gmra.mxu3 %vm184_vm4, %v1502_v44 }
 0x57d   : > { %1578 = vmatpush.bf16.msrb.mxu3 %v1566_v17 }
 0x5f7   : > { %v1493_v58 = vpop.f32.mrf.mxu2 }
 0x5f8   : > { %v1521_v34 = vpack.c.bf16 %v1493_v58, %v1493_v58  ;;  %v4739_v9 = vmul.f32 (%p28_p0), %v4723_v8, %v1493_v58 }
 0x5fa   : > { %v1531_v2 = vunpack.c.l.b16 %v1521_v34  ;;  %v1597_v22 = vsel (%p28_p0), %vm184_vm4, %v4739_v9, 0.0  ;;  %v1653_v52 = vperm.slane (%p28_p0), %v4739_v9, 0  ;;  %v1666_v11 = vperm.slane (%p28_p0), %v4739_v9, 1 }
 0x5fb   :  { %1598 = vadd.xlane.f32.xlu0 (%p28_p0), %v1597_v22  ;;  %v1679_v53 = vperm.slane (%p28_p0), %v4739_v9, 2  ;;  %v1705_v30 = vperm.slane (%p28_p0), %v4739_v9, 4  ;;  %v1718_v16 = vperm.slane (%p28_p0), %v4739_v9, 5  ;;  %v1692_v59 = vperm.slane (%p28_p0), %v4739_v9, 3 }
 0x5fc   :  { %1658 = vperm.xlu2 (%p28_p0), %3811, %v1653_v52   ;;  %v1731_v41 = vperm.slane (%p28_p0), %v4739_v9, 6  ;;  %v1744_v48 = vperm.slane (%p28_p0), %v4739_v9, 7 }
 0x5ff   : > { %v1495_v56 = vpop.f32.mrf.mxu2  ;;  %v1516_v61 = vpop.f32.mrf.mxu3 }
 0x600   : > { %v1522_v1 = vpack.c.bf16 %v1495_v56, %v1495_v56  ;;  %v1523_v3 = vpack.c.bf16 %v1516_v61, %v1516_v61  ;;  %v4736_v31 = vmul.f32 (%p28_p0), %v4723_v8, %v1516_v61  ;;  %v4761_v45 = vmul.f32 (%p28_p0), %v4742_v13, %v1495_v56 }
 0x602   : > { %v1532_v32 = vunpack.c.l.b16 %v1522_v1  ;;  %v1559_v39 = vunpack.c.l.b16 %v1523_v3  ;;  %v1603_v63 = vsel (%p28_p0), %vm184_vm4, %v4736_v31, 0.0  ;;  %v1600_v50 = vsel (%p28_p0), %vm184_vm4, %v4761_v45, 0.0 }
 0x603   :  { %1604 = vadd.xlane.f32.xlu1 (%p28_p0), %v1603_v63  ;;  %1601 = vadd.xlane.f32.xlu0 (%p28_p0), %v1600_v50  ;;  %v1757_v26 = vperm.slane (%p28_p0), %v4761_v45, 0  ;;  %v1822_v42 = vperm.slane (%p28_p0), %v4761_v45, 5  ;;  %v1887_v60 = vperm.slane (%p28_p0), %v4736_v31, 2  ;;  %v1952_v57 = vperm.slane (%p28_p0), %v4736_v31, 7 }
 0x604   : > { %v1533_v19 = vpack.c.b16 %v1532_v32, %v1531_v2  ;;  %3812 = vset.pattern.permute.xlu2 (%p28_p0), %v3949_v7  ;;  %v1770_v35 = vperm.slane (%p28_p0), %v4761_v45, 1  ;;  %v1783_v18 = vperm.slane (%p28_p0), %v4761_v45, 2  ;;  %v1796_v38 = vperm.slane (%p28_p0), %v4761_v45, 3 }
 0x605   :  { %v1848_v40 = vperm.slane (%p28_p0), %v4761_v45, 7  ;;  %v1809_v27 = vperm.slane (%p28_p0), %v4761_v45, 4  ;;  %v1913_v44 = vperm.slane (%p28_p0), %v4736_v31, 4  ;;  %v1835_v51 = vperm.slane (%p28_p0), %v4761_v45, 6 }
 0x606   : > { %3713 = vmatmul.msk.bf16.vlgmr.msrb.gmra.mxu2 %vm184_vm4, %v1533_v19  ;;  %v1861_v14 = vperm.slane (%p28_p0), %v4736_v31, 0  ;;  %v1874_v29 = vperm.slane (%p28_p0), %v4736_v31, 1  ;;  %v1900_v47 = vperm.slane (%p28_p0), %v4736_v31, 3  ;;  %v1926_v34 = vperm.slane (%p28_p0), %v4736_v31, 5 }
 0x607   : > { %v1518_v25 = vpop.f32.mrf.mxu3 }
 0x608   : > { %v1524_v4 = vpack.c.bf16 %v1518_v25, %v1518_v25  ;;  %v4758_v10 = vmul.f32 (%p28_p0), %v4742_v13, %v1518_v25 }
 0x60a   : > { %v1560_v55 = vunpack.c.l.b16 %v1524_v4  ;;  %v1606_v24 = vsel (%p28_p0), %vm184_vm4, %v4758_v10, 0.0  ;;  %v2017_v20 = vperm.slane (%p28_p0), %v4758_v10, 4  ;;  %v1978_v62 = vperm.slane (%p28_p0), %v4758_v10, 1 }
 0x60b   :  { %1607 = vadd.xlane.f32.xlu1 (%p28_p0), %v1606_v24  ;;  %v2043_v54 = vperm.slane (%p28_p0), %v4758_v10, 6  ;;  %v1965_v25 = vperm.slane (%p28_p0), %v4758_v10, 0  ;;  %v2004_v9 = vperm.slane (%p28_p0), %v4758_v10, 3  ;;  %v2030_v24 = vperm.slane (%p28_p0), %v4758_v10, 5 }
 0x60c   : > { %v1561_v28 = vpack.c.b16 %v1560_v55, %v1559_v39  ;;  %1664 = vperm.xlu2 (%p28_p0), %3812, %v1653_v52  }
 0x60e   : > { %3714 = vmatmul.msk.bf16.vlgmr.msrb.gmra.mxu3 %vm184_vm4, %v1561_v28 }
 0x614   :  { %3815 = vset.pattern.permute.xlu2 (%p28_p0), %v3944_v5 }
 0x617   :  { %1671 = vperm.xlu0 (%p28_p0), %3813, %v1666_v11  }
 0x61c   :  { %1684 = vperm.xlu2 (%p28_p0), %3815, %v1679_v53  }
 0x61f   :  { %1762 = vperm.xlu0 (%p28_p0), %3813, %v1757_v26  }
 0x624   :  { %1677 = vperm.xlu1 (%p28_p0), %3814, %v1666_v11   ;;  %3816 = vset.pattern.permute.xlu2 (%p28_p0), %v3949_v7 }
 0x627   :  { %1827 = vperm.xlu0 (%p28_p0), %3813, %v1822_v42  }
 0x62c   :  { %3819 = vset.pattern.permute.xlu1 (%p28_p0), %v3944_v5  ;;  %1690 = vperm.xlu2 (%p28_p0), %3816, %v1679_v53  }
 0x62f   :  { %1892 = vperm.xlu0 (%p28_p0), %3813, %v1887_v60  }
 0x634   :  { %1710 = vperm.xlu1 (%p28_p0), %3819, %v1705_v30   ;;  %3817 = vset.pattern.permute.xlu2 (%p28_p0), %v3944_v5 }
 0x637   :  { %1957 = vperm.xlu0 (%p28_p0), %3813, %v1952_v57  }
 0x63c   :  { %1723 = vperm.xlu1 (%p28_p0), %3819, %v1718_v16   ;;  %1697 = vperm.xlu2 (%p28_p0), %3817, %v1692_v59  }
 0x63f   :  { %2022 = vperm.xlu0 (%p28_p0), %3813, %v2017_v20  }
 0x644   :  { %3821 = vset.pattern.permute.xlu1 (%p28_p0), %v3949_v7  ;;  %3818 = vset.pattern.permute.xlu2 (%p28_p0), %v3949_v7 }
 0x647   :  { %2349 = vperm.xlu0 (%p28_p0), %3813, %v2344_v23  }
 0x64c   :  { %1742 = vperm.xlu1 (%p28_p0), %3821, %v1731_v41   ;;  %1703 = vperm.xlu2 (%p28_p0), %3818, %v1692_v59  }
 0x64f   :  { %2414 = vperm.xlu0 (%p28_p0), %3813, %v6241_v12  }
 0x654   :  { %1755 = vperm.xlu1 (%p28_p0), %3821, %v1744_v48   ;;  %1716 = vperm.xlu2 (%p28_p0), %3818, %v1705_v30  }
 0x656   :  { %v4839_v17 = vpop.permute.xlu2 (%p28_p0), %1658 }
 0x657   :  { %2479 = vperm.xlu0 (%p28_p0), %3813, %v6239_v15  }
 0x65c   :  { %3823 = vset.pattern.permute.xlu1 (%p28_p0), %v3944_v5  ;;  %3820 = vset.pattern.permute.xlu2 (%p28_p0), %v3944_v5 }
 0x65f   :  { %3850 = vset.pattern.permute.xlu0 (%p28_p0), %v3949_v7 }
 0x664   :  { %1775 = vperm.xlu1 (%p28_p0), %3823, %v1770_v35   ;;  %1736 = vperm.xlu2 (%p28_p0), %3820, %v1731_v41  }
 0x666   :  { %v4841_v58 = vpop.permute.xlu2 (%p28_p0), %1664 }
 0x667   :  { %1729 = vperm.xlu0 (%p28_p0), %3850, %v1718_v16  }
 0x66c   :  { %1788 = vperm.xlu1 (%p28_p0), %3823, %v1783_v18   ;;  %1749 = vperm.xlu2 (%p28_p0), %3820, %v1744_v48  }
 0x66f   :  { %1794 = vperm.xlu0 (%p28_p0), %3850, %v1783_v18   ;;  %v2357_v18 = vperm.slane (%p28_p0), %v4723_v8, 2 }
 0x674   :  { %3825 = vset.pattern.permute.xlu1 (%p28_p0), %v3949_v7  ;;  %3822 = vset.pattern.permute.xlu2 (%p28_p0), %v3949_v7 }
 0x676   :  { %v4845_v56 = vpop.permute.xlu2 (%p28_p0), %1684  ;;  %v4847_v61 = vpop.xlane.xlu1 (%p28_p0), %1604 }
 0x677   :  { %1859 = vperm.xlu0 (%p28_p0), %3850, %v1848_v40  }
 0x67c   :  { %1807 = vperm.xlu1 (%p28_p0), %3825, %v1796_v38   ;;  %1768 = vperm.xlu2 (%p28_p0), %3822, %v1757_v26   ;;  %v2056_v26 = vperm.slane (%p28_p0), %v4758_v10, 7 }
 0x67e   :  { %v4855_v32 = vpop.xlane.xlu1 (%p28_p0), %1607 }
 0x67f   :  { %1924 = vperm.xlu0 (%p28_p0), %3850, %v1913_v44   ;;  %vm1645_vm14 = vweird.f32 (%p28_p0), %v4855_v32 }
 0x684   :  { %1820 = vperm.xlu1 (%p28_p0), %3825, %v1809_v27   ;;  %1781 = vperm.xlu2 (%p28_p0), %3822, %v1770_v35  }
 0x687   :  { %1989 = vperm.xlu0 (%p28_p0), %3850, %v1978_v62  }
 0x689   : > { %v1552_v46 = vpop.f32.mrf.mxu2  }
 0x68a   : > { %v6313_v1 = vmov %v1552_v46  ;;  %1586 = vst.msk [vmem:[%s6233_s1] sm:$0xff] (%p28_p0), %vm44_vm2, %v1552_v46 }
 0x68b   :  { %v1939_v1 = vperm.slane (%p28_p0), %v4736_v31, 6 }
 0x68c   :  { %3827 = vset.pattern.permute.xlu1 (%p28_p0), %v3944_v5  ;;  %3824 = vset.pattern.permute.xlu2 (%p28_p0), %v3944_v5 }
 0x68f   :  { %2054 = vperm.xlu0 (%p28_p0), %3850, %v2043_v54  }
 0x691   : > { %v1554_v43 = vpop.f32.mrf.mxu2   ;;  %v1580_v37 = vpop.f32.mrf.mxu3  }
 0x692   : > { %v6311_v3 = vmov %v1580_v37  ;;  %v6312_v2 = vmov %v1554_v43  ;;  %1587 = vst.msk [vmem:[%s6233_s1 + $0x8] sm:$0xff] (%p28_p0), %vm44_vm2, %v1554_v43  ;;  %v1991_v43 = vperm.slane (%p28_p0), %v4758_v10, 2 }
 0x693   :  { %1588 = vst.msk [vmem:[%s6233_s1 + $0x10] sm:$0xff] (%p28_p0), %vm44_vm2, %v1580_v37  ;;  %v4851_v2 = vpop.permute.xlu2 (%p28_p0), %1690 }
 0x694   :  { %1840 = vperm.xlu1 (%p28_p0), %3827, %v1835_v51   ;;  %1801 = vperm.xlu2 (%p28_p0), %3824, %v1796_v38  }
 0x696   :  { %30 = sbr.rel (!%p28_p0) target bundleno = 8 (0x8), region = 39  ;;  %v4860_v3 = vpop.permute.xlu1 (%p28_p0), %1677 }
 0x697   :  { %2381 = vperm.xlu0 (%p28_p0), %3850, %v2370_v36  }
 0x699   : > { %v1582_v49 = vpop.f32.mrf.mxu3  }
 0x69a   : > { %v6310_v4 = vmov %v1582_v49  ;;  %1589 = vst.msk [vmem:[%s6233_s1 + $0x18] sm:$0xff] (%p28_p0), %vm44_vm2, %v1582_v49 }
 0x69b   :  { %v4857_v19 = vpop.permute.xlu2 %1697 }
 0x69c   :  { %1853 = vperm.xlu1 %3827, %v1848_v40   ;;  %1814 = vperm.xlu2 %3824, %v1809_v27  }
 0x69f   :  { %2446 = vperm.xlu0 %3850, %v2435_v33  }
 0x6a4   :  { %3829 = vset.pattern.permute.xlu1 %v3949_v7  ;;  %3826 = vset.pattern.permute.xlu2 %v3949_v7 }
 0x6a6   :  { %v4863_v4 = vpop.permute.xlu2 %1703  ;;  %v4866_v39 = vpop.permute.xlu1 %1710 }
 0x6a7   :  { %2511 = vperm.xlu0 %3850, %v6240_v0  }
 0x6ac   :  { %1872 = vperm.xlu1 %3829, %v1861_v14   ;;  %1833 = vperm.xlu2 %3826, %v1822_v42  }
 0x6ae   :  { %v4868_v55 = vpop.permute.xlu2 %1716  ;;  %v4870_v28 = vpop.permute.xlu1 %1723 }
 0x6b4   :  { %1885 = vperm.xlu1 %3829, %v1874_v29   ;;  %1846 = vperm.xlu2 %3826, %v1835_v51  }
 0x6bc   :  { %3831 = vset.pattern.permute.xlu1 %v3944_v5  ;;  %3828 = vset.pattern.permute.xlu2 %v3944_v5 }
 0x6be   :  { %v4872_v46 = vpop.permute.xlu2 %1736  ;;  %v4876_v37 = vpop.permute.xlu1 %1742 }
 0x6c4   :  { %1905 = vperm.xlu1 %3831, %v1900_v47   ;;  %1866 = vperm.xlu2 %3828, %v1861_v14  }
 0x6c6   :  { %v4878_v49 = vpop.permute.xlu2 %1749  ;;  %v4882_v63 = vpop.permute.xlu1 %1755 }
 0x6cc   :  { %1918 = vperm.xlu1 %3831, %v1913_v44   ;;  %1879 = vperm.xlu2 %3828, %v1874_v29  }
 0x6d4   :  { %3833 = vset.pattern.permute.xlu1 %v3949_v7  ;;  %3830 = vset.pattern.permute.xlu2 %v3949_v7 }
 0x6d6   :  { %v4884_v22 = vpop.permute.xlu2 %1768  ;;  %v4889_v52 = vpop.permute.xlu1 %1775 }
 0x6dc   :  { %1937 = vperm.xlu1 %3833, %v1926_v34   ;;  %1898 = vperm.xlu2 %3830, %v1887_v60   ;;  %v2331_v60 = vperm.slane %v4723_v8, 0 }
 0x6de   :  { %v4891_v45 = vpop.permute.xlu2 %1781  ;;  %v4895_v50 = vpop.permute.xlu1 %1788 }
 0x6e4   :  { %1950 = vperm.xlu1 %3833, %v1939_v1   ;;  %1911 = vperm.xlu2 %3830, %v1900_v47   ;;  %v2396_v47 = vperm.slane %v4723_v8, 5 }
 0x6ec   :  { %3835 = vset.pattern.permute.xlu1 %v3944_v5  ;;  %3832 = vset.pattern.permute.xlu2 %v3944_v5 }
 0x6ee   :  { %v4897_v11 = vpop.permute.xlu2 %1801  ;;  %v4901_v31 = vpop.permute.xlu1 %1807 }
 0x6f4   :  { %1970 = vperm.xlu1 %3835, %v1965_v25   ;;  %1931 = vperm.xlu2 %3832, %v1926_v34  }
 0x6f6   :  { %v4903_v53 = vpop.permute.xlu2 %1814  ;;  %v4907_v42 = vpop.permute.xlu1 %1820 }
 0x6fc   :  { %1983 = vperm.xlu1 %3835, %v1978_v62   ;;  %1944 = vperm.xlu2 %3832, %v1939_v1  }
 0x704   :  { %3837 = vset.pattern.permute.xlu1 %v3949_v7  ;;  %3834 = vset.pattern.permute.xlu2 %v3949_v7 }
 0x706   :  { %v4909_v30 = vpop.permute.xlu2 %1833  ;;  %v4913_v16 = vpop.permute.xlu1 %1840 }
 0x70c   :  { %2002 = vperm.xlu1 %3837, %v1991_v43   ;;  %1963 = vperm.xlu2 %3834, %v1952_v57   ;;  %v4915_v57 = vpop.xlane.xlu0 %1598 }
 0x70d   :  { %3858 = vrsqrt.f32 %v4915_v57  ;;  %vm1615_vm2 = vweird.f32 %v4915_v57 }
 0x70e   :  { %v4917_v59 = vpop.permute.xlu2 %1846  ;;  %v4921_v41 = vpop.permute.xlu1 %1853 }
 0x714   :  { %2015 = vperm.xlu1 %3837, %v2004_v9   ;;  %1976 = vperm.xlu2 %3834, %v1965_v25   ;;  %v4926_v35 = vpop.xlane.xlu0 %1601 }
 0x715   :  { %3860 = vrsqrt.f32 %v4926_v35  ;;  %vm1625_vm11 = vweird.f32 %v4926_v35 }
 0x716   :  { %3862 = vrsqrt.f32 %v4855_v32 }
 0x717   :  { %3864 = vrsqrt.f32 %v4847_v61 }
 0x71c   :  { %3839 = vset.pattern.permute.xlu1 %v3944_v5  ;;  %3836 = vset.pattern.permute.xlu2 %v3944_v5  ;;  %v4931_v40 = vpop.permute.xlu0 %1671 }
 0x71e   :  { %v4923_v48 = vpop.permute.xlu2 %1866  ;;  %v4929_v38 = vpop.permute.xlu1 %1872 }
 0x71f   :  { %6314 = vst [vmem:[#allocation2_spill] sm:$0xff] %v4923_v48 }
 0x724   :  { %2035 = vperm.xlu1 %3839, %v2030_v24   ;;  %1996 = vperm.xlu2 %3836, %v1991_v43   ;;  %v4942_v44 = vpop.permute.xlu0 %1762 }
 0x726   :  { %v4933_v27 = vpop.permute.xlu2 %1879  ;;  %v4938_v10 = vpop.permute.xlu1 %1885 }
 0x727   :  { %6315 = vst [vmem:[#allocation3_spill] sm:$0xff] %v4938_v10 }
 0x72c   :  { %2048 = vperm.xlu1 %3839, %v2043_v54   ;;  %2009 = vperm.xlu2 %3836, %v2004_v9   ;;  %v2383_v54 = vperm.slane %v4723_v8, 4  ;;  %v4950_v14 = vpop.permute.xlu0 %1827  ;;  %v2422_v9 = vperm.slane %v4723_v8, 7 }
 0x734   :  { %3841 = vset.pattern.permute.xlu1 %v3949_v7  ;;  %3838 = vset.pattern.permute.xlu2 %v3949_v7  ;;  %v4958_v34 = vpop.permute.xlu0 %1892 }
 0x736   :  { %v4945_v62 = vpop.permute.xlu1 %1905 }
 0x737   :  { %6316 = vst [vmem:[#allocation4_spill] sm:$0xff] %v4945_v62  ;;  %v6242_v62 = vmov 0  }
 0x738   :  { %3855 = vset.pattern.permute.xlu0 %v6242_v62 }
 0x73c   :  { %2067 = vperm.xlu1 %3841, %v2056_v26   ;;  %2028 = vperm.xlu2 %3838, %v2017_v20   ;;  %v4940_v20 = vpop.permute.xlu2 %1898  ;;  %v4967_v43 = vpop.permute.xlu0 %1957 }
 0x73d   :  { %6322 = vst [vmem:[#allocation10_spill] sm:$0xff] %v4967_v43 }
 0x744   :  { %2342 = vperm.xlu1 %3841, %v2331_v60   ;;  %2041 = vperm.xlu2 %3838, %v2030_v24   ;;  %v4947_v51 = vpop.permute.xlu2 %1911 }
 0x745   :  { %6317 = vst [vmem:[#allocation5_spill] sm:$0xff] %v4947_v51  ;;  %v6347_v51 = vmov 0  }
 0x74c   :  { %3843 = vset.pattern.permute.xlu1 %v3944_v5  ;;  %3840 = vset.pattern.permute.xlu2 %v3944_v5 }
 0x74e   :  { %v4955_v29 = vpop.permute.xlu2 %1931 }
 0x74f   :  { %6319 = vst [vmem:[#allocation7_spill] sm:$0xff] %v4955_v29 }
 0x754   :  { %2362 = vperm.xlu1 %3843, %v2357_v18   ;;  %2061 = vperm.xlu2 %3840, %v2056_v26  }
 0x756   :  { %v4964_v25 = vpop.permute.xlu2 %1944 }
 0x757   :  { %6321 = vst [vmem:[#allocation9_spill] sm:$0xff] %v4964_v25 }
 0x75c   :  { %2375 = vperm.xlu1 %3843, %v2370_v36   ;;  %2336 = vperm.xlu2 %3840, %v2331_v60   ;;  %v4953_v36 = vpop.permute.xlu1 %1918  ;;  %v4975_v60 = vpop.permute.xlu0 %2022 }
 0x75d   :  { %6318 = vst [vmem:[#allocation6_spill] sm:$0xff] %v4953_v36 }
 0x75e   :  { %6325 = vst [vmem:[#allocation13_spill] sm:$0xff] %v4975_v60 }
 0x764   :  { %3845 = vset.pattern.permute.xlu1 %v3949_v7  ;;  %3842 = vset.pattern.permute.xlu2 %v3949_v7  ;;  %v4962_v1 = vpop.permute.xlu1 %1937 }
 0x765   :  { %6320 = vst [vmem:[#allocation8_spill] sm:$0xff] %v4962_v1  ;;  %v2487_v1 = vperm.slane %v4742_v13, 4 }
 0x766   :  { %v4972_v26 = vpop.permute.xlu2 %1963 }
 0x767   :  { %6324 = vst [vmem:[#allocation12_spill] sm:$0xff] %v4972_v26  ;;  %v2448_v26 = vperm.slane %v4742_v13, 1 }
 0x76c   :  { %2394 = vperm.xlu1 %3845, %v2383_v54   ;;  %2355 = vperm.xlu2 %3842, %v2344_v23   ;;  %v4970_v24 = vpop.permute.xlu1 %1950 }
 0x76d   :  { %6323 = vst [vmem:[#allocation11_spill] sm:$0xff] %v4970_v24 }
 0x76e   :  { %v4979_v15 = vpop.permute.xlu2 %1976 }
 0x76f   :  { %6327 = vst [vmem:[#allocation15_spill] sm:$0xff] %v4979_v15 }
 0x774   :  { %2407 = vperm.xlu1 %3845, %v2396_v47   ;;  %2368 = vperm.xlu2 %3842, %v2357_v18   ;;  %v4977_v23 = vpop.permute.xlu1 %1970  ;;  %v4983_v18 = vpop.permute.xlu0 %2349 }
 0x775   :  { %6326 = vst [vmem:[#allocation14_spill] sm:$0xff] %v4977_v23 }
 0x77c   :  { %3847 = vset.pattern.permute.xlu1 %v3944_v5  ;;  %3844 = vset.pattern.permute.xlu2 %v3944_v5  ;;  %v4985_v0 = vpop.permute.xlu1 %1983  ;;  %v4991_v60 = vpop.permute.xlu0 %2414 }
 0x77d   :  { %6328 = vst [vmem:[#allocation16_spill] sm:$0xff] %v4985_v0  ;;  %v3859_v0 = vpop.eup %3858 }
 0x77e   :  { %v4987_v12 = vpop.permute.xlu2 %1996  ;;  %vm1616_vm9 = vweird.f32 %v3859_v0 }
 0x77f   :  { %6329 = vst [vmem:[#allocation17_spill] sm:$0xff] %v4987_v12  ;;  %v6334_v12 = vperm.slane %v4723_v8, 6  ;;  %vm1617_vm10 = vmor %vm1615_vm2, %vm1616_vm9 }
 0x784   :  { %2427 = vperm.xlu1 %3847, %v2422_v9   ;;  %2388 = vperm.xlu2 %3844, %v2383_v54   ;;  %v4994_v23 = vpop.permute.xlu1 %2002  ;;  %v2461_v54 = vperm.slane %v4742_v13, 2  ;;  %v5000_v25 = vpop.permute.xlu0 %2479 }
 0x785   :  { %6331 = vst [vmem:[#allocation19_spill] sm:$0xff] %v5000_v25 }
 0x78c   :  { %2440 = vperm.xlu1 %3847, %v2435_v33   ;;  %2401 = vperm.xlu2 %3844, %v2396_v47   ;;  %v4996_v33 = vpop.permute.xlu2 %2009  ;;  %v1610_v47 = vmul.f32 %v3859_v0, %v4915_v57  ;;  %v5004_v10 = vpop.permute.xlu1 %2015 }
 0x78d   :  { %6330 = vst [vmem:[#allocation18_spill] sm:$0xff] %v4996_v33  ;;  %v5010_v15 = vpop.permute.xlu0 %1729 }
 0x78e   :  { %6332 = vst [vmem:[#allocation20_spill] sm:$0xff] %v5004_v10  ;;  %v1611_v33 = vmul.f32 %v3859_v0, %v1610_v47  ;;  %v3861_v47 = vpop.eup %3860 }
 0x78f   :  { %vm1626_vm12 = vweird.f32 %v3861_v47 }
 0x790   :  { %v1612_v24 = vmul.f32 0.5, %v1611_v33  ;;  %vm1627_vm13 = vmor %vm1625_vm11, %vm1626_vm12 }
 0x792   :  { %v1613_v62 = vsub.f32 1.5, %v1612_v24 }
 0x794   :  { %3849 = vset.pattern.permute.xlu1 %v3949_v7  ;;  %3846 = vset.pattern.permute.xlu2 %v3949_v7  ;;  %v1614_v8 = vmul.f32 %v3859_v0, %v1613_v62  ;;  %v1620_v62 = vmul.f32 %v3861_v47, %v4926_v35 }
 0x796   :  { %v5006_v48 = vpop.permute.xlu2 %2028  ;;  %v5013_v43 = vpop.permute.xlu1 %2035  ;;  %v5023_v33 = vsel %vm1617_vm10, %v3859_v0, %v1614_v8  ;;  %v1621_v8 = vmul.f32 %v3861_v47, %v1620_v62  ;;  %vm1635_vm10 = vweird.f32 %v4847_v61 }
 0x797   :  { %6333 = vst [vmem:[#allocation21_spill] sm:$0xff] %v5006_v48  ;;  %v6244_v48 = vperm.slane %v5023_v33, 0  ;;  %v2133_v57 = vmul.f32 %v4839_v17, %v5023_v33 }
 0x798   :  { %6335 = vst [vmem:[#allocation22_spill] sm:$0xff] %v5013_v43  ;;  %v1622_v17 = vmul.f32 0.5, %v1621_v8 }
 0x799   :  { %v2265_v0 = vmul.f32 %v6244_v48, %v2133_v57 }
 0x79c   :  { %2459 = vperm.xlu1 %3849, %v2448_v26   ;;  %2420 = vperm.xlu2 %3846, %v6334_v12   ;;  %v5020_v12 = vpop.permute.xlu0 %1794 }
 0x79e   :  { %v5015_v29 = vpop.permute.xlu2 %2041 }
 0x79f   :  { %6336 = vst [vmem:[#allocation23_spill] sm:$0xff] %v5015_v29  ;;  %v6339_v29 = vperm.slane %v4742_v13, 5 }
 0x7a4   :  { %2472 = vperm.xlu1 %3849, %v2461_v54   ;;  %2433 = vperm.xlu2 %3846, %v2422_v9   ;;  %v5025_v9 = vpop.permute.xlu1 %2048  ;;  %v5035_v43 = vpop.permute.xlu0 %1859 }
 0x7a5   :  { %6337 = vst [vmem:[#allocation24_spill] sm:$0xff] %v5025_v9 }
 0x7ac   :  { %3852 = vset.pattern.permute.xlu1 %v3944_v5  ;;  %3848 = vset.pattern.permute.xlu2 %v3944_v5  ;;  %v5050_v57 = vpop.permute.xlu0 %1924 }
 0x7ad   :  { %6342 = vst [vmem:[#allocation28_spill] sm:$0xff] %v5050_v57 }
 0x7ae   :  { %v5027_v24 = vpop.permute.xlu2 %2061  ;;  %v5039_v9 = vpop.permute.xlu1 %2067 }
 0x7af   :  { %6338 = vst [vmem:[#allocation25_spill] sm:$0xff] %v5027_v24 }
 0x7b4   :  { %2492 = vperm.xlu1 %3852, %v2487_v1   ;;  %2453 = vperm.xlu2 %3848, %v2448_v26   ;;  %v2513_v26 = vperm.slane %v4742_v13, 6  ;;  %v5066_v57 = vpop.permute.xlu0 %1989 }
 0x7b5   :  { %6343 = vst [vmem:[#allocation29_spill] sm:$0xff] %v5066_v57 }
 0x7b6   :  { %v5041_v24 = vpop.permute.xlu2 %2336  ;;  %v5052_v62 = vpop.permute.xlu1 %2342 }
 0x7b7   :  { %6340 = vst [vmem:[#allocation26_spill] sm:$0xff] %v5041_v24  ;;  %v5044_v10 = vmul.f32 %v5041_v24, %v2265_v0 }
 0x7b9   :  { %6341 = vst [vmem:[#allocation27_spill] sm:$0xff] %v5044_v10  ;;  %2700 = vperm.xlu0 %3855, %v5044_v10   ;;  %v2135_v10 = vmul.f32 %v4931_v40, %v5023_v33 }
 0x7bc   :  { %2505 = vperm.xlu1 %3852, %v6339_v29   ;;  %2466 = vperm.xlu2 %3848, %v2461_v54   ;;  %v1623_v29 = vsub.f32 1.5, %v1622_v17  ;;  %v2526_v54 = vperm.slane %v4742_v13, 7 }
 0x7be   :  { %v1624_v48 = vmul.f32 %v3861_v47, %v1623_v29  ;;  %v2203_v29 = vperm.slane %v5023_v33, 2 }
 0x7c0   :  { %v5055_v0 = vsel %vm1627_vm13, %v3861_v47, %v1624_v48  ;;  %v6344_v48 = vperm.slane %v4742_v13, 3  ;;  %v2137_v13 = vmul.f32 %v4845_v56, %v5023_v33  ;;  %v2204_v56 = vperm.slane %v5023_v33, 3 }
 0x7c1   :  { %v2138_v35 = vmul.f32 %v4851_v2, %v5055_v0 }
 0x7c3   :  { %v2270_v47 = vmul.f32 %v2203_v29, %v2138_v35  ;;  %v2269_v35 = vmul.f32 %v2203_v29, %v2137_v13 }
 0x7c4   :  { %3854 = vset.pattern.permute.xlu1 %v3949_v7  ;;  %3851 = vset.pattern.permute.xlu2 %v3949_v7  ;;  %v6247_v7 = vperm.slane %v5023_v33, 1 }
 0x7c6   :  { %v5057_v8 = vpop.permute.xlu2 %2355  ;;  %v5060_v17 = vpop.permute.xlu1 %2362  ;;  %v2267_v24 = vmul.f32 %v6247_v7, %v2135_v10 }
 0x7c7   :  { %v5089_v10 = vpop.permute.xlu0 %2054 }
 0x7c8   :  { %v5080_v40 = vmul.f32 %v4983_v18, %v2267_v24  ;;  %v6250_v24 = vperm.slane %v5023_v33, 4 }
 0x7ca   :  { %6346 = vst [vmem:[#allocation31_spill] sm:$0xff] %v5080_v40 }
 0x7cc   :  { %2524 = vperm.xlu1 %3854, %v2513_v26   ;;  %2485 = vperm.xlu2 %3851, %v6344_v48   ;;  %v2141_v48 = vmul.f32 %v4866_v39, %v5023_v33 }
 0x7ce   :  { %v5074_v36 = vpop.permute.xlu2 %2368  ;;  %v5083_v57 = vpop.permute.xlu1 %2375 }
 0x7cf   :  { %v5077_v2 = vmul.f32 %v5074_v36, %v2270_v47  ;;  %v5095_v47 = vmul.f32 %v5060_v17, %v2269_v35  ;;  %v5106_v39 = vpop.permute.xlu0 %2381 }
 0x7d1   :  { %6345 = vst [vmem:[#allocation30_spill] sm:$0xff] %v5077_v2  ;;  %2715 = vperm.xlu0 %3855, %v5077_v2   ;;  %v2140_v2 = vmul.f32 %v4863_v4, %v5055_v0  ;;  %v2144_v4 = vmul.f32 %v5010_v15, %v5055_v0 }
 0x7d2   :  { %6348 = vst [vmem:[#allocation32_spill] sm:$0xff] %v5095_v47 }
 0x7d3   :  { %v2272_v13 = vmul.f32 %v2204_v56, %v2140_v2 }
 0x7d4   :  { %2537 = vperm.xlu1 %3854, %v2526_v54   ;;  %2498 = vperm.xlu2 %3851, %v2487_v1   ;;  %v2273_v1 = vmul.f32 %v6250_v24, %v2141_v48  ;;  %v2206_v48 = vperm.slane %v5023_v33, 5 }
 0x7d6   :  { %v2276_v2 = vmul.f32 %v2206_v48, %v2144_v4 }
 0x7dc   :  { %3857 = vset.pattern.permute.xlu1 %v6347_v51  ;;  %3853 = vset.pattern.permute.xlu2 %v3944_v5  ;;  %v2143_v5 = vmul.f32 %v4870_v28, %v5023_v33 }
 0x7dd   :  { %2706 = vperm.xlu1 %3857, %v5080_v40  }
 0x7de   :  { %v5097_v7 = vpop.permute.xlu1 %2394  ;;  %v5108_v29 = vpop.permute.xlu2 %2388  ;;  %v2275_v40 = vmul.f32 %v2206_v48, %v2143_v5  ;;  %v2134_v5 = vmul.f32 %v4841_v58, %v5055_v0 }
 0x7df   :  { %v5111_v35 = vmul.f32 %v5108_v29, %v2273_v1  ;;  %v3863_v48 = vpop.eup %3862 }
 0x7e0   :  { %v1640_v58 = vmul.f32 %v3863_v48, %v4855_v32  ;;  %vm1646_vm2 = vweird.f32 %v3863_v48  ;;  %v2155_v32 = vmul.f32 %v4897_v11, %v5023_v33 }
 0x7e1   :  { %6349 = vst [vmem:[#allocation33_spill] sm:$0xff] %v5111_v35  ;;  %2724 = vperm.xlu0 %3855, %v5111_v35   ;;  %v6255_v35 = vperm.slane %v5023_v33, 7  ;;  %vm1647_vm9 = vmor %vm1645_vm14, %vm1646_vm2 }
 0x7e4   :  { %2518 = vperm.xlu2 %3853, %v2513_v26  }
 0x7e5   :  { %2712 = vperm.xlu1 %3857, %v5095_v47   ;;  %v5116_v47 = vmul.f32 %v5106_v39, %v2272_v13  ;;  %v2147_v13 = vmul.f32 %v4878_v49, %v5023_v33 }
 0x7e6   :  { %v5123_v24 = vpop.permute.xlu1 %2407  ;;  %v5125_v1 = vpop.permute.xlu2 %2401 }
 0x7e7   :  { %6350 = vst [vmem:[#allocation34_spill] sm:$0xff] %v5116_v47  ;;  %v5128_v15 = vmul.f32 %v5123_v24, %v2276_v2  ;;  %v5134_v28 = vmul.f32 %v5125_v1, %v2275_v40  ;;  %v2279_v4 = vmul.f32 %v6255_v35, %v2147_v13  ;;  %v2209_v40 = vperm.slane %v5055_v0, 0  ;;  %v5161_v35 = vpop.permute.xlu0 %2446 }
 0x7e8   :  { %6351 = vst [vmem:[#allocation35_spill] sm:$0xff] %v5125_v1  ;;  %v2146_v2 = vmul.f32 %v4876_v37, %v5055_v0  ;;  %v2136_v37 = vmul.f32 %v4860_v3, %v5055_v0 }
 0x7e9   :  { %6352 = vst [vmem:[#allocation36_spill] sm:$0xff] %v5128_v15  ;;  %2733 = vperm.xlu0 %3855, %v5128_v15   ;;  %v6356_v15 = vperm.slane %v5023_v33, 0 }
 0x7ea   :  { %6353 = vst [vmem:[#allocation37_spill] sm:$0xff] %v5134_v28 }
 0x7eb   :  { %v2266_v13 = vmul.f32 %v6356_v15, %v2134_v5 }
 0x7ec   :  { %2531 = vperm.xlu2 %3853, %v2526_v54   ;;  %v2150_v54 = vmul.f32 %v4884_v22, %v5055_v0  ;;  %v1641_v22 = vmul.f32 %v3863_v48, %v1640_v58 }
 0x7ed   :  { %2721 = vperm.xlu1 %3857, %v5116_v47  }
 0x7ee   :  { %v1642_v3 = vmul.f32 0.5, %v1641_v22 }
 0x7f4   :  { %3856 = vset.pattern.permute.xlu2 %v6347_v51  ;;  %v6357_v51 = vperm.slane %v5023_v33, 1 }
 0x7f5   :  { %2730 = vperm.xlu1 %3857, %v5134_v28   ;;  %v2207_v28 = vperm.slane %v5023_v33, 6 }
 0x7f6   :  { %v5139_v26 = vpop.permute.xlu1 %2427  ;;  %v5167_v15 = vpop.permute.xlu2 %2420  ;;  %v2268_v1 = vmul.f32 %v6357_v51, %v2136_v37  ;;  %v2152_v51 = vmul.f32 %v4891_v45, %v5055_v0 }
 0x7f7   :  { %6354 = vst [vmem:[#allocation38_spill] sm:$0xff] %v5139_v26  ;;  %v5146_v49 = vmul.f32 %v5139_v26, %v2279_v4  ;;  %v5159_v4 = vmul.f32 %v5052_v62, %v2266_v13  ;;  %v2278_v47 = vmul.f32 %v2207_v28, %v2146_v2  ;;  %v2282_v26 = vmul.f32 %v2209_v40, %v2150_v54 }
 0x7f8   :  { %v5182_v2 = vmul.f32 %v5057_v8, %v2268_v1 }
 0x7f9   :  { %6355 = vst [vmem:[#allocation39_spill] sm:$0xff] %v5146_v49  ;;  %2742 = vperm.xlu0 %3855, %v5146_v49   ;;  %2703 = vperm.xlu2 %3856, %v5159_v4   ;;  %v5170_v5 = vmul.f32 %v5161_v35, %v2282_v26  ;;  %v5173_v13 = vmul.f32 %v5167_v15, %v2278_v47 }
 0x7fa   :  { %v2149_v49 = vmul.f32 %v4942_v44, %v5023_v33  ;;  %v2139_v47 = vmul.f32 %v4857_v19, %v5023_v33  ;;  %v1643_v44 = vsub.f32 1.5, %v1642_v3 }
 0x7fc   :  { %v2281_v26 = vmul.f32 %v2209_v40, %v2149_v49  ;;  %v2271_v37 = vmul.f32 %v2204_v56, %v2139_v47  ;;  %v1644_v1 = vmul.f32 %v3863_v48, %v1643_v44  ;;  %v2210_v49 = vperm.slane %v5055_v0, 1 }
 0x7fd   :  { %2739 = vperm.xlu1 %3857, %v5173_v13   ;;  %v2142_v56 = vmul.f32 %v4868_v55, %v5055_v0  ;;  %v6360_v55 = vperm.slane %v5023_v33, 4 }
 0x7fe   :  { %v5184_v54 = vpop.permute.xlu1 %2440  ;;  %v5198_v19 = vmul.f32 %v5083_v57, %v2271_v37  ;;  %v2284_v22 = vmul.f32 %v2210_v49, %v2152_v51  ;;  %v5205_v45 = vsel %vm1647_vm9, %v3863_v48, %v1644_v1  ;;  %v5207_v3 = vpop.permute.xlu2 %2433  ;;  %v2145_v51 = vmul.f32 %v4872_v46, %v5023_v33 }
 0x7ff   :  { %6358 = vst [vmem:[#allocation40_spill] sm:$0xff] %v5184_v54  ;;  %v5190_v58 = vmul.f32 %v5184_v54, %v2281_v26  ;;  %v2212_v26 = vperm.slane %v5055_v0, 3  ;;  %v2186_v47 = vmul.f32 %v4994_v23, %v5205_v45  ;;  %v2274_v37 = vmul.f32 %v6360_v55, %v2142_v56 }
 0x800   :  { %v6262_v48 = vperm.slane %v5205_v45, 2  ;;  %v2277_v55 = vmul.f32 %v2207_v28, %v2145_v51  ;;  %v2153_v46 = vmul.f32 %v4895_v50, %v5023_v33  ;;  %v6363_v50 = vperm.slane %v5023_v33, 7 }
 0x801   :  { %2751 = vperm.xlu0 %3855, %v5170_v5   ;;  %2709 = vperm.xlu2 %3856, %v5182_v2   ;;  %v2287_v1 = vmul.f32 %v2212_v26, %v2155_v32  ;;  %v5224_v11 = vmul.f32 %v5097_v7, %v2274_v37  ;;  %v2211_v32 = vperm.slane %v5055_v0, 2  ;;  %v2148_v37 = vmul.f32 %v4882_v63, %v5055_v0 }
 0x802   :  { %v2318_v23 = vmul.f32 %v6262_v48, %v2186_v47  ;;  %v5241_v47 = vmul.f32 %v4991_v60, %v2277_v55  ;;  %v2151_v55 = vmul.f32 %v4889_v52, %v5023_v33 }
 0x803   :  { %6361 = vst [vmem:[#allocation42_spill] sm:$0xff] %v5224_v11 }
 0x804   :  { %6362 = vst [vmem:[#allocation43_spill] sm:$0xff] %v5241_v47  ;;  %v2283_v63 = vmul.f32 %v2210_v49, %v2151_v55  ;;  %v2158_v49 = vmul.f32 %v4907_v42, %v5055_v0 }
 0x805   :  { %2748 = vperm.xlu1 %3857, %v5190_v58  }
 0x809   :  { %2718 = vperm.xlu2 %3856, %v5198_v19  }
 0x80e   :  { %v5200_v40 = vpop.permute.xlu1 %2459  ;;  %v5231_v56 = vpop.permute.xlu2 %2453 }
 0x80f   :  { %6359 = vst [vmem:[#allocation41_spill] sm:$0xff] %v5200_v40  ;;  %v5215_v44 = vmul.f32 %v5200_v40, %v2284_v22  ;;  %v5234_v40 = vmul.f32 %v5000_v25, %v2287_v1  ;;  %v2280_v1 = vmul.f32 %v6363_v50, %v2148_v37  ;;  %v2154_v37 = vmul.f32 %v5020_v12, %v5055_v0 }
 0x810   :  { %v2214_v12 = vperm.slane %v5055_v0, 5 }
 0x811   :  { %2757 = vperm.xlu1 %3857, %v5215_v44   ;;  %2727 = vperm.xlu2 %3856, %v5224_v11   ;;  %v5255_v48 = vmul.f32 %v5207_v3, %v2280_v1  ;;  %v2286_v55 = vmul.f32 %v2211_v32, %v2154_v37 }
 0x813   :  { %6364 = vst [vmem:[#allocation44_spill] sm:$0xff] %v5255_v48 }
 0x816   :  { %v2473_v54 = vpop.permute.xlu1 %2472  ;;  %v5246_v28 = vpop.permute.xlu2 %2466 }
 0x817   :  { %v5228_v22 = vmul.f32 %v2473_v54, %v2318_v23  ;;  %v2285_v23 = vmul.f32 %v2211_v32, %v2153_v46  ;;  %v2156_v46 = vmul.f32 %v4901_v31, %v5055_v0  ;;  %v2159_v31 = vmul.f32 %v4950_v14, %v5023_v33 }
 0x818   :  { %v2194_v32 = vmul.f32 %v5089_v10, %v5205_v45 }
 0x819   :  { %2766 = vperm.xlu1 %3857, %v5234_v40   ;;  %2736 = vperm.xlu2 %3856, %v5241_v47   ;;  %v5249_v51 = vmul.f32 %v5246_v28, %v2285_v23  ;;  %v5265_v23 = vmul.f32 %v5231_v56, %v2283_v63  ;;  %v2288_v50 = vmul.f32 %v2212_v26, %v2156_v46  ;;  %v2213_v63 = vperm.slane %v5055_v0, 4 }
 0x81a   :  { %v5283_v26 = vmul.f32 %v2473_v54, %v2286_v55  ;;  %v6270_v55 = vperm.slane %v5205_v45, 6  ;;  %v2196_v47 = vmul.f32 %v5039_v9, %v5205_v45 }
 0x81b   :  { %2760 = vperm.xlu0 %3855, %v5249_v51   ;;  %6365 = vst [vmem:[#allocation45_spill] sm:$0xff] %v5265_v23  ;;  %v2290_v14 = vmul.f32 %v2213_v63, %v2158_v49 }
 0x81c   :  { %6366 = vst [vmem:[#allocation46_spill] sm:$0xff] %v5283_v26  ;;  %v2326_v10 = vmul.f32 %v6270_v55, %v2194_v32  ;;  %v5321_v32 = vpop.permute.xlu0 %2511 }
 0x821   :  { %2745 = vperm.xlu2 %3856, %v5255_v48   ;;  %v3865_v48 = vpop.eup %3864 }
 0x822   :  { %v1630_v49 = vmul.f32 %v3865_v48, %v4847_v61  ;;  %vm1636_vm11 = vweird.f32 %v3865_v48 }
 0x823   :  { %vm1637_vm12 = vmor %vm1635_vm10, %vm1636_vm11 }
 0x826   :  { %v5262_v25 = vpop.permute.xlu1 %2492  ;;  %v5270_v1 = vpop.permute.xlu2 %2485 }
 0x827   :  { %v5273_v52 = vmul.f32 %v5270_v1, %v2288_v50  ;;  %v2157_v50 = vmul.f32 %v4903_v53, %v5023_v33  ;;  %v2162_v53 = vmul.f32 %v4917_v59, %v5055_v0 }
 0x829   :  { %2754 = vperm.xlu2 %3856, %v5265_v23   ;;  %2769 = vperm.xlu0 %3855, %v5273_v52   ;;  %v2291_v23 = vmul.f32 %v2214_v12, %v2159_v31  ;;  %v2289_v31 = vmul.f32 %v2213_v63, %v2157_v50  ;;  %v1631_v50 = vmul.f32 %v3865_v48, %v1630_v49 }
 0x82e   :  { %v5285_v46 = vpop.permute.xlu1 %2505  ;;  %v5290_v42 = vpop.permute.xlu2 %2498 }
 0x82f   :  { %6367 = vst [vmem:[#allocation47_spill] sm:$0xff] %v5290_v42  ;;  %v5295_v37 = vmul.f32 %v5285_v46, %v2291_v23  ;;  %v5298_v54 = vmul.f32 %v5290_v42, %v2290_v14  ;;  %v5309_v23 = vmul.f32 %v5262_v25, %v2289_v31  ;;  %v2215_v14 = vperm.slane %v5055_v0, 6 }
 0x830   :  { %v2161_v31 = vmul.f32 %v4913_v16, %v5023_v33 }
 0x831   :  { %2763 = vperm.xlu2 %3856, %v5283_v26   ;;  %6368 = vst [vmem:[#allocation48_spill] sm:$0xff] %v5295_v37  ;;  %2775 = vperm.xlu1 %3857, %v5298_v54   ;;  %v2160_v26 = vmul.f32 %v4909_v30, %v5055_v0  ;;  %v2294_v59 = vmul.f32 %v2215_v14, %v2162_v53  ;;  %v6272_v30 = vperm.slane %v5205_v45, 7  ;;  %v1632_v53 = vmul.f32 0.5, %v1631_v50 }
 0x832   :  { %2778 = vperm.xlu0 %3855, %v5295_v37  }
 0x833   :  { %v2292_v55 = vmul.f32 %v2214_v12, %v2160_v26  ;;  %v2328_v49 = vmul.f32 %v6272_v30, %v2196_v47  ;;  %v1633_v37 = vsub.f32 1.5, %v1632_v53  ;;  %v2164_v26 = vmul.f32 %v5035_v43, %v5055_v0 }
 0x834   :  { %v2216_v47 = vperm.slane %v5055_v0, 7 }
 0x835   :  { %v1634_v50 = vmul.f32 %v3865_v48, %v1633_v37 }
 0x837   :  { %v5347_v53 = vsel %vm1637_vm12, %v3865_v48, %v1634_v50 }
 0x838   :  { %v2167_v43 = vmul.f32 %v4933_v27, %v5347_v53  ;;  %v6273_v61 = vperm.slane %v5347_v53, 1  ;;  %v6279_v48 = vperm.slane %v5347_v53, 0 }
 0x839   :  { %2772 = vperm.xlu2 %3856, %v5309_v23  }
 0x83a   :  { %v2299_v27 = vmul.f32 %v6273_v61, %v2167_v43 }
 0x83e   :  { %v2525_v42 = vpop.permute.xlu1 %2524  ;;  %v5335_v16 = vpop.permute.xlu2 %2518 }
 0x83f   :  { %v5314_v63 = vmul.f32 %v2525_v42, %v2326_v10  ;;  %v5319_v11 = vmul.f32 %v2525_v42, %v2294_v59  ;;  %v5328_v10 = vmul.f32 %v5321_v32, %v2292_v55  ;;  %v2293_v59 = vmul.f32 %v2215_v14, %v2161_v31  ;;  %6372 = vst [vmem:[#allocation52_spill] sm:$0xff] %v5335_v16 }
 0x840   :  { %v2163_v55 = vmul.f32 %v4921_v41, %v5023_v33  ;;  %v2296_v14 = vmul.f32 %v2216_v47, %v2164_v26  ;;  %v2166_v33 = vmul.f32 %v4929_v38, %v5205_v45  ;;  %v5369_v26 = vmul.f32 %v4983_v18, %v2299_v27 }
 0x841   :  { %6369 = vst [vmem:[#allocation49_spill] sm:$0xff] %v5314_v63  ;;  %2787 = vperm.xlu0 %3855, %v5319_v11   ;;  %2781 = vperm.xlu2 %3856, %v5328_v10   ;;  %v5338_v12 = vmul.f32 %v5335_v16, %v2293_v59 }
 0x842   :  { %6370 = vst [vmem:[#allocation50_spill] sm:$0xff] %v5328_v10  ;;  %v2295_v31 = vmul.f32 %v2216_v47, %v2163_v55  ;;  %v2298_v37 = vmul.f32 %v6279_v48, %v2166_v33 }
 0x843   :  { %2784 = vperm.xlu1 %3857, %v5338_v12   ;;  %6373 = vst [vmem:[#allocation53_spill] sm:$0xff] %v5369_v26 }
 0x844   :  { %v5372_v38 = vmul.f32 %v5052_v62, %v2298_v37  ;;  %v2219_v62 = vperm.slane %v5347_v53, 2 }
 0x846   :  { %v2538_v9 = vpop.permute.xlu1 %2537  ;;  %6374 = vst [vmem:[#allocation54_spill] sm:$0xff] %v5372_v38 }
 0x847   :  { %v5332_v42 = vmul.f32 %v2538_v9, %v2328_v49  ;;  %v5349_v49 = vpop.permute.xlu2 %2531  ;;  %v5353_v59 = vmul.f32 %v2538_v9, %v2296_v14  ;;  %v2701_v9 = vpop.permute.xlu0 %2700  ;;  %v2169_v14 = vmul.f32 %v4958_v34, %v5347_v53 }
 0x848   :  { %v5356_v41 = vmul.f32 %v5349_v49, %v2295_v31  ;;  %v2891_v47 = vperm.slane %v2701_v9, %v3946_v6  ;;  %v2170_v31 = vmul.f32 %v4940_v20, %v5205_v45  ;;  %v6375_v9 = vld [vmem:[#allocation5_spill] sm:$0xff] }
 0x849   :  { %6371 = vst [vmem:[#allocation51_spill] sm:$0xff] %v5332_v42  ;;  %v2301_v33 = vmul.f32 %v2219_v62, %v2169_v14  ;;  %v6277_v14 = vperm.slane %v5347_v53, 3 }
 0x84a   :  { %2790 = vperm.xlu2 %3856, %v5356_v41   ;;  %v2302_v27 = vmul.f32 %v2219_v62, %v2170_v31  ;;  %v6378_v31 = vld [vmem:[#allocation6_spill] sm:$0xff] }
 0x84b   :  { %2793 = vperm.xlu1 %3857, %v5353_v59   ;;  %v5387_v34 = vmul.f32 %v5060_v17, %v2301_v33  ;;  %v2173_v62 = vmul.f32 %v6378_v31, %v5347_v53  ;;  %v6276_v17 = vperm.slane %v5347_v53, 4 }
 0x84c   :  { %v5390_v20 = vmul.f32 %v5074_v36, %v2302_v27 }
 0x84d   :  { %6376 = vst [vmem:[#allocation5_spill] sm:$0xff] %v5387_v34  ;;  %v2305_v27 = vmul.f32 %v6276_v17, %v2173_v62 }
 0x84e   :  { %6377 = vst [vmem:[#allocation55_spill] sm:$0xff] %v5390_v20 }
 0x84f   :  { %v2707_v0 = vpop.permute.xlu1 %2706  ;;  %v2716_v37 = vpop.permute.xlu0 %2715 }
 0x852   :  { %2799 = vperm.xlu2 %3856, %v5372_v38  }
 0x853   :  { %v2704_v55 = vpop.permute.xlu2 %2703  ;;  %2802 = vperm.xlu1 %3857, %v5369_v26  }
 0x854   :  { %v2893_v50 = vperm.slane %v2704_v55, %v4016_v21  ;;  %v2172_v55 = vmul.f32 %v6375_v9, %v5205_v45  ;;  %v2900_v9 = vperm.slane %v2716_v37, %v4016_v21 }
 0x856   :  { %v2895_v18 = vsel %vm122_vm3, %v2893_v50, %v2891_v47  ;;  %v2896_v47 = vperm.slane %v2707_v0, %v3946_v6  ;;  %v2304_v0 = vmul.f32 %v6277_v14, %v2172_v55  ;;  %v6382_v55 = vld [vmem:[#allocation7_spill] sm:$0xff] }
 0x857   :  { %v2713_v43 = vpop.permute.xlu1 %2712 }
 0x858   :  { %v2899_v30 = vperm.slane %v2713_v43, %v3946_v6  ;;  %v5413_v37 = vmul.f32 %v5106_v39, %v2304_v0  ;;  %v6386_v0 = vld [vmem:[#allocation10_spill] sm:$0xff] }
 0x85a   :  { %2808 = vperm.xlu2 %3856, %v5387_v34   ;;  %6379 = vst [vmem:[#allocation6_spill] sm:$0xff] %v5413_v37 }
 0x85b   :  { %v2710_v61 = vpop.permute.xlu2 %2709  ;;  %2811 = vperm.xlu1 %3857, %v5390_v20  }
 0x85c   :  { %v2897_v50 = vperm.slane %v2710_v61, %v4016_v21  ;;  %v2901_v61 = vsel %vm122_vm3, %v2900_v9, %v2899_v30  ;;  %v2175_v30 = vmul.f32 %v6382_v55, %v5347_v53 }
 0x85e   :  { %v2898_v36 = vsel %vm122_vm3, %v2897_v50, %v2896_v47  ;;  %v5416_v47 = vmul.f32 %v5108_v29, %v2305_v27  ;;  %v6381_v50 = vld [vmem:[#allocation8_spill] sm:$0xff] }
 0x85f   :  { %v2990_v43 = vsel %vm127_vm15, %v2898_v36, %v2895_v18  ;;  %v2176_v31 = vmul.f32 %v6381_v50, %v5205_v45  ;;  %v2222_v18 = vperm.slane %v5347_v53, 5  ;;  %v6384_v36 = vld [vmem:[#allocation35_spill] sm:$0xff]  ;;  %v6274_v50 = vperm.slane %v5347_v53, 7 }
 0x860   :  { %v5408_v33 = vsel %vm128_vm0, %v2901_v61, %v2990_v43  ;;  %6380 = vst [vmem:[#allocation56_spill] sm:$0xff] %v5416_v47  ;;  %v2179_v61 = vmul.f32 %v6386_v0, %v5347_v53  ;;  %v6387_v43 = vld [vmem:[#allocation11_spill] sm:$0xff] }
 0x861   :  { %v2308_v9 = vmul.f32 %v2222_v18, %v2176_v31  ;;  %v2307_v62 = vmul.f32 %v2222_v18, %v2175_v30  ;;  %v2178_v27 = vmul.f32 %v6387_v43, %v5205_v45  ;;  %v6275_v31 = vperm.slane %v5347_v53, 6  ;;  %v6388_v18 = vld [vmem:[#allocation15_spill] sm:$0xff] }
 0x862   :  { %2817 = vperm.xlu2 %3856, %v5413_v37   ;;  %v6278_v43 = vperm.slane %v5205_v45, 0 }
 0x863   :  { %2820 = vperm.xlu1 %3857, %v5416_v47   ;;  %v5426_v39 = vmul.f32 %v5123_v24, %v2308_v9  ;;  %v5429_v29 = vmul.f32 %v6384_v36, %v2307_v62  ;;  %v5439_v55 = vpop.permute.xlu2 %2718  ;;  %v2311_v24 = vmul.f32 %v6274_v50, %v2179_v61  ;;  %v2310_v30 = vmul.f32 %v6275_v31, %v2178_v27  ;;  %v6389_v62 = vld [vmem:[#allocation38_spill] sm:$0xff]  ;;  %v2722_v50 = vpop.permute.xlu1 %2721 }
 0x864   :  { %v2182_v9 = vmul.f32 %v6388_v18, %v5205_v45  ;;  %v2725_v27 = vpop.permute.xlu0 %2724  ;;  %v2903_v26 = vperm.slane %v2722_v50, %v4016_v21 }
 0x865   :  { %6383 = vst [vmem:[#allocation8_spill] sm:$0xff] %v5426_v39  ;;  %v5448_v36 = vmul.f32 %v6389_v62, %v2311_v24  ;;  %v5451_v0 = vmul.f32 %v5167_v15, %v2310_v30  ;;  %v6393_v24 = vld [vmem:[#allocation17_spill] sm:$0xff]  ;;  %v6394_v15 = vperm.slane %v5205_v45, 2 }
 0x866   :  { %6385 = vst [vmem:[#allocation7_spill] sm:$0xff] %v5429_v29  ;;  %v2314_v61 = vmul.f32 %v6278_v43, %v2182_v9  ;;  %v2185_v62 = vmul.f32 %v6393_v24, %v5347_v53  ;;  %v6283_v24 = vperm.slane %v5205_v45, 3 }
 0x867   :  { %6390 = vst [vmem:[#allocation35_spill] sm:$0xff] %v5448_v36 }
 0x868   :  { %6391 = vst [vmem:[#allocation10_spill] sm:$0xff] %v5451_v0  ;;  %v5459_v18 = vmul.f32 %v5161_v35, %v2314_v61  ;;  %v2317_v30 = vmul.f32 %v6394_v15, %v2185_v62  ;;  %v6396_v35 = vld [vmem:[#allocation20_spill] sm:$0xff] }
 0x869   :  { %v2188_v61 = vmul.f32 %v6396_v35, %v5205_v45  ;;  %v6291_v35 = vperm.slane %v5205_v45, 5 }
 0x86a   :  { %2826 = vperm.xlu2 %3856, %v5429_v29   ;;  %6392 = vst [vmem:[#allocation11_spill] sm:$0xff] %v5459_v18  ;;  %v5471_v9 = vmul.f32 %v5246_v28, %v2317_v30  ;;  %v6398_v28 = vld [vmem:[#allocation22_spill] sm:$0xff] }
 0x86b   :  { %2829 = vperm.xlu1 %3857, %v5426_v39   ;;  %v2728_v31 = vpop.permute.xlu2 %2727  ;;  %v5466_v17 = vpop.permute.xlu1 %2730  ;;  %v2320_v48 = vmul.f32 %v6283_v24, %v2188_v61  ;;  %v2191_v30 = vmul.f32 %v6398_v28, %v5347_v53 }
 0x86c   :  { %v5468_v14 = vpop.permute.xlu0 %2733  ;;  %6395 = vst [vmem:[#allocation15_spill] sm:$0xff] %v5471_v9 }
 0x86d   :  { %v5484_v15 = vmul.f32 %v5270_v1, %v2320_v48 }
 0x86f   :  { %6397 = vst [vmem:[#allocation38_spill] sm:$0xff] %v5484_v15 }
 0x872   :  { %2835 = vperm.xlu2 %3856, %v5451_v0  }
 0x873   :  { %2838 = vperm.xlu1 %3857, %v5448_v36   ;;  %v5473_v43 = vpop.permute.xlu2 %2736  ;;  %v5481_v62 = vpop.permute.xlu1 %2739 }
 0x874   :  { %v5486_v0 = vpop.permute.xlu0 %2742 }
 0x87b   :  { %2847 = vperm.xlu1 %3857, %v5459_v18   ;;  %v5490_v18 = vpop.permute.xlu2 %2745  ;;  %v2749_v24 = vpop.permute.xlu1 %2748 }
 0x87c   :  { %v2752_v1 = vpop.permute.xlu0 %2751  ;;  %v2917_v38 = vperm.slane %v2749_v24, %v3946_v6 }
 0x883   :  { %2856 = vperm.xlu1 %3857, %v5471_v9   ;;  %v2323_v9 = vmul.f32 %v6291_v35, %v2191_v30  ;;  %v2755_v48 = vpop.permute.xlu2 %2754  ;;  %v2758_v29 = vpop.permute.xlu1 %2757 }
 0x884   :  { %v2920_v30 = vperm.slane %v2755_v48, %v3946_v6 }
 0x885   :  { %v5497_v61 = vmul.f32 %v5285_v46, %v2323_v9  ;;  %v2902_v46 = vperm.slane %v5439_v55, %v3946_v6  ;;  %v2905_v55 = vperm.slane %v2725_v27, %v3946_v6 }
 0x887   :  { %6399 = vst [vmem:[#allocation17_spill] sm:$0xff] %v5497_v61 }
 0x88b   :  { %2865 = vperm.xlu1 %3857, %v5484_v15   ;;  %v2764_v36 = vpop.permute.xlu2 %2763  ;;  %v2767_v15 = vpop.permute.xlu1 %2766 }
 0x88c   :  { %v2924_v42 = vperm.slane %v2764_v36, %v4016_v21 }
 0x88d   :  { %v2761_v28 = vpop.permute.xlu0 %2760 }
 0x88e   :  { %v2923_v9 = vperm.slane %v2761_v28, %v3946_v6  ;;  %v2918_v28 = vperm.slane %v2752_v1, %v4016_v21 }
 0x890   :  { %v2925_v50 = vsel %vm122_vm3, %v2924_v42, %v2923_v9  ;;  %v2919_v24 = vsel %vm122_vm3, %v2918_v28, %v2917_v38  ;;  %v2915_v38 = vperm.slane %v5490_v18, %v4016_v21 }
 0x893   :  { %2874 = vperm.xlu1 %3857, %v5497_v61   ;;  %v2773_v39 = vpop.permute.xlu2 %2772  ;;  %v2906_v61 = vperm.slane %v2728_v31, %v4016_v21  ;;  %v2926_v31 = vperm.slane %v2767_v15, %v3946_v6  ;;  %v2911_v15 = vperm.slane %v5473_v43, %v3946_v6 }
 0x894   :  { %v2929_v36 = vperm.slane %v2773_v39, %v3946_v6  ;;  %v2908_v39 = vperm.slane %v5466_v17, %v3946_v6  ;;  %v2914_v17 = vperm.slane %v5486_v0, %v3946_v6 }
 0x89b   :  { %2883 = vperm.xlu1 %3857, %v5314_v63   ;;  %v2770_v37 = vpop.permute.xlu0 %2769  ;;  %v2782_v35 = vpop.permute.xlu2 %2781  ;;  %v2921_v63 = vperm.slane %v2758_v29, %v4016_v21  ;;  %v2909_v29 = vperm.slane %v5468_v14, %v4016_v21 }
 0x89c   :  { %v2927_v20 = vperm.slane %v2770_v37, %v4016_v21  ;;  %v2904_v37 = vsel %vm122_vm3, %v2903_v26, %v2902_v46 }
 0x89d   :  { %v2922_v10 = vsel %vm122_vm3, %v2921_v63, %v2920_v30 }
 0x89e   :  { %v2928_v27 = vsel %vm122_vm3, %v2927_v20, %v2926_v31  ;;  %v3003_v14 = vsel %vm127_vm15, %v2922_v10, %v2919_v24  ;;  %v2912_v10 = vperm.slane %v5481_v62, %v4016_v21  ;;  %v2910_v62 = vsel %vm122_vm3, %v2909_v29, %v2908_v39 }
 0x89f   :  { %v3004_v20 = vsel %vm128_vm0, %v2925_v50, %v3003_v14  ;;  %v6401_v14 = vperm.slane %v5347_v53, 0 }
 0x8a0   :  { %v3005_v43 = vsel %vm130_vm1, %v2928_v27, %v3004_v20  ;;  %v2913_v9 = vsel %vm122_vm3, %v2912_v10, %v2911_v15  ;;  %v6403_v20 = vld [vmem:[#allocation3_spill] sm:$0xff] }
 0x8a3   :  { %v2776_v34 = vpop.permute.xlu1 %2775 }
 0x8a4   :  { %v2779_v47 = vpop.permute.xlu0 %2778  ;;  %v2930_v48 = vperm.slane %v2776_v34, %v4016_v21  ;;  %v2907_v34 = vsel %vm122_vm3, %v2906_v61, %v2905_v55  ;;  %v2994_v61 = vsel %vm130_vm1, %v2904_v37, %v5408_v33  ;;  %v2791_v30 = vpop.permute.xlu2 %2790  ;;  %v2916_v55 = vsel %vm122_vm3, %v2915_v38, %v2914_v17 }
 0x8a5   :  { %v2932_v1 = vperm.slane %v2779_v47, %v3946_v6  ;;  %v2933_v47 = vperm.slane %v2782_v35, %v4016_v21  ;;  %v2996_v18 = vsel %vm132_vm5, %v2907_v34, %v2994_v61  ;;  %v2938_v28 = vperm.slane %v2791_v30, %v3946_v6  ;;  %v6405_v30 = vld [vmem:[#allocation4_spill] sm:$0xff] }
 0x8a6   :  { %v2931_v26 = vsel %vm122_vm3, %v2930_v48, %v2929_v36  ;;  %v2998_v37 = vsel %vm134_vm6, %v2910_v62, %v2996_v18  ;;  %v6404_v61 = vperm.slane %v5347_v53, 1  ;;  %v6406_v18 = vperm.slane %v5347_v53, 3 }
 0x8a7   :  { %v3006_v46 = vsel %vm132_vm5, %v2931_v26, %v3005_v43  ;;  %v2934_v35 = vsel %vm122_vm3, %v2933_v47, %v2932_v1  ;;  %v3000_v34 = vsel %vm136_vm7, %v2913_v9, %v2998_v37  ;;  %v2168_v47 = vmul.f32 %v6403_v20, %v5205_v45  ;;  %v6407_v9 = vld [vmem:[#allocation28_spill] sm:$0xff] }
 0x8a8   :  { %v3007_v0 = vsel %vm134_vm6, %v2934_v35, %v3006_v46  ;;  %v3002_v29 = vsel %vm138_vm8, %v2916_v55, %v3000_v34  ;;  %v6409_v55 = vld [vmem:[#allocation9_spill] sm:$0xff]  ;;  %v6300_v20 = vperm.slane %v5205_v45, 4 }
 0x8a9   :  { %v3028_v1 = vsel %vm184_vm4, %v3002_v29, 0.0  ;;  %v2300_v10 = vmul.f32 %v6404_v61, %v2168_v47 }
 0x8ab   :  { %v5577_v43 = vmul.f32 %v5057_v8, %v2300_v10  ;;  %v6415_v10 = vld [vmem:[#allocation23_spill] sm:$0xff] }
 0x8b3   :  { %v2788_v63 = vpop.permute.xlu0 %2787 }
 0x8b5   :  { %v2785_v16 = vpop.permute.xlu1 %2784 }
 0x8b6   :  { %v2935_v42 = vperm.slane %v2785_v16, %v3946_v6  ;;  %v2936_v16 = vperm.slane %v2788_v63, %v4016_v21  ;;  %v6400_v63 = vld [vmem:[#allocation2_spill] sm:$0xff] }
 0x8b7   :  { %v2165_v15 = vmul.f32 %v6400_v63, %v5347_v53 }
 0x8b8   :  { %v2937_v33 = vsel %vm122_vm3, %v2936_v16, %v2935_v42  ;;  %v6402_v42 = vld [vmem:[#allocation26_spill] sm:$0xff]  ;;  %v2171_v16 = vmul.f32 %v6405_v30, %v5347_v53 }
 0x8b9   :  { %v3008_v36 = vsel %vm136_vm7, %v2937_v33, %v3007_v0  ;;  %v2297_v26 = vmul.f32 %v6401_v14, %v2165_v15  ;;  %v2174_v33 = vmul.f32 %v6407_v9, %v5205_v45 }
 0x8ba   :  { %v2303_v46 = vmul.f32 %v6406_v18, %v2171_v16  ;;  %v6416_v16 = vperm.slane %v5205_v45, 5 }
 0x8bb   :  { %v5567_v39 = vmul.f32 %v6402_v42, %v2297_v26 }
 0x8bc   :  { %v5587_v35 = vmul.f32 %v5083_v57, %v2303_v46  ;;  %v6410_v57 = vperm.slane %v5347_v53, 6 }
 0x8bd   :  { %v2794_v48 = vpop.permute.xlu1 %2793 }
 0x8be   :  { %v2939_v31 = vperm.slane %v2794_v48, %v4016_v21  ;;  %v6408_v48 = vperm.slane %v5347_v53, 4 }
 0x8c0   :  { %v2940_v50 = vsel %vm122_vm3, %v2939_v31, %v2938_v28  ;;  %v2306_v62 = vmul.f32 %v6408_v48, %v2174_v33  ;;  %v2177_v28 = vmul.f32 %v6409_v55, %v5347_v53  ;;  %v6417_v33 = vld [vmem:[#allocation25_spill] sm:$0xff] }
 0x8c1   :  { %v3009_v24 = vsel %vm138_vm8, %v2940_v50, %v3008_v36  ;;  %v6411_v36 = vld [vmem:[#allocation12_spill] sm:$0xff]  ;;  %v2195_v48 = vmul.f32 %v6417_v33, %v5347_v53 }
 0x8c2   :  { %v3031_v27 = vsel %vm184_vm4, %v3009_v24, 0.0  ;;  %v5599_v31 = vmul.f32 %v5097_v7, %v2306_v62  ;;  %v2309_v0 = vmul.f32 %v6410_v57, %v2177_v28  ;;  %v2180_v34 = vmul.f32 %v6411_v36, %v5205_v45 }
 0x8c3   :  { %3032 = vadd.xlane.f32.xlu0 %v3031_v27  ;;  %v6412_v24 = vperm.slane %v5347_v53, 7  ;;  %v6418_v62 = vperm.slane %v5205_v45, 7 }
 0x8c4   :  { %v5607_v50 = vmul.f32 %v4991_v60, %v2309_v0  ;;  %v6301_v60 = vperm.slane %v5205_v45, 1 }
 0x8c5   :  { %3029 = vadd.xlane.f32.xlu1 %v3028_v1  ;;  %v5569_v38 = vpop.permute.xlu1 %2802  ;;  %v2312_v29 = vmul.f32 %v6412_v24, %v2180_v34  ;;  %v6413_v1 = vld [vmem:[#allocation16_spill] sm:$0xff]  ;;  %v2327_v55 = vmul.f32 %v6418_v62, %v2195_v48 }
 0x8c6   :  { %v2183_v63 = vmul.f32 %v6413_v1, %v5347_v53 }
 0x8c7   :  { %v5615_v7 = vmul.f32 %v5207_v3, %v2312_v29  ;;  %v6414_v3 = vld [vmem:[#allocation13_spill] sm:$0xff]  ;;  %v2800_v29 = vpop.permute.xlu2 %2799 }
 0x8c8   :  { %v2315_v15 = vmul.f32 %v6301_v60, %v2183_v63  ;;  %v2189_v42 = vmul.f32 %v6414_v3, %v5347_v53 }
 0x8ca   :  { %v5626_v14 = vmul.f32 %v5231_v56, %v2315_v15  ;;  %v2321_v61 = vmul.f32 %v6300_v20, %v2189_v42  ;;  %v2192_v56 = vmul.f32 %v6415_v10, %v5205_v45 }
 0x8cc   :  { %v5642_v30 = vmul.f32 %v5262_v25, %v2321_v61  ;;  %v2324_v18 = vmul.f32 %v6416_v16, %v2192_v56  ;;  %v5658_v25 = vmul.f32 %v5349_v49, %v2327_v55 }
 0x8cd   :  { %v5582_v17 = vpop.permute.xlu1 %2811 }
 0x8ce   :  { %v5650_v9 = vmul.f32 %v5321_v32, %v2324_v18  ;;  %v2948_v48 = vperm.slane %v5582_v17, %v4016_v21 }
 0x8cf   :  { %v2809_v18 = vpop.permute.xlu2 %2808 }
 0x8d5   :  { %v5592_v8 = vpop.permute.xlu1 %2820 }
 0x8d7   :  { %2796 = vperm.xlu0 %3855, %v5567_v39  }
 0x8dd   :  { %v5604_v37 = vpop.permute.xlu1 %2829 }
 0x8df   :  { %2805 = vperm.xlu0 %3855, %v5577_v43  }
 0x8e5   :  { %v5617_v27 = vpop.permute.xlu1 %2838 }
 0x8e7   :  { %2814 = vperm.xlu0 %3855, %v5587_v35  }
 0x8ed   :  { %v5629_v26 = vpop.permute.xlu1 %2847 }
 0x8ef   :  { %2823 = vperm.xlu0 %3855, %v5599_v31  }
 0x8f5   :  { %v5635_v47 = vpop.permute.xlu1 %2856 }
 0x8f7   :  { %2832 = vperm.xlu0 %3855, %v5607_v50  }
 0x8fd   :  { %v5647_v46 = vpop.permute.xlu1 %2865 }
 0x8ff   :  { %2841 = vperm.xlu0 %3855, %v5615_v7  }
 0x905   :  { %v5660_v28 = vpop.permute.xlu1 %2874 }
 0x907   :  { %2850 = vperm.xlu0 %3855, %v5626_v14  }
 0x90d   :  { %v5663_v57 = vpop.permute.xlu1 %2883 }
 0x90f   :  { %2859 = vperm.xlu0 %3855, %v5228_v22  }
 0x917   :  { %2868 = vperm.xlu0 %3855, %v5642_v30  }
 0x91f   :  { %2877 = vperm.xlu0 %3855, %v5650_v9  }
 0x927   :  { %2886 = vperm.xlu0 %3855, %v5658_v25  }
 0x936   :  { %v3033_v0 = vpop.xlane.xlu0 %3032 }
 0x937   :  { %3866 = vrsqrt.f32 %v3033_v0  ;;  %vm3056_vm14 = vweird.f32 %v3033_v0 }
 0x938   :  { %v3030_v32 = vpop.xlane.xlu1 %3029 }
 0x939   :  { %3868 = vrsqrt.f32 %v3030_v32  ;;  %vm3046_vm10 = vweird.f32 %v3030_v32 }
 0x93d   :  { %v3867_v36 = vpop.eup %3866 }
 0x93e   :  { %v3051_v34 = vmul.f32 %v3867_v36, %v3033_v0  ;;  %vm3057_vm13 = vweird.f32 %v3867_v36 }
 0x93f   :  { %v3869_v24 = vpop.eup %3868  ;;  %vm3058_vm9 = vmor %vm3056_vm14, %vm3057_vm13 }
 0x940   :  { %v3052_v1 = vmul.f32 %v3867_v36, %v3051_v34  ;;  %v3041_v63 = vmul.f32 %v3869_v24, %v3030_v32  ;;  %vm3047_vm2 = vweird.f32 %v3869_v24  ;;  %v2947_v34 = vperm.slane %v2809_v18, %v3946_v6 }
 0x941   :  { %vm3048_vm11 = vmor %vm3046_vm10, %vm3047_vm2  ;;  %v2942_v32 = vperm.slane %v2800_v29, %v4016_v21 }
 0x942   :  { %v3053_v15 = vmul.f32 0.5, %v3052_v1  ;;  %v3042_v3 = vmul.f32 %v3869_v24, %v3041_v63  ;;  %v2944_v63 = vperm.slane %v5569_v38, %v3946_v6 }
 0x944   :  { %v3054_v49 = vsub.f32 1.5, %v3053_v15  ;;  %v3043_v42 = vmul.f32 0.5, %v3042_v3  ;;  %v2949_v15 = vsel %vm122_vm3, %v2948_v48, %v2947_v34  ;;  %v6420_v34 = vld [vmem:[#allocation34_spill] sm:$0xff] }
 0x946   :  { %v3055_v61 = vmul.f32 %v3867_v36, %v3054_v49  ;;  %v3044_v10 = vsub.f32 1.5, %v3043_v42 }
 0x948   :  { %v5665_v56 = vsel %vm3058_vm9, %v3867_v36, %v3055_v61  ;;  %v3045_v16 = vmul.f32 %v3869_v24, %v3044_v10 }
 0x949   :  { %v2797_v33 = vpop.permute.xlu0 %2796  ;;  %v3081_v55 = vmul.f32 %v5665_v56, %v5159_v4  ;;  %v3160_v49 = vperm.slane %v5665_v56, 4  ;;  %v3083_v38 = vmul.f32 %v5665_v56, %v5182_v2  ;;  %v6303_v42 = vperm.slane %v5665_v56, 1 }
 0x94a   :  { %v5669_v62 = vsel %vm3048_vm11, %v3869_v24, %v3045_v16  ;;  %v2941_v36 = vperm.slane %v2797_v33, %v3946_v6  ;;  %v3163_v18 = vperm.slane %v5665_v56, 7 }
 0x94b   :  { %v3148_v0 = vperm.slane %v5669_v62, 0  ;;  %v3149_v17 = vperm.slane %v5669_v62, 1  ;;  %v3086_v4 = vmul.f32 %v5669_v62, %v5198_v19  ;;  %v3151_v24 = vperm.slane %v5669_v62, 3 }
 0x94c   :  { %v3104_v3 = vmul.f32 %v5669_v62, %v5309_v23  ;;  %v2943_v29 = vsel %vm122_vm3, %v2942_v32, %v2941_v36  ;;  %v3110_v61 = vmul.f32 %v5669_v62, %v5356_v41  ;;  %v6305_v19 = vperm.slane %v5669_v62, 4  ;;  %v6419_v23 = vld [vmem:[#allocation27_spill] sm:$0xff] }
 0x94d   :  { %v3213_v1 = vmul.f32 %v3148_v0, %v3081_v55  ;;  %v3080_v33 = vmul.f32 %v5669_v62, %v6419_v23  ;;  %v3215_v55 = vmul.f32 %v3149_v17, %v3083_v38  ;;  %v6302_v2 = vperm.slane %v5669_v62, 6 }
 0x94e   :  { %v5694_v16 = vmul.f32 %v3160_v49, %v3104_v3  ;;  %v3087_v36 = vmul.f32 %v5665_v56, %v6420_v34  ;;  %v5704_v32 = vmul.f32 %v3163_v18, %v3110_v61  ;;  %v6304_v60 = vperm.slane %v5669_v62, 2 }
 0x94f   :  { %3344 = vperm.xlu0 %3855, %v3213_v1   ;;  %v3218_v1 = vmul.f32 %v3151_v24, %v3086_v4  ;;  %v5706_v3 = vmul.f32 %v3148_v0, %v3080_v33  ;;  %v3093_v38 = vmul.f32 %v5665_v56, %v5173_v13  ;;  %v3096_v4 = vmul.f32 %v5669_v62, %v5190_v58  ;;  %v2818_v0 = vpop.permute.xlu2 %2817 }
 0x950   :  { %v5710_v23 = vmul.f32 %v3151_v24, %v3087_v36  ;;  %v3156_v61 = vperm.slane %v5665_v56, 0  ;;  %v3099_v24 = vmul.f32 %v5665_v56, %v5215_v44  ;;  %v3102_v13 = vmul.f32 %v5669_v62, %v5234_v40 }
 0x951   :  { %v2806_v10 = vpop.permute.xlu0 %2805  ;;  %v3159_v58 = vperm.slane %v5665_v56, 3  ;;  %v3162_v44 = vperm.slane %v5665_v56, 6  ;;  %v3111_v40 = vmul.f32 %v5665_v56, %v5353_v59 }
 0x952   :  { %v2945_v48 = vperm.slane %v2806_v10, %v4016_v21 }
 0x953   :  { %v5755_v34 = vmul.f32 %v3163_v18, %v3111_v40  ;;  %v3100_v18 = vmul.f32 %v5669_v62, %v5249_v51  ;;  %v3103_v40 = vmul.f32 %v5665_v56, %v5273_v52  ;;  %v3109_v52 = vmul.f32 %v5665_v56, %v5319_v11 }
 0x954   :  { %v2946_v20 = vsel %vm122_vm3, %v2945_v48, %v2944_v63  ;;  %v5722_v63 = vmul.f32 %v6302_v2, %v3093_v38  ;;  %v5737_v48 = vmul.f32 %v6303_v42, %v3099_v24  ;;  %v6423_v2 = vld [vmem:[#allocation33_spill] sm:$0xff]  ;;  %v3158_v42 = vperm.slane %v5665_v56, 2 }
 0x955   :  { %v3010_v10 = vsel %vm127_vm15, %v2946_v20, %v2943_v29  ;;  %v5728_v20 = vmul.f32 %v3156_v61, %v3096_v4  ;;  %v3105_v29 = vmul.f32 %v5665_v56, %v5298_v54  ;;  %v6422_v54 = vld [vmem:[#allocation30_spill] sm:$0xff]  ;;  %v3088_v24 = vmul.f32 %v5669_v62, %v6423_v2  ;;  %v6425_v2 = vld [vmem:[#allocation39_spill] sm:$0xff] }
 0x956   :  { %v3011_v33 = vsel %vm128_vm0, %v2949_v15, %v3010_v10  ;;  %v3108_v15 = vmul.f32 %v5669_v62, %v5338_v12  ;;  %v5744_v10 = vmul.f32 %v3159_v58, %v3102_v13  ;;  %v3085_v12 = vmul.f32 %v5665_v56, %v6422_v54 }
 0x957   :  { %3350 = vperm.xlu0 %3855, %v3215_v55   ;;  %v6421_v55 = vld [vmem:[#allocation31_spill] sm:$0xff]  ;;  %v5746_v4 = vmul.f32 %v3160_v49, %v3105_v29  ;;  %v5765_v49 = vmul.f32 %v6305_v19, %v3088_v24  ;;  %v6424_v29 = vld [vmem:[#allocation36_spill] sm:$0xff]  ;;  %v3094_v54 = vmul.f32 %v5669_v62, %v6425_v2  ;;  %v5793_v51 = vmul.f32 %v3159_v58, %v3103_v40 }
 0x958   :  { %v3082_v36 = vmul.f32 %v5669_v62, %v6421_v55  ;;  %v5753_v41 = vmul.f32 %v3162_v44, %v3108_v15  ;;  %v5761_v13 = vmul.f32 %v6304_v60, %v3085_v12  ;;  %v3091_v55 = vmul.f32 %v5665_v56, %v6424_v29  ;;  %v6428_v60 = vld [vmem:[#allocation48_spill] sm:$0xff] }
 0x959   :  { %v2815_v38 = vpop.permute.xlu0 %2814  ;;  %v6426_v12 = vperm.slane %v5669_v62, 5  ;;  %v6427_v29 = vperm.slane %v5669_v62, 7  ;;  %v3106_v19 = vmul.f32 %v5669_v62, %v6428_v60  ;;  %v5791_v15 = vmul.f32 %v3158_v42, %v3100_v18 }
 0x95a   :  { %v5757_v59 = vmul.f32 %v3149_v17, %v3082_v36  ;;  %v3097_v17 = vmul.f32 %v5665_v56, %v5170_v5  ;;  %v2950_v36 = vperm.slane %v2815_v38, %v3946_v6  ;;  %v2951_v38 = vperm.slane %v2818_v0, %v4016_v21  ;;  %v6430_v0 = vld [vmem:[#allocation42_spill] sm:$0xff] }
 0x95b   :  { %v5781_v24 = vmul.f32 %v6426_v12, %v3091_v55  ;;  %v5785_v2 = vmul.f32 %v6427_v29, %v3094_v54  ;;  %v6429_v55 = vperm.slane %v5665_v56, 5  ;;  %v2827_v54 = vpop.permute.xlu2 %2826  ;;  %v5802_v29 = vmul.f32 %v3162_v44, %v3109_v52 }
 0x95c   :  { %v5789_v5 = vmul.f32 %v3156_v61, %v3097_v17  ;;  %v2957_v60 = vperm.slane %v5604_v37, %v4016_v21  ;;  %v2952_v61 = vsel %vm122_vm3, %v2951_v38, %v2950_v36  ;;  %v2953_v17 = vperm.slane %v5592_v8, %v3946_v6 }
 0x95d   :  { %v5800_v12 = vmul.f32 %v6429_v55, %v3106_v19  ;;  %v3089_v19 = vmul.f32 %v5665_v56, %v6430_v0  ;;  %v3012_v18 = vsel %vm130_vm1, %v2952_v61, %v3011_v33  ;;  %v6431_v36 = vperm.slane %v5669_v62, 4  ;;  %v6432_v55 = vld [vmem:[#allocation43_spill] sm:$0xff] }
 0x95e   :  { %v6433_v33 = vperm.slane %v5669_v62, 6 }
 0x95f   :  { %3359 = vperm.xlu0 %3855, %v3218_v1   ;;  %v2956_v1 = vperm.slane %v2827_v54, %v3946_v6  ;;  %v3221_v52 = vmul.f32 %v6431_v36, %v3089_v19  ;;  %v3092_v54 = vmul.f32 %v5669_v62, %v6432_v55  ;;  %v6435_v36 = vperm.slane %v5669_v62, 7 }
 0x961   :  { %v2824_v58 = vpop.permute.xlu0 %2823  ;;  %v2958_v40 = vsel %vm122_vm3, %v2957_v60, %v2956_v1  ;;  %v3224_v61 = vmul.f32 %v6433_v33, %v3092_v54  ;;  %v2962_v1 = vperm.slane %v5617_v27, %v3946_v6  ;;  %v6436_v54 = vld [vmem:[#allocation45_spill] sm:$0xff]  ;;  %v6438_v33 = vld [vmem:[#allocation46_spill] sm:$0xff] }
 0x962   :  { %v2954_v11 = vperm.slane %v2824_v58, %v4016_v21  ;;  %v3098_v27 = vmul.f32 %v5669_v62, %v6436_v54  ;;  %v6446_v54 = vld [vmem:[#allocation41_spill] sm:$0xff] }
 0x963   :  { %v2836_v58 = vpop.permute.xlu2 %2835 }
 0x964   :  { %v2955_v44 = vsel %vm122_vm3, %v2954_v11, %v2953_v17  ;;  %v2960_v60 = vperm.slane %v2836_v58, %v4016_v21  ;;  %v6437_v58 = vperm.slane %v5665_v56, 1 }
 0x965   :  { %v3013_v37 = vsel %vm132_vm5, %v2955_v44, %v3012_v18  ;;  %v6434_v18 = vld [vmem:[#allocation44_spill] sm:$0xff] }
 0x966   :  { %v3014_v8 = vsel %vm134_vm6, %v2958_v40, %v3013_v37  ;;  %v3095_v44 = vmul.f32 %v5665_v56, %v6434_v18 }
 0x967   :  { %3368 = vperm.xlu0 %3855, %v3221_v52  }
 0x968   :  { %v3227_v52 = vmul.f32 %v6435_v36, %v3095_v44  ;;  %v6442_v44 = vld [vmem:[#allocation29_spill] sm:$0xff]  ;;  %v6444_v36 = vperm.slane %v5205_v45, 1 }
 0x969   :  { %v2833_v38 = vpop.permute.xlu0 %2832 }
 0x96a   :  { %v2959_v0 = vperm.slane %v2833_v38, %v3946_v6 }
 0x96c   :  { %v2961_v17 = vsel %vm122_vm3, %v2960_v60, %v2959_v0  ;;  %v3230_v0 = vmul.f32 %v6437_v58, %v3098_v27  ;;  %v6439_v60 = vld [vmem:[#allocation14_spill] sm:$0xff]  ;;  %v6447_v58 = vperm.slane %v5665_v56, 5 }
 0x96d   :  { %v3015_v37 = vsel %vm136_vm7, %v2961_v17, %v3014_v8  ;;  %v2181_v17 = vmul.f32 %v6439_v60, %v5347_v53  ;;  %v6450_v60 = vld [vmem:[#allocation21_spill] sm:$0xff] }
 0x96f   :  { %3377 = vperm.xlu0 %3855, %v3224_v61   ;;  %v3101_v61 = vmul.f32 %v5665_v56, %v6438_v33 }
 0x971   :  { %v2842_v11 = vpop.permute.xlu0 %2841  ;;  %v3233_v8 = vmul.f32 %v3158_v42, %v3101_v61  ;;  %v6449_v61 = vld [vmem:[#allocation19_spill] sm:$0xff] }
 0x972   :  { %v2963_v19 = vperm.slane %v2842_v11, %v4016_v21  ;;  %v6440_v11 = vperm.slane %v5205_v45, 0 }
 0x974   :  { %v2964_v40 = vsel %vm122_vm3, %v2963_v19, %v2962_v1  ;;  %v2313_v1 = vmul.f32 %v6440_v11, %v2181_v17  ;;  %v6441_v19 = vld [vmem:[#allocation40_spill] sm:$0xff]  ;;  %v2190_v17 = vmul.f32 %v6450_v60, %v5205_v45  ;;  %v6451_v11 = vperm.slane %v5205_v45, 4 }
 0x975   :  { %v3016_v38 = vsel %vm138_vm8, %v2964_v40, %v3015_v37  ;;  %v2184_v40 = vmul.f32 %v6442_v44, %v5205_v45  ;;  %v6443_v37 = vld [vmem:[#allocation50_spill] sm:$0xff]  ;;  %v6453_v44 = vld [vmem:[#allocation24_spill] sm:$0xff] }
 0x976   :  { %v3034_v55 = vsel %vm184_vm4, %v3016_v38, 0.0  ;;  %v5849_v18 = vmul.f32 %v6441_v19, %v2313_v1  ;;  %v3107_v42 = vmul.f32 %v5665_v56, %v6443_v37  ;;  %v6445_v38 = vld [vmem:[#allocation18_spill] sm:$0xff]  ;;  %v2322_v56 = vmul.f32 %v6451_v11, %v2190_v17  ;;  %v6452_v1 = vld [vmem:[#allocation47_spill] sm:$0xff] }
 0x977   :  { %3386 = vperm.xlu0 %3855, %v3227_v52   ;;  %3035 = vadd.xlane.f32.xlu2 %v3034_v55  ;;  %v2316_v52 = vmul.f32 %v6444_v36, %v2184_v40  ;;  %v2187_v55 = vmul.f32 %v6445_v38, %v5347_v53  ;;  %v2193_v40 = vmul.f32 %v6453_v44, %v5347_v53  ;;  %v6454_v37 = vperm.slane %v5205_v45, 6  ;;  %v6455_v36 = vld [vmem:[#allocation52_spill] sm:$0xff] }
 0x978   :  { %v5879_v19 = vmul.f32 %v6452_v1, %v2322_v56  ;;  %v6457_v38 = vld [vmem:[#allocation32_spill] sm:$0xff] }
 0x979   :  { %v5862_v27 = vmul.f32 %v6446_v54, %v2316_v52  ;;  %v6458_v54 = vperm.slane %v5669_v62, 2 }
 0x97f   :  { %3395 = vperm.xlu0 %3855, %v3230_v0   ;;  %v3239_v0 = vmul.f32 %v6447_v58, %v3107_v42  ;;  %v2325_v42 = vmul.f32 %v6454_v37, %v2193_v40 }
 0x981   :  { %v5887_v52 = vmul.f32 %v6455_v36, %v2325_v42 }
 0x987   :  { %3404 = vperm.xlu0 %3855, %v3233_v8  }
 0x98f   :  { %3413 = vperm.xlu0 %3855, %v5694_v16   ;;  %2844 = vperm.xlu2 %3856, %v5849_v18   ;;  %v6448_v16 = vperm.slane %v5205_v45, 3  ;;  %v6459_v45 = vld [vmem:[#allocation37_spill] sm:$0xff] }
 0x990   :  { %v3090_v58 = vmul.f32 %v5669_v62, %v6459_v45 }
 0x991   :  { %v2319_v33 = vmul.f32 %v6448_v16, %v2187_v55  ;;  %v3084_v55 = vmul.f32 %v5669_v62, %v6457_v38 }
 0x993   :  { %v5870_v8 = vmul.f32 %v6449_v61, %v2319_v33  ;;  %v3216_v53 = vmul.f32 %v6458_v54, %v3084_v55  ;;  %v2975_v54 = vperm.slane %v5647_v46, %v4016_v21  ;;  %v2980_v46 = vperm.slane %v5660_v28, %v3946_v6 }
 0x997   :  { %3422 = vperm.xlu0 %3855, %v3239_v0   ;;  %2853 = vperm.xlu2 %3856, %v5862_v27   ;;  %v6460_v0 = vperm.slane %v5669_v62, 5 }
 0x999   :  { %v3222_v16 = vmul.f32 %v6460_v0, %v3090_v58 }
 0x99f   :  { %3431 = vperm.xlu0 %3855, %v5704_v32   ;;  %2862 = vperm.xlu2 %3856, %v5870_v8   ;;  %v6456_v32 = vld [vmem:[#allocation51_spill] sm:$0xff] }
 0x9a7   :  { %2871 = vperm.xlu2 %3856, %v5879_v19  }
 0x9af   :  { %2880 = vperm.xlu2 %3856, %v5887_v52  }
 0x9b7   :  { %2889 = vperm.xlu2 %3856, %v6456_v32  }
 0x9bf   :  { %3341 = vperm.xlu2 %3856, %v5706_v3   ;;  %v2851_v3 = vpop.permute.xlu0 %2850 }
 0x9c7   :  { %3353 = vperm.xlu2 %3856, %v3216_v53   ;;  %v2860_v60 = vpop.permute.xlu0 %2859 }
 0x9c8   :  { %v2972_v62 = vperm.slane %v2860_v60, %v4016_v21 }
 0x9cf   :  { %3362 = vperm.xlu2 %3856, %v5710_v23   ;;  %v2869_v44 = vpop.permute.xlu0 %2868 }
 0x9d7   :  { %3371 = vperm.xlu2 %3856, %v3222_v16   ;;  %v2878_v0 = vpop.permute.xlu0 %2877 }
 0x9d8   :  { %v2981_v16 = vperm.slane %v2878_v0, %v4016_v21 }
 0x9df   :  { %3380 = vperm.xlu2 %3856, %v5722_v63   ;;  %v2966_v63 = vperm.slane %v5629_v26, %v4016_v21 }
 0x9e7   :  { %3389 = vperm.xlu2 %3856, %v5728_v20   ;;  %v2968_v20 = vperm.slane %v2851_v3, %v3946_v6 }
 0x9ea   :  { %v3036_v33 = vpop.xlane.xlu2 %3035 }
 0x9eb   :  { %3870 = vrsqrt.f32 %v3036_v33  ;;  %vm3066_vm13 = vweird.f32 %v3036_v33 }
 0x9ef   :  { %3398 = vperm.xlu2 %3856, %v5737_v48   ;;  %v2971_v48 = vperm.slane %v5635_v47, %v3946_v6 }
 0x9f1   :  { %v3871_v17 = vpop.eup %3870  ;;  %v2973_v37 = vsel %vm122_vm3, %v2972_v62, %v2971_v48  ;;  %v2982_v62 = vsel %vm122_vm3, %v2981_v16, %v2980_v46 }
 0x9f2   :  { %v2845_v61 = vpop.permute.xlu2 %2844  ;;  %v3061_v11 = vmul.f32 %v3871_v17, %v3036_v33  ;;  %vm3067_vm12 = vweird.f32 %v3871_v17  ;;  %v2984_v33 = vperm.slane %v5663_v57, %v4016_v21 }
 0x9f3   :  { %v2965_v23 = vperm.slane %v2845_v61, %v3946_v6  ;;  %v2977_v61 = vperm.slane %v2869_v44, %v3946_v6  ;;  %vm3068_vm14 = vmor %vm3066_vm13, %vm3067_vm12 }
 0x9f4   :  { %v3062_v42 = vmul.f32 %v3871_v17, %v3061_v11 }
 0x9f5   :  { %v2967_v40 = vsel %vm122_vm3, %v2966_v63, %v2965_v23  ;;  %v6461_v63 = vld [vmem:[#allocation53_spill] sm:$0xff] }
 0x9f6   :  { %v3063_v38 = vmul.f32 0.5, %v3062_v42 }
 0x9f7   :  { %3407 = vperm.xlu2 %3856, %v5744_v10  }
 0x9f8   :  { %v3064_v45 = vsub.f32 1.5, %v3063_v38 }
 0x9fa   :  { %v2854_v56 = vpop.permute.xlu2 %2853 }
 0x9fb   :  { %v2969_v1 = vperm.slane %v2854_v56, %v4016_v21 }
 0x9fd   :  { %v2970_v10 = vsel %vm122_vm3, %v2969_v1, %v2968_v20 }
 0x9fe   :  { %v3017_v36 = vsel %vm127_vm15, %v2970_v10, %v2967_v40 }
 0x9ff   :  { %3416 = vperm.xlu2 %3856, %v5746_v4   ;;  %v3018_v26 = vsel %vm128_vm0, %v2973_v37, %v3017_v36  ;;  %v3065_v4 = vmul.f32 %v3871_v17, %v3064_v45 }
 0xa01   :  { %v5932_v11 = vsel %vm3068_vm14, %v3871_v17, %v3065_v4 }
 0xa02   :  { %v2863_v55 = vpop.permute.xlu2 %2862  ;;  %v3114_v20 = vmul.f32 %v5932_v11, %v6461_v63  ;;  %v3165_v1 = vperm.slane %v5932_v11, 1  ;;  %v3166_v16 = vperm.slane %v5932_v11, 2  ;;  %v6464_v63 = vld [vmem:[#allocation56_spill] sm:$0xff] }
 0xa03   :  { %v2974_v47 = vperm.slane %v2863_v55, %v3946_v6 }
 0xa04   :  { %v3246_v44 = vmul.f32 %v3165_v1, %v3114_v20  ;;  %v3120_v20 = vmul.f32 %v5932_v11, %v6464_v63 }
 0xa05   :  { %v2976_v53 = vsel %vm122_vm3, %v2975_v54, %v2974_v47 }
 0xa06   :  { %v3019_v58 = vsel %vm130_vm1, %v2976_v53, %v3018_v26 }
 0xa07   :  { %3425 = vperm.xlu2 %3856, %v5753_v41  }
 0xa0a   :  { %v2872_v3 = vpop.permute.xlu2 %2871 }
 0xa0b   :  { %v2978_v60 = vperm.slane %v2872_v3, %v4016_v21  ;;  %v6463_v3 = vld [vmem:[#allocation54_spill] sm:$0xff] }
 0xa0d   :  { %v2979_v23 = vsel %vm122_vm3, %v2978_v60, %v2977_v61 }
 0xa0e   :  { %v3020_v41 = vsel %vm132_vm5, %v2979_v23, %v3019_v58  ;;  %v6462_v58 = vld [vmem:[#allocation55_spill] sm:$0xff] }
 0xa0f   :  { %3434 = vperm.xlu2 %3856, %v5755_v34   ;;  %v3021_v56 = vsel %vm134_vm6, %v2982_v62, %v3020_v41  ;;  %v2887_v34 = vpop.permute.xlu0 %2886 }
 0xa10   :  { %v2986_v37 = vperm.slane %v2887_v34, %v3946_v6 }
 0xa12   :  { %v2881_v28 = vpop.permute.xlu2 %2880 }
 0xa13   :  { %v2983_v48 = vperm.slane %v2881_v28, %v3946_v6  ;;  %v3168_v28 = vperm.slane %v5932_v11, 4 }
 0xa15   :  { %v2985_v17 = vsel %vm122_vm3, %v2984_v33, %v2983_v48  ;;  %v3167_v33 = vperm.slane %v5932_v11, 3 }
 0xa16   :  { %v3022_v40 = vsel %vm136_vm7, %v2985_v17, %v3021_v56 }
 0xa17   :  { %3443 = vperm.xlu2 %3856, %v3246_v44   ;;  %v3140_v44 = vmul.f32 %v5932_v11, %v5887_v52 }
 0xa1a   :  { %v2890_v10 = vpop.permute.xlu2 %2889 }
 0xa1b   :  { %v2987_v42 = vperm.slane %v2890_v10, %v4016_v21  ;;  %v3142_v10 = vmul.f32 %v5932_v11, %v5658_v25 }
 0xa1d   :  { %v2988_v36 = vsel %vm122_vm3, %v2987_v42, %v2986_v37 }
 0xa1e   :  { %v3023_v26 = vsel %vm138_vm8, %v2988_v36, %v3022_v40  ;;  %v3252_v40 = vmul.f32 %v3168_v28, %v3120_v20 }
 0xa1f   :  { %v3037_v57 = vsel %vm184_vm4, %v3023_v26, 0.0 }
 0xa20   :  { %3038 = vadd.xlane.f32.xlu1 %v3037_v57  ;;  %v6466_v57 = vld [vmem:[#allocation8_spill] sm:$0xff] }
 0xa39   :  { %3347 = vperm.xlu1 %3857, %v5757_v59   ;;  %v3112_v59 = vmul.f32 %v5932_v11, %v5567_v39 }
 0xa41   :  { %3356 = vperm.xlu1 %3857, %v5761_v13   ;;  %v3164_v13 = vperm.slane %v5932_v11, 0 }
 0xa49   :  { %3365 = vperm.xlu1 %3857, %v5765_v49   ;;  %v3244_v49 = vmul.f32 %v3164_v13, %v3112_v59 }
 0xa51   :  { %3374 = vperm.xlu1 %3857, %v5781_v24   ;;  %v5963_v24 = vpop.permute.xlu2 %3341 }
 0xa59   :  { %3383 = vperm.xlu1 %3857, %v5785_v2   ;;  %v5965_v2 = vpop.permute.xlu0 %3344 }
 0xa61   :  { %3392 = vperm.xlu1 %3857, %v5789_v5  }
 0xa69   :  { %3401 = vperm.xlu1 %3857, %v5791_v15   ;;  %v5967_v15 = vpop.permute.xlu2 %3353 }
 0xa71   :  { %3410 = vperm.xlu1 %3857, %v5793_v51   ;;  %v5969_v51 = vpop.permute.xlu0 %3350  ;;  %v5971_v54 = vpop.permute.xlu2 %3362 }
 0xa72   :  { %v3536_v63 = vperm.slane %v5969_v51, %v4016_v21 }
 0xa79   :  { %3419 = vperm.xlu1 %3857, %v5800_v12   ;;  %v5973_v47 = vpop.permute.xlu0 %3359  ;;  %v5984_v62 = vpop.permute.xlu2 %3371 }
 0xa81   :  { %3428 = vperm.xlu1 %3857, %v5802_v29   ;;  %v5986_v56 = vpop.permute.xlu0 %3368  ;;  %v6010_v26 = vpop.permute.xlu2 %3380 }
 0xa89   :  { %3437 = vperm.xlu1 %3857, %v3244_v49  }
 0xa93   :  { %v3039_v5 = vpop.xlane.xlu1 %3038 }
 0xa94   :  { %3872 = vrsqrt.f32 %v3039_v5  ;;  %vm3076_vm9 = vweird.f32 %v3039_v5 }
 0xa9a   :  { %v3873_v12 = vpop.eup %3872 }
 0xa9b   :  { %v3071_v38 = vmul.f32 %v3873_v12, %v3039_v5  ;;  %vm3077_vm2 = vweird.f32 %v3873_v12  ;;  %v6018_v5 = vpop.permute.xlu0 %3377 }
 0xa9c   :  { %vm3078_vm10 = vmor %vm3076_vm9, %vm3077_vm2 }
 0xa9d   :  { %v3072_v29 = vmul.f32 %v3873_v12, %v3071_v38 }
 0xa9f   :  { %v3073_v55 = vmul.f32 0.5, %v3072_v29 }
 0xaa1   :  { %v3074_v39 = vsub.f32 1.5, %v3073_v55 }
 0xaa3   :  { %v3075_v53 = vmul.f32 %v3873_v12, %v3074_v39  ;;  %v3387_v20 = vpop.permute.xlu0 %3386 }
 0xaa5   :  { %v5975_v45 = vsel %vm3078_vm10, %v3873_v12, %v3075_v53  ;;  %v3169_v12 = vperm.slane %v5932_v11, 5  ;;  %v6468_v53 = vld [vmem:[#allocation35_spill] sm:$0xff] }
 0xaa6   :  { %v3117_v0 = vmul.f32 %v5975_v45, %v6462_v58  ;;  %v3115_v4 = vmul.f32 %v5975_v45, %v5577_v43  ;;  %v3113_v61 = vmul.f32 %v5975_v45, %v6463_v3  ;;  %v3118_v43 = vmul.f32 %v5932_v11, %v5587_v35 }
 0xaa7   :  { %v3178_v17 = vperm.slane %v5975_v45, 6  ;;  %v3179_v37 = vperm.slane %v5975_v45, 7  ;;  %v3123_v25 = vmul.f32 %v5975_v45, %v6466_v57  ;;  %v3121_v59 = vmul.f32 %v5975_v45, %v5599_v31  ;;  %v6471_v57 = vld [vmem:[#allocation10_spill] sm:$0xff] }
 0xaa8   :  { %v3249_v60 = vmul.f32 %v3166_v16, %v3117_v0  ;;  %v3247_v46 = vmul.f32 %v3165_v1, %v3115_v4  ;;  %v3245_v23 = vmul.f32 %v3164_v13, %v3113_v61  ;;  %v6465_v1 = vld [vmem:[#allocation5_spill] sm:$0xff]  ;;  %v3250_v34 = vmul.f32 %v3167_v33, %v3118_v43  ;;  %v6467_v13 = vld [vmem:[#allocation6_spill] sm:$0xff]  ;;  %v6469_v4 = vld [vmem:[#allocation7_spill] sm:$0xff]  ;;  %v6029_v61 = vpop.permute.xlu2 %3389 }
 0xaa9   :  { %v3116_v48 = vmul.f32 %v5932_v11, %v6465_v1  ;;  %v6004_v35 = vmul.f32 %v3178_v17, %v3140_v44  ;;  %v6008_v36 = vmul.f32 %v3179_v37, %v3142_v10  ;;  %v3119_v49 = vmul.f32 %v5975_v45, %v6467_v13 }
 0xaaa   :  { %3452 = vperm.xlu2 %3856, %v3249_v60   ;;  %3446 = vperm.xlu1 %3857, %v3247_v46   ;;  %v3255_v38 = vmul.f32 %v3169_v12, %v3123_v25  ;;  %v3253_v29 = vmul.f32 %v3168_v28, %v3121_v59  ;;  %v3126_v58 = vmul.f32 %v5932_v11, %v6468_v53  ;;  %v3171_v0 = vperm.slane %v5932_v11, 7 }
 0xaab   :  { %3440 = vperm.xlu0 %3855, %v3245_v23   ;;  %v3348_v41 = vpop.permute.xlu1 %3347  ;;  %v3248_v42 = vmul.f32 %v3166_v16, %v3116_v48  ;;  %v3251_v55 = vmul.f32 %v3167_v33, %v3119_v49  ;;  %v3124_v31 = vmul.f32 %v5932_v11, %v5607_v50  ;;  %v3170_v16 = vperm.slane %v5932_v11, 6 }
 0xaac   :  { %v3122_v3 = vmul.f32 %v5932_v11, %v6469_v4  ;;  %v3535_v60 = vperm.slane %v3348_v41, %v3946_v6  ;;  %v3532_v46 = vperm.slane %v5963_v24, %v3946_v6  ;;  %v3258_v28 = vmul.f32 %v3171_v0, %v3126_v58  ;;  %v6071_v58 = vpop.permute.xlu0 %3395 }
 0xaad   :  { %v3256_v50 = vmul.f32 %v3170_v16, %v3124_v31  ;;  %v3533_v43 = vperm.slane %v5965_v2, %v4016_v21  ;;  %v3538_v33 = vperm.slane %v5967_v15, %v3946_v6  ;;  %v3542_v48 = vperm.slane %v5971_v54, %v4016_v21 }
 0xaae   :  { %v3254_v1 = vmul.f32 %v3169_v12, %v3122_v3  ;;  %v3537_v41 = vsel %vm122_vm3, %v3536_v63, %v3535_v60  ;;  %v3172_v10 = vperm.slane %v5975_v45, 0  ;;  %v3125_v25 = vmul.f32 %v5975_v45, %v6471_v57 }
 0xaaf   :  { %v3534_v24 = vsel %vm122_vm3, %v3533_v43, %v3532_v46  ;;  %v3541_v59 = vperm.slane %v5973_v47, %v3946_v6  ;;  %v3547_v13 = vperm.slane %v5984_v62, %v3946_v6  ;;  %v3550_v31 = vperm.slane %v6018_v5, %v3946_v6 }
 0xab0   :  { %v3628_v54 = vsel %vm127_vm15, %v3537_v41, %v3534_v24  ;;  %v3257_v53 = vmul.f32 %v3170_v16, %v3125_v25  ;;  %v3174_v60 = vperm.slane %v5975_v45, 2  ;;  %v3173_v16 = vperm.slane %v5975_v45, 1 }
 0xab1   :  { %v3128_v43 = vmul.f32 %v5932_v11, %v5849_v18  ;;  %v3133_v18 = vmul.f32 %v5975_v45, %v5228_v22  ;;  %v3176_v57 = vperm.slane %v5975_v45, 4  ;;  %v3136_v22 = vmul.f32 %v5932_v11, %v5642_v30 }
 0xab2   :  { %3461 = vperm.xlu2 %3856, %v3252_v40   ;;  %3455 = vperm.xlu1 %3857, %v3250_v34   ;;  %v6470_v34 = vld [vmem:[#allocation11_spill] sm:$0xff] }
 0xab3   :  { %3449 = vperm.xlu0 %3855, %v3248_v42   ;;  %v3357_v52 = vpop.permute.xlu1 %3356  ;;  %v3129_v15 = vmul.f32 %v5975_v45, %v6470_v34  ;;  %v3127_v42 = vmul.f32 %v5975_v45, %v5615_v7  ;;  %v3543_v7 = vsel %vm122_vm3, %v3542_v48, %v3541_v59  ;;  %v3260_v41 = vmul.f32 %v3172_v10, %v3128_v43  ;;  %v6474_v59 = vld [vmem:[#allocation17_spill] sm:$0xff] }
 0xab4   :  { %v3539_v23 = vperm.slane %v3357_v52, %v4016_v21  ;;  %v3545_v52 = vperm.slane %v5986_v56, %v4016_v21 }
 0xab6   :  { %v3540_v51 = vsel %vm122_vm3, %v3539_v23, %v3538_v33 }
 0xab7   :  { %v3629_v49 = vsel %vm128_vm0, %v3540_v51, %v3628_v54  ;;  %v3405_v51 = vpop.permute.xlu0 %3404  ;;  %v3177_v54 = vperm.slane %v5975_v45, 5 }
 0xab8   :  { %v3630_v47 = vsel %vm130_vm1, %v3543_v7, %v3629_v49 }
 0xaba   :  { %3470 = vperm.xlu2 %3856, %v3255_v38   ;;  %3464 = vperm.xlu1 %3857, %v3253_v29   ;;  %v6065_v38 = vpop.permute.xlu2 %3398  ;;  %v3261_v29 = vmul.f32 %v3172_v10, %v3129_v15  ;;  %v3265_v15 = vmul.f32 %v3174_v60, %v3133_v18 }
 0xabb   :  { %3458 = vperm.xlu0 %3855, %v3251_v55   ;;  %v3366_v39 = vpop.permute.xlu1 %3365  ;;  %v3259_v55 = vmul.f32 %v3171_v0, %v3127_v42  ;;  %v3554_v0 = vperm.slane %v3387_v20, %v4016_v21 }
 0xabc   :  { %v3544_v44 = vperm.slane %v3366_v39, %v3946_v6  ;;  %v3551_v39 = vperm.slane %v6010_v26, %v4016_v21 }
 0xabe   :  { %v3546_v12 = vsel %vm122_vm3, %v3545_v52, %v3544_v44  ;;  %v3552_v46 = vsel %vm122_vm3, %v3551_v39, %v3550_v31  ;;  %v3139_v39 = vmul.f32 %v5975_v45, %v5650_v9  ;;  %v3560_v9 = vperm.slane %v6065_v38, %v4016_v21 }
 0xabf   :  { %v3631_v62 = vsel %vm132_vm5, %v3546_v12, %v3630_v47  ;;  %v3414_v25 = vpop.permute.xlu0 %3413  ;;  %v3268_v12 = vmul.f32 %v3176_v57, %v3136_v22  ;;  %v3137_v47 = vmul.f32 %v5975_v45, %v5879_v19 }
 0xac1   :  { %v3269_v31 = vmul.f32 %v3176_v57, %v3137_v47 }
 0xac2   :  { %3479 = vperm.xlu2 %3856, %v3258_v28   ;;  %3473 = vperm.xlu1 %3857, %v3256_v50   ;;  %v6472_v28 = vld [vmem:[#allocation15_spill] sm:$0xff]  ;;  %v3130_v50 = vmul.f32 %v5932_v11, %v5626_v14  ;;  %v3408_v24 = vpop.permute.xlu2 %3407  ;;  %v6473_v14 = vld [vmem:[#allocation38_spill] sm:$0xff] }
 0xac3   :  { %3467 = vperm.xlu0 %3855, %v3254_v1   ;;  %v3375_v40 = vpop.permute.xlu1 %3374  ;;  %v3132_v5 = vmul.f32 %v5932_v11, %v6472_v28  ;;  %v3135_v44 = vmul.f32 %v5975_v45, %v6473_v14 }
 0xac4   :  { %v3548_v2 = vperm.slane %v3375_v40, %v4016_v21  ;;  %v3262_v1 = vmul.f32 %v3173_v16, %v3130_v50  ;;  %v3175_v40 = vperm.slane %v5975_v45, 3 }
 0xac5   :  { %v3264_v33 = vmul.f32 %v3174_v60, %v3132_v5  ;;  %v3565_v60 = vperm.slane %v3408_v24, %v3946_v6 }
 0xac6   :  { %v3549_v56 = vsel %vm122_vm3, %v3548_v2, %v3547_v13  ;;  %v3131_v2 = vmul.f32 %v5975_v45, %v5862_v27  ;;  %v3267_v34 = vmul.f32 %v3175_v40, %v3135_v44  ;;  %v3138_v13 = vmul.f32 %v5932_v11, %v6474_v59 }
 0xac7   :  { %v3632_v4 = vsel %vm134_vm6, %v3549_v56, %v3631_v62  ;;  %v3134_v27 = vmul.f32 %v5932_v11, %v5870_v8  ;;  %v3271_v11 = vmul.f32 %v3177_v54, %v3139_v39 }
 0xac8   :  { %v3633_v63 = vsel %vm136_vm7, %v3552_v46, %v3632_v4  ;;  %v3263_v10 = vmul.f32 %v3173_v16, %v3131_v2  ;;  %v3270_v49 = vmul.f32 %v3177_v54, %v3138_v13 }
 0xac9   :  { %v3266_v7 = vmul.f32 %v3175_v40, %v3134_v27 }
 0xaca   :  { %3488 = vperm.xlu2 %3856, %v3261_v29   ;;  %3482 = vperm.xlu1 %3857, %v3259_v55   ;;  %v3417_v52 = vpop.permute.xlu2 %3416  ;;  %v6475_v29 = vld [vmem:[#allocation49_spill] sm:$0xff] }
 0xacb   :  { %3476 = vperm.xlu0 %3855, %v3257_v53   ;;  %v3384_v3 = vpop.permute.xlu1 %3383  ;;  %v3141_v55 = vmul.f32 %v5975_v45, %v6475_v29  ;;  %v3423_v53 = vpop.permute.xlu0 %3422 }
 0xacc   :  { %v3553_v26 = vperm.slane %v3384_v3, %v3946_v6  ;;  %v3556_v3 = vperm.slane %v6029_v61, %v3946_v6  ;;  %v3572_v50 = vperm.slane %v3423_v53, %v4016_v21 }
 0xacd   :  { %v3273_v8 = vmul.f32 %v3178_v17, %v3141_v55  ;;  %v3563_v17 = vperm.slane %v3405_v51, %v4016_v21 }
 0xace   :  { %v3555_v23 = vsel %vm122_vm3, %v3554_v0, %v3553_v26  ;;  %v3559_v26 = vperm.slane %v6071_v58, %v3946_v6 }
 0xacf   :  { %v3634_v20 = vsel %vm138_vm8, %v3555_v23, %v3633_v63  ;;  %v3569_v63 = vperm.slane %v3417_v52, %v4016_v21 }
 0xad0   :  { %3660 = vst.msk [vmem:[%s6234_s2] sm:$0xff] %vm184_vm4, %v3634_v20  ;;  %v3561_v61 = vsel %vm122_vm3, %v3560_v9, %v3559_v26  ;;  %v3568_v20 = vperm.slane %v3414_v25, %v3946_v6 }
 0xad2   :  { %3497 = vperm.xlu2 %3856, %v3264_v33   ;;  %3491 = vperm.xlu1 %3857, %v3262_v1   ;;  %v3426_v30 = vpop.permute.xlu2 %3425 }
 0xad3   :  { %3485 = vperm.xlu0 %3855, %v3260_v41   ;;  %v3393_v48 = vpop.permute.xlu1 %3392  ;;  %v3432_v43 = vpop.permute.xlu0 %3431  ;;  %v3574_v51 = vperm.slane %v3426_v30, %v3946_v6 }
 0xad4   :  { %v3557_v62 = vperm.slane %v3393_v48, %v4016_v21  ;;  %v3570_v48 = vsel %vm122_vm3, %v3569_v63, %v3568_v20  ;;  %v3577_v44 = vperm.slane %v3432_v43, %v3946_v6 }
 0xad6   :  { %v3558_v16 = vsel %vm122_vm3, %v3557_v62, %v3556_v3 }
 0xad7   :  { %v3635_v5 = vsel %vm127_vm15, %v3561_v61, %v3558_v16 }
 0xada   :  { %3506 = vperm.xlu2 %3856, %v3267_v34   ;;  %3500 = vperm.xlu1 %3857, %v3265_v15   ;;  %v3435_v28 = vpop.permute.xlu2 %3434 }
 0xadb   :  { %3494 = vperm.xlu0 %3855, %v3263_v10   ;;  %v3402_v42 = vpop.permute.xlu1 %3401  ;;  %v3578_v1 = vperm.slane %v3435_v28, %v4016_v21 }
 0xadc   :  { %v3562_v4 = vperm.slane %v3402_v42, %v3946_v6 }
 0xade   :  { %v3564_v46 = vsel %vm122_vm3, %v3563_v17, %v3562_v4 }
 0xadf   :  { %v3636_v58 = vsel %vm128_vm0, %v3564_v46, %v3635_v5 }
 0xae2   :  { %3515 = vperm.xlu2 %3856, %v3270_v49   ;;  %3509 = vperm.xlu1 %3857, %v3268_v12  }
 0xae3   :  { %3503 = vperm.xlu0 %3855, %v3266_v7   ;;  %v3411_v56 = vpop.permute.xlu1 %3410 }
 0xae4   :  { %v3566_v19 = vperm.slane %v3411_v56, %v4016_v21 }
 0xae6   :  { %v3567_v23 = vsel %vm122_vm3, %v3566_v19, %v3565_v60 }
 0xae7   :  { %v3637_v33 = vsel %vm130_vm1, %v3567_v23, %v3636_v58 }
 0xae8   :  { %v3638_v40 = vsel %vm132_vm5, %v3570_v48, %v3637_v33 }
 0xaea   :  { %3524 = vperm.xlu2 %3856, %v3273_v8   ;;  %3518 = vperm.xlu1 %3857, %v3271_v11  }
 0xaeb   :  { %3512 = vperm.xlu0 %3855, %v3269_v31   ;;  %v3420_v0 = vpop.permute.xlu1 %3419 }
 0xaec   :  { %v3571_v38 = vperm.slane %v3420_v0, %v3946_v6 }
 0xaee   :  { %v3573_v41 = vsel %vm122_vm3, %v3572_v50, %v3571_v38 }
 0xaef   :  { %v3639_v18 = vsel %vm134_vm6, %v3573_v41, %v3638_v40 }
 0xaf2   :  { %3527 = vperm.xlu1 %3857, %v6008_v36   ;;  %v3143_v36 = vmul.f32 %v5975_v45, %v6456_v32  ;;  %v3444_v32 = vpop.permute.xlu2 %3443 }
 0xaf3   :  { %3521 = vperm.xlu0 %3855, %v6004_v35   ;;  %v3429_v24 = vpop.permute.xlu1 %3428  ;;  %v3579_v35 = vsel %vm122_vm3, %v3578_v1, %v3577_v44 }
 0xaf4   :  { %v3575_v14 = vperm.slane %v3429_v24, %v4016_v21  ;;  %v3275_v10 = vmul.f32 %v3179_v37, %v3143_v36  ;;  %v3583_v37 = vperm.slane %v3444_v32, %v3946_v6 }
 0xaf6   :  { %v3576_v2 = vsel %vm122_vm3, %v3575_v14, %v3574_v51 }
 0xaf7   :  { %v3640_v34 = vsel %vm136_vm7, %v3576_v2, %v3639_v18 }
 0xaf8   :  { %v3641_v15 = vsel %vm138_vm8, %v3579_v35, %v3640_v34 }
 0xaf9   :  { %3661 = vst.msk [vmem:[%s6234_s2 + $0x8] sm:$0xff] %vm184_vm4, %v3641_v15 }
 0xafb   :  { %3530 = vperm.xlu0 %3855, %v3275_v10   ;;  %v3438_v42 = vpop.permute.xlu1 %3437 }
 0xafc   :  { %v3580_v29 = vperm.slane %v3438_v42, %v3946_v6 }
 0xb04   :  { %v3453_v52 = vpop.permute.xlu2 %3452 }
 0xb05   :  { %v3587_v47 = vperm.slane %v3453_v52, %v4016_v21 }
 0xb0c   :  { %v3462_v25 = vpop.permute.xlu2 %3461 }
 0xb0d   :  { %v3592_v9 = vperm.slane %v3462_v25, %v3946_v6 }
 0xb14   :  { %v3471_v22 = vpop.permute.xlu2 %3470 }
 0xb15   :  { %v3596_v0 = vperm.slane %v3471_v22, %v4016_v21 }
 0xb1c   :  { %v3447_v54 = vpop.permute.xlu1 %3446  ;;  %v3480_v30 = vpop.permute.xlu2 %3479 }
 0xb1d   :  { %v3441_v57 = vpop.permute.xlu0 %3440  ;;  %v3584_v12 = vperm.slane %v3447_v54, %v4016_v21  ;;  %v3601_v46 = vperm.slane %v3480_v30, %v3946_v6 }
 0xb1e   :  { %v3581_v7 = vperm.slane %v3441_v57, %v4016_v21 }
 0xb1f   :  { %v3585_v53 = vsel %vm122_vm3, %v3584_v12, %v3583_v37 }
 0xb20   :  { %v3582_v8 = vsel %vm122_vm3, %v3581_v7, %v3580_v29 }
 0xb21   :  { %v3642_v19 = vsel %vm127_vm15, %v3585_v53, %v3582_v8 }
 0xb24   :  { %v3456_v59 = vpop.permute.xlu1 %3455  ;;  %v3489_v58 = vpop.permute.xlu2 %3488 }
 0xb25   :  { %v3450_v13 = vpop.permute.xlu0 %3449  ;;  %v3589_v11 = vperm.slane %v3456_v59, %v3946_v6  ;;  %v3605_v42 = vperm.slane %v3489_v58, %v4016_v21 }
 0xb26   :  { %v3586_v56 = vperm.slane %v3450_v13, %v3946_v6 }
 0xb28   :  { %v3588_v62 = vsel %vm122_vm3, %v3587_v47, %v3586_v56 }
 0xb29   :  { %v3643_v17 = vsel %vm128_vm0, %v3588_v62, %v3642_v19 }
 0xb2c   :  { %v3465_v27 = vpop.permute.xlu1 %3464  ;;  %v3498_v48 = vpop.permute.xlu2 %3497 }
 0xb2d   :  { %v3459_v49 = vpop.permute.xlu0 %3458  ;;  %v3593_v31 = vperm.slane %v3465_v27, %v4016_v21  ;;  %v3610_v57 = vperm.slane %v3498_v48, %v3946_v6 }
 0xb2e   :  { %v3590_v55 = vperm.slane %v3459_v49, %v4016_v21 }
 0xb2f   :  { %v3594_v26 = vsel %vm122_vm3, %v3593_v31, %v3592_v9 }
 0xb30   :  { %v3591_v4 = vsel %vm122_vm3, %v3590_v55, %v3589_v11 }
 0xb31   :  { %v3644_v60 = vsel %vm130_vm1, %v3591_v4, %v3643_v17 }
 0xb32   :  { %v3645_v5 = vsel %vm132_vm5, %v3594_v26, %v3644_v60 }
 0xb34   :  { %v3474_v45 = vpop.permute.xlu1 %3473  ;;  %v3507_v44 = vpop.permute.xlu2 %3506 }
 0xb35   :  { %v3468_v39 = vpop.permute.xlu0 %3467  ;;  %v3598_v63 = vperm.slane %v3474_v45, %v3946_v6  ;;  %v3614_v13 = vperm.slane %v3507_v44, %v4016_v21 }
 0xb36   :  { %v3595_v3 = vperm.slane %v3468_v39, %v3946_v6 }
 0xb38   :  { %v3597_v61 = vsel %vm122_vm3, %v3596_v0, %v3595_v3 }
 0xb39   :  { %v3646_v20 = vsel %vm134_vm6, %v3597_v61, %v3645_v5 }
 0xb3c   :  { %v3483_v16 = vpop.permute.xlu1 %3482  ;;  %v3516_v2 = vpop.permute.xlu2 %3515 }
 0xb3d   :  { %v3602_v23 = vperm.slane %v3483_v16, %v4016_v21  ;;  %v3477_v38 = vpop.permute.xlu0 %3476  ;;  %v3619_v55 = vperm.slane %v3516_v2, %v3946_v6 }
 0xb3e   :  { %v3599_v28 = vperm.slane %v3477_v38, %v4016_v21 }
 0xb3f   :  { %v3603_v50 = vsel %vm122_vm3, %v3602_v23, %v3601_v46 }
 0xb40   :  { %v3600_v43 = vsel %vm122_vm3, %v3599_v28, %v3598_v63 }
 0xb41   :  { %v3647_v33 = vsel %vm136_vm7, %v3600_v43, %v3646_v20 }
 0xb42   :  { %v3648_v1 = vsel %vm138_vm8, %v3603_v50, %v3647_v33 }
 0xb43   :  { %3662 = vst.msk [vmem:[%s6234_s2 + $0x10] sm:$0xff] %vm184_vm4, %v3648_v1 }
 0xb44   :  { %v3492_v41 = vpop.permute.xlu1 %3491  ;;  %v3525_v7 = vpop.permute.xlu2 %3524 }
 0xb45   :  { %v3486_v24 = vpop.permute.xlu0 %3485  ;;  %v3607_v15 = vperm.slane %v3492_v41, %v3946_v6  ;;  %v3623_v47 = vperm.slane %v3525_v7, %v4016_v21 }
 0xb46   :  { %v3604_v10 = vperm.slane %v3486_v24, %v3946_v6 }
 0xb48   :  { %v3606_v22 = vsel %vm122_vm3, %v3605_v42, %v3604_v10 }
 0xb4c   :  { %v3501_v51 = vpop.permute.xlu1 %3500 }
 0xb4d   :  { %v3495_v14 = vpop.permute.xlu0 %3494  ;;  %v3611_v32 = vperm.slane %v3501_v51, %v4016_v21 }
 0xb4e   :  { %v3608_v35 = vperm.slane %v3495_v14, %v4016_v21 }
 0xb4f   :  { %v3612_v27 = vsel %vm122_vm3, %v3611_v32, %v3610_v57 }
 0xb50   :  { %v3609_v52 = vsel %vm122_vm3, %v3608_v35, %v3607_v15 }
 0xb51   :  { %v3649_v49 = vsel %vm127_vm15, %v3609_v52, %v3606_v22 }
 0xb52   :  { %v3650_v39 = vsel %vm128_vm0, %v3612_v27, %v3649_v49 }
 0xb54   :  { %v3510_v36 = vpop.permute.xlu1 %3509 }
 0xb55   :  { %v3504_v40 = vpop.permute.xlu0 %3503  ;;  %v3616_v12 = vperm.slane %v3510_v36, %v3946_v6 }
 0xb56   :  { %v3613_v54 = vperm.slane %v3504_v40, %v3946_v6 }
 0xb58   :  { %v3615_v56 = vsel %vm122_vm3, %v3614_v13, %v3613_v54 }
 0xb59   :  { %v3651_v30 = vsel %vm130_vm1, %v3615_v56, %v3650_v39 }
 0xb5c   :  { %v3519_v34 = vpop.permute.xlu1 %3518 }
 0xb5d   :  { %v3513_v18 = vpop.permute.xlu0 %3512  ;;  %v3620_v45 = vperm.slane %v3519_v34, %v4016_v21 }
 0xb5e   :  { %v3617_v25 = vperm.slane %v3513_v18, %v4016_v21 }
 0xb5f   :  { %v3621_v8 = vsel %vm122_vm3, %v3620_v45, %v3619_v55 }
 0xb60   :  { %v3618_v37 = vsel %vm122_vm3, %v3617_v25, %v3616_v12 }
 0xb61   :  { %v3652_v11 = vsel %vm132_vm5, %v3618_v37, %v3651_v30 }
 0xb62   :  { %v3653_v9 = vsel %vm134_vm6, %v3621_v8, %v3652_v11 }
 0xb64   :  { %v3528_v53 = vpop.permute.xlu1 %3527 }
 0xb65   :  { %v3522_v59 = vpop.permute.xlu0 %3521  ;;  %v3625_v4 = vperm.slane %v3528_v53, %v3946_v6 }
 0xb66   :  { %v3622_v29 = vperm.slane %v3522_v59, %v3946_v6 }
 0xb68   :  { %v3624_v62 = vsel %vm122_vm3, %v3623_v47, %v3622_v29 }
 0xb69   :  { %v3654_v19 = vsel %vm136_vm7, %v3624_v62, %v3653_v9 }
 0xb6d   :  { %v3531_v31 = vpop.permute.xlu0 %3530 }
 0xb6e   :  { %v3626_v3 = vperm.slane %v3531_v31, %v4016_v21 }
 0xb70   :  { %v3627_v0 = vsel %vm122_vm3, %v3626_v3, %v3625_v4 }
 0xb71   :  { %v3655_v17 = vsel %vm138_vm8, %v3627_v0, %v3654_v19 }
 0xb72   :  { %3663 = vst.msk [vmem:[%s6234_s2 + $0x18] sm:$0xff] %vm184_vm4, %v3655_v17 }

// kernel: soft_label_propagation.13
= control target key start
LH: loop header
LB: loop body
LE: loop exit
PB: predicated region body
PF: predicated region fallthrough
CT: control target
= control target key end

     0   :  { %vm22_vm0 = vcmask 130048   ;;  %s179_s0 = inlined_call_operand.vmem [shape: f32[2,4,16], index: 0, kind: input, shape index: {}]   ;;  %s180_s1 = inlined_call_operand.vmem [shape: bf16[2,16,16], index: 1, kind: input, shape index: {}]   ;;  %s181_s2 = inlined_call_operand.hbm [shape: f32[2,4,16], index: 2, kind: output, shape index: {}]  }
   0x1   :  { %v109_v0 = vld [vmem:[%s180_s1] sm:$0xff]   ;;  %v116_v1 = vld [vmem:[%s180_s1 + $0x8] sm:$0xff]  }
   0x2   :  { %v111_v2 = vunpack.c.h.bf16 %v109_v0  ;;  %v115_v3 = vunpack.c.h.bf16 %v116_v1 }
   0x3   :  { %7 = vsyncpa [#allocation3], 0  ;;  %v110_v4 = vunpack.c.l.bf16 %v109_v0  ;;  %v114_v5 = vunpack.c.l.bf16 %v116_v1  ;;  %v12_v6 = vld [vmem:[%s179_s0] sm:$0xf]  ;;  %v13_v7 = vld [vmem:[%s179_s0 + $0x4] sm:$0xf] }
   0x4   :  { %102 = vmatpush.xpose.msk.msra.mxu0 %vm22_vm0, %v111_v2  ;;  %105 = vmatpush.xpose.msk.msra.mxu1 %vm22_vm0, %v115_v3  ;;  %s146_s1 = smov [#allocation2]   ;;  %s90_s20 = sshll.u32 %s181_s2, 4  ;;  %vm81_vm1 = vcmask 125952   ;;  %s91_s20 = int_to_ptr.hbm [resolvable:$true] %s90_s20 }
   0x5   :  { %s88_s17 = sshll.u32 %s146_s1, 4  ;;  %s147_s21 = smov 64   ;;  %s89_s17 = int_to_ptr.vmem [resolvable:$true] %s88_s17 }
   0x6   :  { %s148_s22 = smov 4  }
   0x8   :  { %103 = vmatpush.xpose.msk.msra.mxu0 %vm22_vm0, %v110_v4  ;;  %106 = vmatpush.xpose.msk.msra.mxu1 %vm22_vm0, %v114_v5 }
   0xb   :  { %104 = vmatmul.msk.f32.vlgmr.msra.gmra.mxu0 %vm22_vm0, %v12_v6  ;;  %107 = vmatmul.msk.f32.vlgmr.msra.gmra.mxu1 %vm22_vm0, %v13_v7 }
  0x88   :  { %v49_v8 = vpop.f32.mrf.mxu0  ;;  %v78_v9 = vpop.f32.mrf.mxu1 }
  0x89   :  { %82 = vst.msk [vmem:[#allocation2] sm:$0xf] %vm81_vm1, %v49_v8 }
  0x8a   :  { %83 = vst.msk [vmem:[#allocation2 + $0x4] sm:$0xf] %vm81_vm1, %v78_v9 }
  0x8b   :  { %96 = dma.vmem_to_hbm [thread:$0]  %s89_s17, 128, %s91_s20, [#allocation3], %s147_s21, %s147_s21, %s148_s22  }
  0x8c   :  { %144 = dma.done.wait [#allocation3], 128  }
  0x8d   :  { %145 = vsyncadd [#allocation3], 4294967168 }
  0x8e   :  { %101 = vsyncpa [#allocation3], 1 }

// kernel: soft_label_propagation.14
= control target key start
LH: loop header
LB: loop body
LE: loop exit
PB: predicated region body
PF: predicated region fallthrough
CT: control target
= control target key end

     0   :  { %8 = vsyncpa [#allocation3], 0  ;;  %s171_s15 = smov [#allocation2]   ;;  %s172_s17 = smov 64   ;;  %s225_s0 = inlined_call_operand.hbm [shape: f32[2,4,16], index: 0, kind: input, shape index: {}]   ;;  %s226_s1 = inlined_call_operand.vmem [shape: f32[2,16,32], index: 1, kind: input, shape index: {}]   ;;  %s227_s2 = inlined_call_operand.vmem [shape: f32[2,4,32], index: 2, kind: input, shape index: {}]   ;;  %s228_s3 = inlined_call_operand.vmem [shape: f32[2,4,32], index: 3, kind: output, shape index: {}]  }
   0x1   :  { %s13_s14 = sshll.u32 %s225_s0, 4  ;;  %s15_s16 = sshll.u32 %s171_s15, 4  ;;  %s14_s14 = int_to_ptr.hbm [resolvable:$true] %s13_s14  ;;  %s16_s16 = int_to_ptr.vmem [resolvable:$true] %s15_s16 }
   0x2   :  { %s173_s18 = smov 4  }
   0x3   :  { %21 = dma.hbm_to_vmem [thread:$0]  %s14_s14, 128, %s16_s16, [#allocation3], %s172_s17, %s172_s17, %s173_s18  }
   0x4   :  { %169 = dma.done.wait [#allocation3], 128  }
   0x5   :  { %170 = vsyncadd [#allocation3], 4294967168  ;;  %vm85_vm0 = vcmask 125952   ;;  %v30_v0 = vld [vmem:[#allocation2] sm:$0xf]  ;;  %v33_v1 = vld [vmem:[%s226_s1 + $0x8] sm:$0xff] }
   0x6   :  { %v32_v2 = vld [vmem:[%s226_s1] sm:$0xff]  ;;  %v86_v3 = vsel %vm85_vm0, %v30_v0, 0.0  ;;  %56 = vmatpush.msra.mxu0 %v33_v1  ;;  %vm38_vm1 = vcmask 130048   ;;  %v35_v4 = vld [vmem:[%s226_s1 + $0x18] sm:$0xff]  ;;  %v34_v5 = vld [vmem:[%s226_s1 + $0x10] sm:$0xff]  ;;  %vm128_vm7 = vcmask 257024  }
   0x7   :  { %87 = vadd.xlane.f32.xlu0 %v86_v3  ;;  %79 = vmatpush.msra.mxu1 %v35_v4  ;;  %v31_v6 = vld [vmem:[#allocation2 + $0x4] sm:$0xf]  ;;  %v36_v18 = vld [vmem:[%s227_s2] sm:$0xf] }
   0x8   :  { %57 = vmatpush.msra.mxu0 %v32_v2  ;;  %v89_v7 = vsel %vm85_vm0, %v31_v6, 0.0  ;;  %v92_v25 = vmul.f32 0.4, %v36_v18  ;;  %v37_v33 = vld [vmem:[%s227_s2 + $0x4] sm:$0xf] }
   0x9   :  { %136 = vmatmul.msk.f32.vlgmr.msra.gmra.mxu0 %vm38_vm1, %v30_v0  ;;  %80 = vmatpush.msra.mxu1 %v34_v5  ;;  %v93_v38 = vmul.f32 0.4, %v37_v33 }
   0xa   :  { %137 = vmatmul.msk.f32.vlgmr.msra.gmra.mxu1 %vm38_vm1, %v31_v6 }
   0xf   :  { %90 = vadd.xlane.f32.xlu0 %v89_v7 }
  0x7a   :  { %v88_v8 = vpop.xlane.xlu0 %87 }
  0x7b   :  { %141 = vrcp.f32 %v88_v8  ;;  %v105_v13 = vand.u32 2147483648, %v88_v8  ;;  %v103_v15 = vand.u32 2147483647, %v88_v8  ;;  %vm99_vm3 = vweird.f32 %v88_v8 }
  0x7d   :  { %v106_v20 = vor.u32 1.1754944e-38, %v105_v13  ;;  %vm104_vm5 = vcmp.eq.f32.partialorder %v103_v15, 8.507059e+37 }
  0x81   :  { %v142_v9 = vpop.eup %141 }
  0x82   :  { %v95_v10 = vmul.f32 %v142_v9, %v88_v8  ;;  %v91_v11 = vpop.xlane.xlu0 %90  ;;  %vm100_vm2 = vweird.f32 %v142_v9 }
  0x83   :  { %143 = vrcp.f32 %v91_v11  ;;  %vm101_vm4 = vmor %vm99_vm3, %vm100_vm2  ;;  %v120_v27 = vand.u32 2147483648, %v91_v11  ;;  %v118_v30 = vand.u32 2147483647, %v91_v11  ;;  %vm114_vm8 = vweird.f32 %v91_v11 }
  0x84   :  { %v96_v12 = vsub.f32 1.0, %v95_v10 }
  0x85   :  { %v121_v35 = vor.u32 1.1754944e-38, %v120_v27  ;;  %vm119_vm10 = vcmp.eq.f32.partialorder %v118_v30, 8.507059e+37 }
  0x86   :  { %v97_v14 = vmul.f32 %v142_v9, %v96_v12  ;;  %v59_v19 = vpop.f32.mrf.mxu0 }
  0x87   :  { %v82_v34 = vpop.f32.mrf.mxu1 }
  0x88   :  { %v98_v16 = vadd.f32 %v142_v9, %v97_v14 }
  0x89   :  { %v144_v17 = vpop.eup %143 }
  0x8a   :  { %v110_v21 = vmul.f32 %v144_v17, %v91_v11  ;;  %v102_v22 = vsel %vm101_vm4, %v142_v9, %v98_v16  ;;  %vm115_vm6 = vweird.f32 %v144_v17 }
  0x8b   :  { %v107_v23 = vsel %vm104_vm5, %v106_v20, %v102_v22  ;;  %vm116_vm9 = vmor %vm114_vm8, %vm115_vm6 }
  0x8c   :  { %v111_v24 = vsub.f32 1.0, %v110_v21  ;;  %v108_v26 = vmul.f32 %v107_v23, %v59_v19 }
  0x8e   :  { %v112_v28 = vmul.f32 %v144_v17, %v111_v24  ;;  %v124_v29 = vmul.f32 0.6, %v108_v26 }
  0x90   :  { %v126_v31 = vadd.f32 %v124_v29, %v92_v25  ;;  %v113_v32 = vadd.f32 %v144_v17, %v112_v28 }
  0x92   :  { %129 = vst.msk [vmem:[%s228_s3] sm:$0xf] %vm128_vm7, %v126_v31  ;;  %v117_v36 = vsel %vm116_vm9, %v144_v17, %v113_v32 }
  0x93   :  { %v122_v37 = vsel %vm119_vm10, %v121_v35, %v117_v36 }
  0x94   :  { %v123_v39 = vmul.f32 %v122_v37, %v82_v34 }
  0x96   :  { %v125_v40 = vmul.f32 0.6, %v123_v39 }
  0x98   :  { %v127_v41 = vadd.f32 %v125_v40, %v93_v38 }
  0x9a   :  { %130 = vst.msk [vmem:[%s228_s3 + $0x4] sm:$0xf] %vm128_vm7, %v127_v41 }
  0x9b   :  { %135 = vsyncpa [#allocation3], 1 }

</bundles_post_ra>
